<compile_context>
chip_gen: v6e
topology: v6e:2x2x1
jax: 0.10.0
libtpu: 0.0.40
codegen_flags: <defaults>
</compile_context>

<pallas_src>
import functools
import math

import jax
import jax.numpy as jnp
from jax import lax
from jax.experimental import pallas as pl
from jax.experimental.pallas import tpu as pltpu


def _round_up(x, m):
    return ((x + m - 1) // m) * m


def _exact_gelu(x):
    # PyTorch F.gelu default (approximate='none'): 0.5*x*(1+erf(x/sqrt(2)))
    return 0.5 * x * (1.0 + lax.erf(x * (1.0 / math.sqrt(2.0))))


def _pad_to(a, rows, cols):
    pr, pc = rows - a.shape[0], cols - a.shape[1]
    if pr or pc:
        a = jnp.pad(a, ((0, pr), (0, pc)))
    return a


def _resident_spec(shape):
    """Weight/bias spec: constant block index (VMEM-resident) and, when the
    running JAX supports it, a single pipeline buffer (no dead second copy)."""
    nd = len(shape)
    index_map = lambda i: (0,) * nd
    try:
        return pl.BlockSpec(shape, index_map, pipeline_mode=pl.Buffered(1))
    except (TypeError, AttributeError):
        return pl.BlockSpec(shape, index_map)


def _mmser_kernel(
    xt_ref,            # (TM, Dt)    text embeddings, f32
    xa_ref,            # (TM, Da)    audio embeddings, f32
    w0t_ref, w0a_ref,  # (Dt, 1024) / (Da, 1024)  bf16, BatchNorm folded in
    b0_ref,            # (1, 1024)   f32, BatchNorm folded in
    w1_ref, b1_ref,    # (1024, 256) bf16, (1, 256) f32
    w2_ref, b2_ref,    # (256, 128)  bf16, (1, 128) f32
    w3_ref, b3_ref,    # (128, 128)  f32,  (1, 128) f32
    logits_ref,        # (TM, 128)   lane-dense padded logits
    softmax_ref,       # (TM, 128)   lane-dense padded probabilities
    *, num_classes,
):
    bf16, f32 = jnp.bfloat16, jnp.float32

    # ---- projection: Linear(960->960) (BatchNorm pre-folded) + GELU ----
    h = (
        jnp.dot(xt_ref[...].astype(bf16), w0t_ref[...], preferred_element_type=f32)
        + jnp.dot(xa_ref[...].astype(bf16), w0a_ref[...], preferred_element_type=f32)
        + b0_ref[...]
    )
    h = _exact_gelu(h)

    # ---- dropout: identity in eval mode ----

    # ---- linear1 (960->256) + GELU ----
    h = _exact_gelu(
        jnp.dot(h.astype(bf16), w1_ref[...], preferred_element_type=f32) + b1_ref[...]
    )

    # ---- linear2 (256->64, padded to 128) + GELU ----
    h = _exact_gelu(
        jnp.dot(h.astype(bf16), w2_ref[...], preferred_element_type=f32) + b2_ref[...]
    )

    # ---- linear3 (64->num_classes, padded to 128x128) ----
    logits = jnp.dot(h, w3_ref[...], preferred_element_type=f32) + b3_ref[...]
    logits_ref[...] = logits

    # ---- softmax over the real class columns (padded cols masked to -inf) ----
    col = lax.broadcasted_iota(jnp.int32, logits.shape, 1)
    masked = jnp.where(col < num_classes, logits, -jnp.inf)
    m = jnp.max(masked, axis=1, keepdims=True)
    e = jnp.exp(masked - m)                       # exp(-inf) = 0 on padded cols
    denom = jnp.sum(e, axis=1, keepdims=True)
    softmax_ref[...] = e * pl.reciprocal(denom, approx=True)


def prepare_params(p, text_dim=480, eps=1e-5):
    """Fold eval-mode BatchNorm into w0/b0 (exact), split w0 for concat-free
    inputs, zero-pad hidden dims 960->1024 and 64->128 and classes C->128
    (exact), and cast the three matmul weights to bf16 (f32 accumulation is
    kept inside the kernel)."""
    bf16, f32 = jnp.bfloat16, jnp.float32

    scale = p["bn_gamma"] * lax.rsqrt(p["bn_var"] + eps)          # (1, 960)
    w0f = p["w0"] * scale                                          # per-output-column
    b0f = (p["b0"] - p["bn_mean"]) * scale + p["bn_beta"]

    h0 = _round_up(w0f.shape[1], 128)        # 960 -> 1024
    h1 = p["w1"].shape[1]                    # 256 (already lane aligned)
    h2 = _round_up(p["w2"].shape[1], 128)    # 64  -> 128
    c = p["w3"].shape[1]
    cp = _round_up(c, 128)                   # 4   -> 128

    audio_dim = w0f.shape[0] - text_dim
    return {
        "w0t": _pad_to(w0f[:text_dim], text_dim, h0).astype(bf16),
        "w0a": _pad_to(w0f[text_dim:], audio_dim, h0).astype(bf16),
        "b0": _pad_to(b0f, 1, h0).astype(f32),
        "w1": _pad_to(p["w1"], h0, h1).astype(bf16),
        "b1": p["b1"].astype(f32),
        "w2": _pad_to(p["w2"], h1, h2).astype(bf16),
        "b2": _pad_to(p["b2"], 1, h2).astype(f32),
        "w3": _pad_to(p["w3"], h2, cp).astype(f32),
        "b3": _pad_to(p["b3"], 1, cp).astype(f32),
        "num_classes": int(c),
    }


def flexible_mmser_forward(text_embed, audio_embed, prep):
    """Concat-free, BN-folded, lane-dense fused forward pass."""
    B, Dt = text_embed.shape
    Da = audio_embed.shape[1]
    C = prep["num_classes"]
    CP = prep["w3"].shape[1]                 # 128 (lane-dense output width)

    # ---- per-generation tile cap / VMEM budget ----
    vmem_cap = 64 << 20                      # conservative default (v7x per-TC)
    try:
        vmem_cap = int(getattr(pltpu.get_tpu_info(), "vmem_capacity_bytes", vmem_cap))
    except Exception:
        pass
    small_vmem = vmem_cap <= (64 << 20)      # v7x: 64 MiB / TensorCore
    tm_cap = 512 if small_vmem else 1024
    vmem_limit = (32 << 20) if small_vmem else (48 << 20)

    # ---- batch tiling: big tiles, but >= 2 grid steps once B is large ----
    if B <= 128:
        TM = B                               # single tile; grid=(1,)
    else:
        TM = min(tm_cap, _round_up(pl.cdiv(B, 2), 8))
    grid_b = pl.cdiv(B, TM)

    weight_args = (
        prep["w0t"], prep["w0a"], prep["b0"],
        prep["w1"], prep["b1"],
        prep["w2"], prep["b2"],
        prep["w3"], prep["b3"],
    )

    in_specs = [
        pl.BlockSpec((TM, Dt), lambda i: (i, 0)),
        pl.BlockSpec((TM, Da), lambda i: (i, 0)),
    ] + [_resident_spec(a.shape) for a in weight_args]

    out_shapes = (
        jax.ShapeDtypeStruct((B, CP), jnp.float32),
        jax.ShapeDtypeStruct((B, CP), jnp.float32),
    )
    out_specs = (
        pl.BlockSpec((TM, CP), lambda i: (i, 0)),
        pl.BlockSpec((TM, CP), lambda i: (i, 0)),
    )

    H0, H1 = prep["w1"].shape                # 1024, 256
    H2 = prep["w2"].shape[1]                 # 128
    weight_bytes = sum(int(a.size) * a.dtype.itemsize for a in weight_args)
    act_bytes = (text_embed.size + audio_embed.size) * 4 + 2 * B * CP * 4
    cost = pl.CostEstimate(
        flops=2 * B * (Dt * H0 + Da * H0 + H0 * H1 + H1 * H2 + H2 * CP),
        transcendentals=B * (H0 + H1 + H2 + CP),
        bytes_accessed=int(weight_bytes + act_bytes),
    )

    kernel = functools.partial(_mmser_kernel, num_classes=C)
    logits_p, probs_p = pl.pallas_call(
        kernel,
        out_shape=out_shapes,
        grid=(grid_b,),
        in_specs=in_specs,
        out_specs=out_specs,
        compiler_params=pltpu.CompilerParams(
            dimension_semantics=("parallel",),   # batch tiles are independent
            vmem_limit_bytes=vmem_limit,
        ),
        cost_estimate=cost,
    )(text_embed, audio_embed, *weight_args)

    # Lane-dense (B, 128) kernel outputs; slice back to the logical class count.
    return logits_p[:, :C], probs_p[:, :C]


def init_params(key, text_dim=480, audio_dim=480, num_classes=4):
    concat_dim = text_dim + audio_dim  # 960
    dims = [(concat_dim, 960), (960, 256), (256, 64), (64, num_classes)]
    keys = jax.random.split(key, 16)
    p = {}
    for idx, (din, dout) in enumerate(dims):
        bound = 1.0 / math.sqrt(din)
        # weights stored as (in, out) == transpose of PyTorch (out, in)
        p[f"w{idx}"] = jax.random.uniform(
            keys[2 * idx], (din, dout), jnp.float32, -bound, bound
        )
        p[f"b{idx}"] = jax.random.uniform(
            keys[2 * idx + 1], (1, dout), jnp.float32, -bound, bound
        )
    # BatchNorm1d(960) parameters / running stats (eval mode), deterministic
    p["bn_gamma"] = 1.0 + 0.05 * jax.random.normal(keys[8], (1, 960), jnp.float32)
    p["bn_beta"] = 0.05 * jax.random.normal(keys[9], (1, 960), jnp.float32)
    p["bn_mean"] = 0.05 * jax.random.normal(keys[10], (1, 960), jnp.float32)
    p["bn_var"] = 1.0 + 0.1 * jax.random.uniform(keys[11], (1, 960), jnp.float32)
    return p


def reference_forward_f32(text_embed, audio_embed, params):
    """Pure-JAX f32 reference of the original PyTorch (eval-mode) semantics."""
    x = jnp.concatenate((text_embed, audio_embed), axis=1)
    h = x @ params["w0"] + params["b0"]
    h = (h - params["bn_mean"]) / jnp.sqrt(params["bn_var"] + 1e-5)
    h = h * params["bn_gamma"] + params["bn_beta"]
    h = _exact_gelu(h)
    h = _exact_gelu(h @ params["w1"] + params["b1"])
    h = _exact_gelu(h @ params["w2"] + params["b2"])
    logits = h @ params["w3"] + params["b3"]
    return logits, jax.nn.softmax(logits, axis=1)


def reference_forward_matched(text_embed, audio_embed, prep):
    """Pure-JAX reference replicating the kernel's exact numerics
    (BN fold + zero padding + bf16 weights/activation casts)."""
    bf16, f32 = jnp.bfloat16, jnp.float32
    C = prep["num_classes"]
    h = (
        jnp.dot(text_embed.astype(bf16), prep["w0t"], preferred_element_type=f32)
        + jnp.dot(audio_embed.astype(bf16), prep["w0a"], preferred_element_type=f32)
        + prep["b0"]
    )
    h = _exact_gelu(h)
    h = _exact_gelu(
        jnp.dot(h.astype(bf16), prep["w1"], preferred_element_type=f32) + prep["b1"]
    )
    h = _exact_gelu(
        jnp.dot(h.astype(bf16), prep["w2"], preferred_element_type=f32) + prep["b2"]
    )
    logits = jnp.dot(h, prep["w3"], preferred_element_type=f32) + prep["b3"]
    logits = logits[:, :C]
    return logits, jax.nn.softmax(logits, axis=1)


if __name__ == "__main__":
    key = jax.random.PRNGKey(0)
    k_t, k_a, k_p, k_t2, k_a2 = jax.random.split(key, 5)

    B, TEXT_DIM, AUDIO_DIM, NUM_CLASSES = 8, 480, 480, 4
    text_embed = jax.random.normal(k_t, (B, TEXT_DIM), jnp.float32)
    audio_embed = jax.random.normal(k_a, (B, AUDIO_DIM), jnp.float32)

    params = init_params(k_p, TEXT_DIM, AUDIO_DIM, NUM_CLASSES)
    prep = prepare_params(params, text_dim=TEXT_DIM)

    logits, probs = jax.block_until_ready(
        flexible_mmser_forward(text_embed, audio_embed, prep)
    )

    assert logits.shape == (B, NUM_CLASSES) and probs.shape == (B, NUM_CLASSES)
    # approx reciprocal in the softmax tail -> relaxed row-sum tolerance
    assert jnp.allclose(jnp.sum(probs, axis=1), 1.0, atol=2e-3)

    # Tight check: same numerics as the kernel (BN fold + padding + bf16 weights).
    m_logits, m_probs = reference_forward_matched(text_embed, audio_embed, prep)
    assert jnp.allclose(logits, m_logits, atol=2e-3, rtol=2e-3)
    assert jnp.allclose(probs, m_probs, atol=3e-3, rtol=3e-3)

    # Loose check: original f32 eval-mode semantics (bf16 quantization budget).
    r_logits, r_probs = reference_forward_f32(text_embed, audio_embed, params)
    assert jnp.allclose(logits, r_logits, atol=2e-2, rtol=2e-2)
    assert jnp.allclose(probs, r_probs, atol=1e-2, rtol=2e-2)

    # Also exercise the multi-tile (grid >= 2, partial last block) path.
    B2 = 136
    t2 = jax.random.normal(k_t2, (B2, TEXT_DIM), jnp.float32)
    a2 = jax.random.normal(k_a2, (B2, AUDIO_DIM), jnp.float32)
    l2, p2 = jax.block_until_ready(flexible_mmser_forward(t2, a2, prep))
    ml2, mp2 = reference_forward_matched(t2, a2, prep)
    assert l2.shape == (B2, NUM_CLASSES) and p2.shape == (B2, NUM_CLASSES)
    assert jnp.allclose(l2, ml2, atol=2e-3, rtol=2e-3)
    assert jnp.allclose(p2, mp2, atol=3e-3, rtol=3e-3)

    print("KERNEL_OK")
</pallas_src>

<mosaic_0001>
module attributes {stable_mosaic.version = 11 : i64} {
  func.func @_mmser_kernel(%arg0: i32, %arg1: memref<8x480xf32, #tpu.memory_space<vmem>>, %arg2: memref<8x480xf32, #tpu.memory_space<vmem>>, %arg3: memref<480x1024xbf16, #tpu.memory_space<vmem>>, %arg4: memref<480x1024xbf16, #tpu.memory_space<vmem>>, %arg5: memref<1x1024xf32, #tpu.memory_space<vmem>>, %arg6: memref<1024x256xbf16, #tpu.memory_space<vmem>>, %arg7: memref<1x256xf32, #tpu.memory_space<vmem>>, %arg8: memref<256x128xbf16, #tpu.memory_space<vmem>>, %arg9: memref<1x128xf32, #tpu.memory_space<vmem>>, %arg10: memref<128x128xf32, #tpu.memory_space<vmem>>, %arg11: memref<1x128xf32, #tpu.memory_space<vmem>>, %arg12: memref<8x128xf32, #tpu.memory_space<vmem>>, %arg13: memref<8x128xf32, #tpu.memory_space<vmem>>) attributes {dimension_semantics = [#tpu.dimension_semantics<parallel>], iteration_bounds = array<i64: 1>, scalar_prefetch = 0 : i64, scratch_operands = 0 : i64, tpu.core_type = #tpu.core_type<tc>, window_params = [{transform_indices = @transform_0, window_bounds = array<i64: 8, 480>}, {transform_indices = @transform_1, window_bounds = array<i64: 8, 480>}, {pipeline_mode = #tpu.pipeline_mode<synchronous>, transform_indices = @transform_2, window_bounds = array<i64: 480, 1024>}, {pipeline_mode = #tpu.pipeline_mode<synchronous>, transform_indices = @transform_3, window_bounds = array<i64: 480, 1024>}, {pipeline_mode = #tpu.pipeline_mode<synchronous>, transform_indices = @transform_4, window_bounds = array<i64: 1, 1024>}, {pipeline_mode = #tpu.pipeline_mode<synchronous>, transform_indices = @transform_5, window_bounds = array<i64: 1024, 256>}, {pipeline_mode = #tpu.pipeline_mode<synchronous>, transform_indices = @transform_6, window_bounds = array<i64: 1, 256>}, {pipeline_mode = #tpu.pipeline_mode<synchronous>, transform_indices = @transform_7, window_bounds = array<i64: 256, 128>}, {pipeline_mode = #tpu.pipeline_mode<synchronous>, transform_indices = @transform_8, window_bounds = array<i64: 1, 128>}, {pipeline_mode = #tpu.pipeline_mode<synchronous>, transform_indices = @transform_9, window_bounds = array<i64: 128, 128>}, {pipeline_mode = #tpu.pipeline_mode<synchronous>, transform_indices = @transform_10, window_bounds = array<i64: 1, 128>}, {transform_indices = @transform_11, window_bounds = array<i64: 8, 128>}, {transform_indices = @transform_12, window_bounds = array<i64: 8, 128>}]} {
    %c0 = arith.constant 0 : index
    %c0_0 = arith.constant 0 : index
    %0 = vector.load %arg1[%c0, %c0_0] : memref<8x480xf32, #tpu.memory_space<vmem>>, vector<8x480xf32>
    %1 = arith.truncf %0 : vector<8x480xf32> to vector<8x480xbf16>
    %c0_1 = arith.constant 0 : index
    %c0_2 = arith.constant 0 : index
    %2 = vector.load %arg3[%c0_1, %c0_2] : memref<480x1024xbf16, #tpu.memory_space<vmem>>, vector<480x1024xbf16>
    %cst = arith.constant dense<0.000000e+00> : vector<8x1024xf32>
    %3 = tpu.matmul %1, %2, %cst {dimension_numbers = #tpu.dot_dimension_numbers<[1], [0], [0], [1], [0, 0, 1, 1], [], []>} : vector<8x480xbf16>, vector<480x1024xbf16>, vector<8x1024xf32> -> vector<8x1024xf32>
    %c0_3 = arith.constant 0 : index
    %c0_4 = arith.constant 0 : index
    %4 = vector.load %arg2[%c0_3, %c0_4] : memref<8x480xf32, #tpu.memory_space<vmem>>, vector<8x480xf32>
    %5 = arith.truncf %4 : vector<8x480xf32> to vector<8x480xbf16>
    %c0_5 = arith.constant 0 : index
    %c0_6 = arith.constant 0 : index
    %6 = vector.load %arg4[%c0_5, %c0_6] : memref<480x1024xbf16, #tpu.memory_space<vmem>>, vector<480x1024xbf16>
    %cst_7 = arith.constant dense<0.000000e+00> : vector<8x1024xf32>
    %7 = tpu.matmul %5, %6, %cst_7 {dimension_numbers = #tpu.dot_dimension_numbers<[1], [0], [0], [1], [0, 0, 1, 1], [], []>} : vector<8x480xbf16>, vector<480x1024xbf16>, vector<8x1024xf32> -> vector<8x1024xf32>
    %8 = arith.addf %3, %7 : vector<8x1024xf32>
    %c0_8 = arith.constant 0 : index
    %c0_9 = arith.constant 0 : index
    %9 = vector.load %arg5[%c0_8, %c0_9] : memref<1x1024xf32, #tpu.memory_space<vmem>>, vector<1x1024xf32>
    %10 = vector.broadcast %9 : vector<1x1024xf32> to vector<8x1024xf32>
    %11 = arith.addf %8, %10 : vector<8x1024xf32>
    %cst_10 = arith.constant 5.000000e-01 : f32
    %12 = vector.broadcast %cst_10 : f32 to vector<8x1024xf32>
    %13 = arith.mulf %12, %11 : vector<8x1024xf32>
    %cst_11 = arith.constant 0.707106769 : f32
    %14 = vector.broadcast %cst_11 : f32 to vector<8x1024xf32>
    %15 = arith.mulf %11, %14 : vector<8x1024xf32>
    %16 = math.erf %15 : vector<8x1024xf32>
    %cst_12 = arith.constant 1.000000e+00 : f32
    %17 = vector.broadcast %cst_12 : f32 to vector<8x1024xf32>
    %18 = arith.addf %17, %16 : vector<8x1024xf32>
    %19 = arith.mulf %13, %18 : vector<8x1024xf32>
    %20 = arith.truncf %19 : vector<8x1024xf32> to vector<8x1024xbf16>
    %c0_13 = arith.constant 0 : index
    %c0_14 = arith.constant 0 : index
    %21 = vector.load %arg6[%c0_13, %c0_14] : memref<1024x256xbf16, #tpu.memory_space<vmem>>, vector<1024x256xbf16>
    %cst_15 = arith.constant dense<0.000000e+00> : vector<8x256xf32>
    %22 = tpu.matmul %20, %21, %cst_15 {dimension_numbers = #tpu.dot_dimension_numbers<[1], [0], [0], [1], [0, 0, 1, 1], [], []>} : vector<8x1024xbf16>, vector<1024x256xbf16>, vector<8x256xf32> -> vector<8x256xf32>
    %c0_16 = arith.constant 0 : index
    %c0_17 = arith.constant 0 : index
    %23 = vector.load %arg7[%c0_16, %c0_17] : memref<1x256xf32, #tpu.memory_space<vmem>>, vector<1x256xf32>
    %24 = vector.broadcast %23 : vector<1x256xf32> to vector<8x256xf32>
    %25 = arith.addf %22, %24 : vector<8x256xf32>
    %cst_18 = arith.constant 5.000000e-01 : f32
    %26 = vector.broadcast %cst_18 : f32 to vector<8x256xf32>
    %27 = arith.mulf %26, %25 : vector<8x256xf32>
    %cst_19 = arith.constant 0.707106769 : f32
    %28 = vector.broadcast %cst_19 : f32 to vector<8x256xf32>
    %29 = arith.mulf %25, %28 : vector<8x256xf32>
    %30 = math.erf %29 : vector<8x256xf32>
    %cst_20 = arith.constant 1.000000e+00 : f32
    %31 = vector.broadcast %cst_20 : f32 to vector<8x256xf32>
    %32 = arith.addf %31, %30 : vector<8x256xf32>
    %33 = arith.mulf %27, %32 : vector<8x256xf32>
    %34 = arith.truncf %33 : vector<8x256xf32> to vector<8x256xbf16>
    %c0_21 = arith.constant 0 : index
    %c0_22 = arith.constant 0 : index
    %35 = vector.load %arg8[%c0_21, %c0_22] : memref<256x128xbf16, #tpu.memory_space<vmem>>, vector<256x128xbf16>
    %cst_23 = arith.constant dense<0.000000e+00> : vector<8x128xf32>
    %36 = tpu.matmul %34, %35, %cst_23 {dimension_numbers = #tpu.dot_dimension_numbers<[1], [0], [0], [1], [0, 0, 1, 1], [], []>} : vector<8x256xbf16>, vector<256x128xbf16>, vector<8x128xf32> -> vector<8x128xf32>
    %c0_24 = arith.constant 0 : index
    %c0_25 = arith.constant 0 : index
    %37 = vector.load %arg9[%c0_24, %c0_25] : memref<1x128xf32, #tpu.memory_space<vmem>>, vector<1x128xf32>
    %38 = vector.broadcast %37 : vector<1x128xf32> to vector<8x128xf32>
    %39 = arith.addf %36, %38 : vector<8x128xf32>
    %cst_26 = arith.constant 5.000000e-01 : f32
    %40 = vector.broadcast %cst_26 : f32 to vector<8x128xf32>
    %41 = arith.mulf %40, %39 : vector<8x128xf32>
    %cst_27 = arith.constant 0.707106769 : f32
    %42 = vector.broadcast %cst_27 : f32 to vector<8x128xf32>
    %43 = arith.mulf %39, %42 : vector<8x128xf32>
    %44 = math.erf %43 : vector<8x128xf32>
    %cst_28 = arith.constant 1.000000e+00 : f32
    %45 = vector.broadcast %cst_28 : f32 to vector<8x128xf32>
    %46 = arith.addf %45, %44 : vector<8x128xf32>
    %47 = arith.mulf %41, %46 : vector<8x128xf32>
    %c0_29 = arith.constant 0 : index
    %c0_30 = arith.constant 0 : index
    %48 = vector.load %arg10[%c0_29, %c0_30] : memref<128x128xf32, #tpu.memory_space<vmem>>, vector<128x128xf32>
    %cst_31 = arith.constant dense<0.000000e+00> : vector<8x128xf32>
    %49 = tpu.matmul %47, %48, %cst_31 {dimension_numbers = #tpu.dot_dimension_numbers<[1], [0], [0], [1], [0, 0, 1, 1], [], []>} : vector<8x128xf32>, vector<128x128xf32>, vector<8x128xf32> -> vector<8x128xf32>
    %c0_32 = arith.constant 0 : index
    %c0_33 = arith.constant 0 : index
    %50 = vector.load %arg11[%c0_32, %c0_33] : memref<1x128xf32, #tpu.memory_space<vmem>>, vector<1x128xf32>
    %51 = vector.broadcast %50 : vector<1x128xf32> to vector<8x128xf32>
    %52 = arith.addf %49, %51 : vector<8x128xf32>
    %c0_34 = arith.constant 0 : index
    %c0_35 = arith.constant 0 : index
    %53 = vector.load %arg12[%c0_34, %c0_35] : memref<8x128xf32, #tpu.memory_space<vmem>>, vector<8x128xf32>
    tpu.vector_store %arg12[%c0_34, %c0_35], %52 {strides = array<i32>} : memref<8x128xf32, #tpu.memory_space<vmem>>, vector<8x128xf32>,
    %54 = tpu.iota {dimensions = array<i32: 1>} : vector<8x128xi32>
    %c4_i32 = arith.constant 4 : i32
    %55 = vector.broadcast %c4_i32 : i32 to vector<8x128xi32>
    %56 = arith.cmpi slt, %54, %55 : vector<8x128xi32>
    %cst_36 = arith.constant 0xFF800000 : f32
    %57 = vector.broadcast %cst_36 : f32 to vector<8x128xf32>
    %58 = arith.select %56, %52, %57 : vector<8x128xi1>, vector<8x128xf32>
    %cst_37 = arith.constant dense<0xFF800000> : vector<8xf32>
    %59 = vector.multi_reduction <maximumf>, %58, %cst_37 [1] : vector<8x128xf32> to vector<8xf32>
    %60 = vector.shape_cast %59 : vector<8xf32> to vector<8x1xf32>
    %61 = vector.broadcast %60 : vector<8x1xf32> to vector<8x128xf32>
    %62 = arith.subf %58, %61 : vector<8x128xf32>
    %63 = math.exp %62 : vector<8x128xf32>
    %cst_38 = arith.constant dense<0.000000e+00> : vector<8xf32>
    %64 = vector.multi_reduction <add>, %63, %cst_38 [1] : vector<8x128xf32> to vector<8xf32>
    %65 = vector.shape_cast %64 : vector<8xf32> to vector<8x1xf32>
    %66 = tpu.reciprocal %65 {approx = true} : vector<8x1xf32> -> vector<8x1xf32>
    %67 = vector.broadcast %66 : vector<8x1xf32> to vector<8x128xf32>
    %68 = arith.mulf %63, %67 : vector<8x128xf32>
    %c0_39 = arith.constant 0 : index
    %c0_40 = arith.constant 0 : index
    %69 = vector.load %arg13[%c0_39, %c0_40] : memref<8x128xf32, #tpu.memory_space<vmem>>, vector<8x128xf32>
    tpu.vector_store %arg13[%c0_39, %c0_40], %68 {strides = array<i32>} : memref<8x128xf32, #tpu.memory_space<vmem>>, vector<8x128xf32>,
    return
  }
  func.func @transform_0(%arg0: i32) -> (i32, i32) {
    %c0_i32 = arith.constant 0 : i32
    %c0_i32_0 = arith.constant 0 : i32
    return %arg0, %c0_i32 : i32, i32
  }
  func.func @transform_1(%arg0: i32) -> (i32, i32) {
    %c0_i32 = arith.constant 0 : i32
    %c0_i32_0 = arith.constant 0 : i32
    return %arg0, %c0_i32 : i32, i32
  }
  func.func @transform_2(%arg0: i32) -> (i32, i32) {
    %c0_i32 = arith.constant 0 : i32
    %c0_i32_0 = arith.constant 0 : i32
    %c0_i32_1 = arith.constant 0 : i32
    return %c0_i32, %c0_i32_0 : i32, i32
  }
  func.func @transform_3(%arg0: i32) -> (i32, i32) {
    %c0_i32 = arith.constant 0 : i32
    %c0_i32_0 = arith.constant 0 : i32
    %c0_i32_1 = arith.constant 0 : i32
    return %c0_i32, %c0_i32_0 : i32, i32
  }
  func.func @transform_4(%arg0: i32) -> (i32, i32) {
    %c0_i32 = arith.constant 0 : i32
    %c0_i32_0 = arith.constant 0 : i32
    %c0_i32_1 = arith.constant 0 : i32
    return %c0_i32, %c0_i32_0 : i32, i32
  }
  func.func @transform_5(%arg0: i32) -> (i32, i32) {
    %c0_i32 = arith.constant 0 : i32
    %c0_i32_0 = arith.constant 0 : i32
    %c0_i32_1 = arith.constant 0 : i32
    return %c0_i32, %c0_i32_0 : i32, i32
  }
  func.func @transform_6(%arg0: i32) -> (i32, i32) {
    %c0_i32 = arith.constant 0 : i32
    %c0_i32_0 = arith.constant 0 : i32
    %c0_i32_1 = arith.constant 0 : i32
    return %c0_i32, %c0_i32_0 : i32, i32
  }
  func.func @transform_7(%arg0: i32) -> (i32, i32) {
    %c0_i32 = arith.constant 0 : i32
    %c0_i32_0 = arith.constant 0 : i32
    %c0_i32_1 = arith.constant 0 : i32
    return %c0_i32, %c0_i32_0 : i32, i32
  }
  func.func @transform_8(%arg0: i32) -> (i32, i32) {
    %c0_i32 = arith.constant 0 : i32
    %c0_i32_0 = arith.constant 0 : i32
    %c0_i32_1 = arith.constant 0 : i32
    return %c0_i32, %c0_i32_0 : i32, i32
  }
  func.func @transform_9(%arg0: i32) -> (i32, i32) {
    %c0_i32 = arith.constant 0 : i32
    %c0_i32_0 = arith.constant 0 : i32
    %c0_i32_1 = arith.constant 0 : i32
    return %c0_i32, %c0_i32_0 : i32, i32
  }
  func.func @transform_10(%arg0: i32) -> (i32, i32) {
    %c0_i32 = arith.constant 0 : i32
    %c0_i32_0 = arith.constant 0 : i32
    %c0_i32_1 = arith.constant 0 : i32
    return %c0_i32, %c0_i32_0 : i32, i32
  }
  func.func @transform_11(%arg0: i32) -> (i32, i32) {
    %c0_i32 = arith.constant 0 : i32
    %c0_i32_0 = arith.constant 0 : i32
    return %arg0, %c0_i32 : i32, i32
  }
  func.func @transform_12(%arg0: i32) -> (i32, i32) {
    %c0_i32 = arith.constant 0 : i32
    %c0_i32_0 = arith.constant 0 : i32
    return %arg0, %c0_i32 : i32, i32
  }
}

</mosaic_0001>

<bundles_post_ra>
// kernel: tpu_custom_call.1
= control target key start
LH: loop header
LB: loop body
LE: loop exit
PB: predicated region body
PF: predicated region fallthrough
CT: control target
= control target key end

     0   :  { %18 = vsyncpa [#allocation3], 0  ;;  %s6519_s0 = inlined_call_operand.hbm [shape: f32[8,480], index: 0, kind: input, shape index: {}]   ;;  %s6520_s1 = inlined_call_operand.hbm [shape: f32[8,480], index: 1, kind: input, shape index: {}]   ;;  %s6521_s2 = inlined_call_operand.hbm [shape: bf16[480,1024], index: 2, kind: input, shape index: {}]   ;;  %s6522_s3 = inlined_call_operand.hbm [shape: bf16[480,1024], index: 3, kind: input, shape index: {}]   ;;  %s6523_s4 = inlined_call_operand.hbm [shape: f32[1,1024], index: 4, kind: input, shape index: {}]   ;;  %s6524_s5 = inlined_call_operand.hbm [shape: bf16[1024,256], index: 5, kind: input, shape index: {}]   ;;  %s6525_s6 = inlined_call_operand.vmem [shape: f32[1,256], index: 6, kind: input, shape index: {}]   ;;  %s6526_s7 = inlined_call_operand.hbm [shape: bf16[256,128], index: 7, kind: input, shape index: {}]   ;;  %s6527_s8 = inlined_call_operand.vmem [shape: f32[1,128], index: 8, kind: input, shape index: {}]   ;;  %s6528_s9 = inlined_call_operand.hbm [shape: f32[128,128], index: 9, kind: input, shape index: {}]   ;;  %s6529_s10 = inlined_call_operand.vmem [shape: f32[1,128], index: 10, kind: input, shape index: {}]   ;;  %s6530_s11 = inlined_call_operand.hbm [shape: f32[8,128], index: 11, kind: output, shape index: {0}]   ;;  %s6531_s12 = inlined_call_operand.hbm [shape: f32[8,128], index: 12, kind: output, shape index: {1}]  }
   0x1   :  { %19 = vsyncpa [#allocation6], 0 }
   0x2   :  { %20 = vsyncpa [#allocation9], 0 }
   0x3   :  { %21 = vsyncpa [#allocation12], 0 }
   0x4   :  { %22 = vsyncpa [#allocation15], 0 }
   0x5   :  { %23 = vsyncpa [#allocation4], 0 }
   0x6   :  { %24 = vsyncpa [#allocation18], 0  ;;  %s6254_s21 = smov [#allocation5]  }
   0x7   :  { %s41_s22 = sshll.u32 %s6254_s21, 4  ;;  %s42_s22 = int_to_ptr.vmem [resolvable:$true] %s41_s22 }
   0x8   :  { %s6048_s23 = scalar_lea.vmem %s42_s22, 512  ;;  %p6053_p1 = scmp.lt.s32.totalorder %s42_s22, %s42_s22 }
   0x9   :  { %p6049_p0 = scmp.ne.s32.totalorder %s42_s22, %s6048_s23  ;;  %p6054_p2 = scmp.lt.s32.totalorder %s6048_s23, %s6048_s23 }
   0xb   :  { %p6055_p3 = por %p6054_p2, %p6053_p1 }
   0xd   :  { %p6056_p4 = pnand %p6055_p3, %p6049_p0 }
   0xf   :  { %6059 = shalt.err (!%p6056_p4)
}
  0x10   :  { %44 = dma.hbm_to_vmem [thread:$0]  %s6520_s1, 512, %s42_s22, [#allocation6]  }
  0x11   :  { %s6255_s26 = smov [#allocation8]   ;;  %s6256_s28 = smov [#allocation11]  }
  0x12   :  { %s62_s27 = sshll.u32 %s6255_s26, 4  ;;  %s84_s29 = sshll.u32 %s6256_s28, 4  ;;  %s63_s27 = int_to_ptr.vmem [resolvable:$true] %s62_s27  ;;  %s85_s29 = int_to_ptr.vmem [resolvable:$true] %s84_s29 }
  0x13   :  { %s6068_s30 = scalar_lea.vmem %s63_s27, 30720  ;;  %p6073_p6 = scmp.lt.s32.totalorder %s63_s27, %s63_s27 }
  0x14   :  { %p6069_p5 = scmp.ne.s32.totalorder %s63_s27, %s6068_s30  ;;  %p6074_p7 = scmp.lt.s32.totalorder %s6068_s30, %s6068_s30 }
  0x16   :  { %p6075_p8 = por %p6074_p7, %p6073_p6 }
  0x18   :  { %p6076_p9 = pnand %p6075_p8, %p6069_p5 }
  0x1a   :  { %6079 = shalt.err (!%p6076_p9)
}
  0x1b   :  { %s6257_s13 = smov 512   ;;  %s6258_s14 = smov 32  }
  0x1c   :  { %68 = dma.hbm_to_vmem [thread:$0]  %s6522_s3, 30720, %s63_s27, [#allocation9], %s6257_s13, %s6257_s13, %s6258_s14  }
  0x1d   :  { %s6088_s1 = scalar_lea.vmem %s85_s29, 16384  ;;  %p6093_p11 = scmp.lt.s32.totalorder %s85_s29, %s85_s29 }
  0x1e   :  { %p6089_p10 = scmp.ne.s32.totalorder %s85_s29, %s6088_s1  ;;  %p6094_p12 = scmp.lt.s32.totalorder %s6088_s1, %s6088_s1 }
  0x20   :  { %p6095_p13 = por %p6094_p12, %p6093_p11 }
  0x22   :  { %p6096_p0 = pnand %p6095_p13, %p6089_p10 }
  0x24   :  { %6099 = shalt.err (!%p6096_p0)
}
  0x25   :  { %s6259_s17 = smov 128   ;;  %s6260_s18 = smov 8  }
  0x26   :  { %90 = dma.hbm_to_vmem [thread:$0]  %s6524_s5, 16384, %s85_s29, [#allocation12], %s6259_s17, %s6259_s17, %s6260_s18  }
  0x27   :  { %s6261_s21 = smov [#allocation2]   ;;  %s6262_s3 = smov [#allocation7]  }
  0x28   :  { %s31_s22 = sshll.u32 %s6261_s21, 4  ;;  %s50_s23 = sshll.u32 %s6262_s3, 4  ;;  %s32_s22 = int_to_ptr.vmem [resolvable:$true] %s31_s22  ;;  %s51_s23 = int_to_ptr.vmem [resolvable:$true] %s50_s23 }
  0x29   :  { %s6108_s24 = scalar_lea.vmem %s32_s22, 512  ;;  %p6113_p2 = scmp.lt.s32.totalorder %s32_s22, %s32_s22 }
  0x2a   :  { %p6109_p1 = scmp.ne.s32.totalorder %s32_s22, %s6108_s24  ;;  %p6114_p3 = scmp.lt.s32.totalorder %s6108_s24, %s6108_s24 }
  0x2c   :  { %p6115_p4 = por %p6114_p3, %p6113_p2 }
  0x2e   :  { %p6116_p5 = pnand %p6115_p4, %p6109_p1 }
  0x30   :  { %6119 = shalt.err (!%p6116_p5)
}
  0x31   :  { %34 = dma.hbm_to_vmem [thread:$0]  %s6519_s0, 512, %s32_s22, [#allocation3]  }
  0x32   :  { %s6128_s27 = scalar_lea.vmem %s51_s23, 30720  ;;  %p6133_p7 = scmp.lt.s32.totalorder %s51_s23, %s51_s23 }
  0x33   :  { %p6129_p6 = scmp.ne.s32.totalorder %s51_s23, %s6128_s27  ;;  %p6134_p8 = scmp.lt.s32.totalorder %s6128_s27, %s6128_s27 }
  0x35   :  { %p6135_p9 = por %p6134_p8, %p6133_p7 }
  0x37   :  { %p6136_p10 = pnand %p6135_p9, %p6129_p6 }
  0x39   :  { %6139 = shalt.err (!%p6136_p10)
}
  0x3a   :  { %56 = dma.hbm_to_vmem [thread:$0]  %s6521_s2, 30720, %s51_s23, [#allocation6], %s6257_s13, %s6257_s13, %s6258_s14  }
  0x3b   :  { %s6263_s29 = smov [#allocation10]   ;;  %s6264_s15 = smov [#allocation13]  }
  0x3c   :  { %s75_s30 = sshll.u32 %s6263_s29, 4  ;;  %s98_s0 = sshll.u32 %s6264_s15, 4  ;;  %s76_s30 = int_to_ptr.vmem [resolvable:$true] %s75_s30  ;;  %s99_s0 = int_to_ptr.vmem [resolvable:$true] %s98_s0 }
  0x3d   :  { %s6148_s16 = scalar_lea.vmem %s76_s30, 128  ;;  %p6153_p12 = scmp.lt.s32.totalorder %s76_s30, %s76_s30 }
  0x3e   :  { %p6149_p11 = scmp.ne.s32.totalorder %s76_s30, %s6148_s16  ;;  %p6154_p13 = scmp.lt.s32.totalorder %s6148_s16, %s6148_s16 }
  0x40   :  { %p6155_p0 = por %p6154_p13, %p6153_p12 }
  0x42   :  { %p6156_p1 = pnand %p6155_p0, %p6149_p11 }
  0x44   :  { %6159 = shalt.err (!%p6156_p1)
}
  0x45   :  { %78 = dma.hbm_to_vmem [thread:$0]  %s6523_s4, 128, %s76_s30, [#allocation9]  }
  0x46   :  { %s6168_s20 = scalar_lea.vmem %s99_s0, 2048  ;;  %p6173_p3 = scmp.lt.s32.totalorder %s99_s0, %s99_s0 }
  0x47   :  { %p6169_p2 = scmp.ne.s32.totalorder %s99_s0, %s6168_s20  ;;  %p6174_p4 = scmp.lt.s32.totalorder %s6168_s20, %s6168_s20 }
  0x49   :  { %p6175_p5 = por %p6174_p4, %p6173_p3 }
  0x4b   :  { %p6176_p6 = pnand %p6175_p5, %p6169_p2 }
  0x4d   :  { %6179 = shalt.err (!%p6176_p6)
}
  0x4e   :  { %s6265_s2 = smov 64   ;;  %s6266_s13 = smov 4  }
  0x4f   :  { %104 = dma.hbm_to_vmem [thread:$0]  %s6526_s7, 2048, %s99_s0, [#allocation12], %s6265_s2, %s6265_s2, %s6266_s13  }
  0x50   :  { %s6267_s22 = smov [#allocation14]  }
  0x51   :  { %s112_s3 = sshll.u32 %s6267_s22, 4  ;;  %s113_s3 = int_to_ptr.vmem [resolvable:$true] %s112_s3 }
  0x52   :  { %s6188_s23 = scalar_lea.vmem %s113_s3, 2048  ;;  %p6193_p8 = scmp.lt.s32.totalorder %s113_s3, %s113_s3 }
  0x53   :  { %p6189_p7 = scmp.ne.s32.totalorder %s113_s3, %s6188_s23  ;;  %p6194_p9 = scmp.lt.s32.totalorder %s6188_s23, %s6188_s23 }
  0x55   :  { %p6195_p10 = por %p6194_p9, %p6193_p8 }
  0x57   :  { %p6196_p11 = pnand %p6195_p10, %p6189_p7 }
  0x59   :  { %6199 = shalt.err (!%p6196_p11)
}
  0x5a   :  { %118 = dma.hbm_to_vmem [thread:$0]  %s6528_s9, 2048, %s113_s3, [#allocation15], %s6259_s17, %s6259_s17, %s6260_s18  }
  0x5b   :  { %6240 = dma.done.wait [#allocation3], 512  }
  0x5c   :  { %6241 = vsyncadd [#allocation3], 4294966784 }
  0x5d   :  { %6242 = dma.done.wait [#allocation6], 31232  }
  0x5e   :  { %6243 = vsyncadd [#allocation6], 4294936064 }
  0x5f   :  { %6244 = dma.done.wait [#allocation9], 30848  }
  0x60   :  { %6245 = vsyncadd [#allocation9], 4294936448 }
  0x61   :  { %6246 = dma.done.wait [#allocation12], 18432  }
  0x62   :  { %6247 = vsyncadd [#allocation12], 4294948864 }
  0x63   :  { %6248 = dma.done.wait [#allocation15], 2048  }
  0x64   :  { %6249 = vsyncadd [#allocation15], 4294965248  ;;  %v458_v0 = vld [vmem:[#allocation8 + $0x1c0] sm:$0xff]  ;;  %v397_v48 = vld [vmem:[#allocation5 + $0x18] sm:$0xff]  ;;  %vm1842_vm0 = vcmask 785408   ;;  %vm6269_vm1 = vmmov 0  }
  0x65   :  { %v462_v1 = vld [vmem:[#allocation8 + $0x1e0] sm:$0xff]  ;;  %v6373_v51 = vpack.c.bf16 %v397_v48, %v397_v48  ;;  %v395_v58 = vld [vmem:[#allocation5 + $0x8] sm:$0xff] }
  0x66   :  { %v586_v2 = vld [vmem:[#allocation8 + $0x5c0] sm:$0xff]  ;;  %v5137_v3 = vcombine.high %v458_v0, %v462_v1  ;;  %v5136_v5 = vcombine.low %v458_v0, %v462_v1  ;;  %v6377_v61 = vpack.c.bf16 %v395_v58, %v395_v58  ;;  %v396_v58 = vld [vmem:[#allocation5 + $0x10] sm:$0xff] }
  0x67   :  { %v590_v4 = vld [vmem:[#allocation8 + $0x5e0] sm:$0xff]  ;;  %5320 = vmatprep.mubr.msk.bf16.mxu1 %vm1842_vm0, %v6373_v51 }
  0x68   :  { %v450_v6 = vld [vmem:[#allocation8 + $0x180] sm:$0xff]  ;;  %v5265_v8 = vcombine.high %v586_v2, %v590_v4  ;;  %v5264_v9 = vcombine.low %v586_v2, %v590_v4  ;;  %1846 = vmatprep.subr.bf16.mxu0 %v5137_v3  ;;  %1878 = vmatprep.mubr.bf16.mxu0 %v6377_v61 }
  0x69   :  { %v454_v7 = vld [vmem:[#allocation8 + $0x1a0] sm:$0xff]  ;;  %1847 = vmatpush1.bf16.msra.mxu0 %v5136_v5 }
  0x6a   :  { %v5129_v10 = vcombine.high %v450_v6, %v454_v7  ;;  %v578_v11 = vld [vmem:[#allocation8 + $0x580] sm:$0xff]  ;;  %1887 = vmatprep.subr.bf16.mxu1 %v5265_v8  ;;  %v5128_v18 = vcombine.low %v450_v6, %v454_v7 }
  0x6b   :  { %v582_v12 = vld [vmem:[#allocation8 + $0x5a0] sm:$0xff]  ;;  %1888 = vmatpush1.bf16.msra.mxu1 %v5264_v9 }
  0x6c   :  { %v442_v13 = vld [vmem:[#allocation8 + $0x140] sm:$0xff]  ;;  %v5257_v14 = vcombine.high %v578_v11, %v582_v12  ;;  %1848 = vmatprep.subr.bf16.mxu0 %v5129_v10  ;;  %v5256_v19 = vcombine.low %v578_v11, %v582_v12 }
  0x6d   :  { %v446_v15 = vld [vmem:[#allocation8 + $0x160] sm:$0xff]  ;;  %1849 = vmatpush1.bf16.msra.mxu0 %v5128_v18 }
  0x6e   :  { %v570_v16 = vld [vmem:[#allocation8 + $0x540] sm:$0xff]  ;;  %v5121_v20 = vcombine.high %v442_v13, %v446_v15  ;;  %1889 = vmatprep.subr.bf16.mxu1 %v5257_v14  ;;  %v5120_v26 = vcombine.low %v442_v13, %v446_v15 }
  0x6f   :  { %v574_v17 = vld [vmem:[#allocation8 + $0x560] sm:$0xff]  ;;  %1890 = vmatpush1.bf16.msra.mxu1 %v5256_v19 }
  0x70   :  { %v5249_v21 = vcombine.high %v570_v16, %v574_v17  ;;  %v434_v22 = vld [vmem:[#allocation8 + $0x100] sm:$0xff]  ;;  %1850 = vmatprep.subr.bf16.mxu0 %v5121_v20  ;;  %v5248_v27 = vcombine.low %v570_v16, %v574_v17 }
  0x71   :  { %v438_v23 = vld [vmem:[#allocation8 + $0x120] sm:$0xff]  ;;  %1851 = vmatpush1.bf16.msra.mxu0 %v5120_v26 }
  0x72   :  { %v562_v24 = vld [vmem:[#allocation8 + $0x500] sm:$0xff]  ;;  %v5113_v28 = vcombine.high %v434_v22, %v438_v23  ;;  %1891 = vmatprep.subr.bf16.mxu1 %v5249_v21  ;;  %v5112_v34 = vcombine.low %v434_v22, %v438_v23 }
  0x73   :  { %v566_v25 = vld [vmem:[#allocation8 + $0x520] sm:$0xff]  ;;  %1892 = vmatpush1.bf16.msra.mxu1 %v5248_v27 }
  0x74   :  { %v5241_v29 = vcombine.high %v562_v24, %v566_v25  ;;  %v426_v30 = vld [vmem:[#allocation8 + $0xc0] sm:$0xff]  ;;  %1852 = vmatprep.subr.bf16.mxu0 %v5113_v28  ;;  %v5240_v35 = vcombine.low %v562_v24, %v566_v25 }
  0x75   :  { %v430_v31 = vld [vmem:[#allocation8 + $0xe0] sm:$0xff]  ;;  %1853 = vmatpush1.bf16.msra.mxu0 %v5112_v34 }
  0x76   :  { %v554_v32 = vld [vmem:[#allocation8 + $0x4c0] sm:$0xff]  ;;  %v5105_v36 = vcombine.high %v426_v30, %v430_v31  ;;  %1893 = vmatprep.subr.bf16.mxu1 %v5241_v29  ;;  %v5104_v42 = vcombine.low %v426_v30, %v430_v31 }
  0x77   :  { %v558_v33 = vld [vmem:[#allocation8 + $0x4e0] sm:$0xff]  ;;  %1894 = vmatpush1.bf16.msra.mxu1 %v5240_v35 }
  0x78   :  { %v5233_v37 = vcombine.high %v554_v32, %v558_v33  ;;  %v418_v38 = vld [vmem:[#allocation8 + $0x80] sm:$0xff]  ;;  %1854 = vmatprep.subr.bf16.mxu0 %v5105_v36  ;;  %v5232_v43 = vcombine.low %v554_v32, %v558_v33 }
  0x79   :  { %v422_v39 = vld [vmem:[#allocation8 + $0xa0] sm:$0xff]  ;;  %1855 = vmatpush1.bf16.msra.mxu0 %v5104_v42 }
  0x7a   :  { %v546_v40 = vld [vmem:[#allocation8 + $0x480] sm:$0xff]  ;;  %v5097_v44 = vcombine.high %v418_v38, %v422_v39  ;;  %1895 = vmatprep.subr.bf16.mxu1 %v5233_v37  ;;  %v5096_v52 = vcombine.low %v418_v38, %v422_v39 }
  0x7b   :  { %v550_v41 = vld [vmem:[#allocation8 + $0x4a0] sm:$0xff]  ;;  %1896 = vmatpush1.bf16.msra.mxu1 %v5232_v43 }
  0x7c   :  { %v5225_v45 = vcombine.high %v546_v40, %v550_v41  ;;  %v410_v46 = vld [vmem:[#allocation8 + $0x40] sm:$0xff]  ;;  %1856 = vmatprep.subr.bf16.mxu0 %v5097_v44  ;;  %v5224_v53 = vcombine.low %v546_v40, %v550_v41 }
  0x7d   :  { %v414_v47 = vld [vmem:[#allocation8 + $0x60] sm:$0xff]  ;;  %1857 = vmatpush1.bf16.msra.mxu0 %v5096_v52 }
  0x7e   :  { %v538_v49 = vld [vmem:[#allocation8 + $0x440] sm:$0xff]  ;;  %v5089_v54 = vcombine.high %v410_v46, %v414_v47  ;;  %1897 = vmatprep.subr.bf16.mxu1 %v5225_v45  ;;  %v5088_v62 = vcombine.low %v410_v46, %v414_v47 }
  0x7f   :  { %v542_v50 = vld [vmem:[#allocation8 + $0x460] sm:$0xff]  ;;  %1898 = vmatpush1.bf16.msra.mxu1 %v5224_v53  ;;  %v459_v53 = vld [vmem:[#allocation8 + $0x1c8] sm:$0xff] }
  0x80   :  { %v5217_v55 = vcombine.high %v538_v49, %v542_v50  ;;  %v402_v56 = vld [vmem:[#allocation8] sm:$0xff]  ;;  %1858 = vmatprep.subr.bf16.mxu0 %v5089_v54  ;;  %v5216_v63 = vcombine.low %v538_v49, %v542_v50  ;;  %v463_v54 = vld [vmem:[#allocation8 + $0x1e8] sm:$0xff] }
  0x81   :  { %v406_v57 = vld [vmem:[#allocation8 + $0x20] sm:$0xff]  ;;  %1859 = vmatpush1.bf16.msra.mxu0 %v5088_v62 }
  0x82   :  { %v530_v59 = vld [vmem:[#allocation8 + $0x400] sm:$0xff]  ;;  %v5081_v0 = vcombine.high %v402_v56, %v406_v57  ;;  %1899 = vmatprep.subr.bf16.mxu1 %v5217_v55  ;;  %v5080_v6 = vcombine.low %v402_v56, %v406_v57 }
  0x83   :  { %v534_v60 = vld [vmem:[#allocation8 + $0x420] sm:$0xff]  ;;  %1900 = vmatpush1.bf16.msra.mxu1 %v5216_v63  ;;  %v451_v63 = vld [vmem:[#allocation8 + $0x188] sm:$0xff] }
  0x84   :  { %v5209_v1 = vcombine.high %v530_v59, %v534_v60  ;;  %v522_v2 = vld [vmem:[#allocation8 + $0x3c0] sm:$0xff]  ;;  %1860 = vmatprep.subr.bf16.mxu0 %v5081_v0  ;;  %v5208_v7 = vcombine.low %v530_v59, %v534_v60  ;;  %v5139_v59 = vcombine.high %v459_v53, %v463_v54  ;;  %v455_v0 = vld [vmem:[#allocation8 + $0x1a8] sm:$0xff] }
  0x85   :  { %v526_v3 = vld [vmem:[#allocation8 + $0x3e0] sm:$0xff]  ;;  %1861 = vmatpush1.bf16.msra.mxu0 %v5080_v6  ;;  %v587_v6 = vld [vmem:[#allocation8 + $0x5c8] sm:$0xff] }
  0x86   :  { %v634_v4 = vld [vmem:[#allocation8 + $0x740] sm:$0xff]  ;;  %v5201_v8 = vcombine.high %v522_v2, %v526_v3  ;;  %1901 = vmatprep.subr.bf16.mxu1 %v5209_v1  ;;  %v5200_v14 = vcombine.low %v522_v2, %v526_v3  ;;  %v6380_v1 = vpack.c.bf16 %v396_v58, %v396_v58  ;;  %v5138_v3 = vcombine.low %v459_v53, %v463_v54  ;;  %v539_v58 = vld [vmem:[#allocation8 + $0x448] sm:$0xff] }
  0x87   :  { %v638_v5 = vld [vmem:[#allocation8 + $0x760] sm:$0xff]  ;;  %1902 = vmatpush1.bf16.msra.mxu1 %v5208_v7  ;;  %v591_v7 = vld [vmem:[#allocation8 + $0x5e8] sm:$0xff] }
  0x88   :  { %v5313_v9 = vcombine.high %v634_v4, %v638_v5  ;;  %v514_v10 = vld [vmem:[#allocation8 + $0x380] sm:$0xff]  ;;  %1862 = vmatprep.subr.bf16.mxu0 %v5201_v8  ;;  %v5312_v15 = vcombine.low %v634_v4, %v638_v5  ;;  %v5131_v5 = vcombine.high %v451_v63, %v455_v0  ;;  %v443_v8 = vld [vmem:[#allocation8 + $0x148] sm:$0xff] }
  0x89   :  { %v518_v11 = vld [vmem:[#allocation8 + $0x3a0] sm:$0xff]  ;;  %1863 = vmatpush2.bf16.msra.mxu0 %v5200_v14 }
  0x8a   :  { %v626_v12 = vld [vmem:[#allocation8 + $0x700] sm:$0xff]  ;;  %v5193_v16 = vcombine.high %v514_v10, %v518_v11  ;;  %1907 = vmatprep.subr.bf16.mxu1 %v5313_v9  ;;  %v5192_v22 = vcombine.low %v514_v10, %v518_v11  ;;  %v447_v9 = vld [vmem:[#allocation8 + $0x168] sm:$0xff] }
  0x8b   :  { %v630_v13 = vld [vmem:[#allocation8 + $0x720] sm:$0xff]  ;;  %1908 = vmatpush2.bf16.msra.mxu1 %v5312_v15  ;;  %v5123_v14 = vcombine.high %v443_v8, %v447_v9  ;;  %v579_v15 = vld [vmem:[#allocation8 + $0x588] sm:$0xff] }
  0x8c   :  { %v5305_v17 = vcombine.high %v626_v12, %v630_v13  ;;  %v506_v18 = vld [vmem:[#allocation8 + $0x340] sm:$0xff]  ;;  %1864 = vmatprep.subr.bf16.mxu0 %v5193_v16  ;;  %v5304_v23 = vcombine.low %v626_v12, %v630_v13  ;;  %v5130_v12 = vcombine.low %v451_v63, %v455_v0  ;;  %v5267_v13 = vcombine.high %v587_v6, %v591_v7  ;;  %v583_v16 = vld [vmem:[#allocation8 + $0x5a8] sm:$0xff] }
  0x8d   :  { %v510_v19 = vld [vmem:[#allocation8 + $0x360] sm:$0xff]  ;;  %1865 = vmatpush2.bf16.msra.mxu0 %v5192_v22  ;;  %v5259_v22 = vcombine.high %v579_v15, %v583_v16 }
  0x8e   :  { %v618_v20 = vld [vmem:[#allocation8 + $0x6c0] sm:$0xff]  ;;  %v5185_v24 = vcombine.high %v506_v18, %v510_v19  ;;  %1909 = vmatprep.subr.bf16.mxu1 %v5305_v17  ;;  %v5184_v30 = vcombine.low %v506_v18, %v510_v19  ;;  %v435_v18 = vld [vmem:[#allocation8 + $0x108] sm:$0xff] }
  0x8f   :  { %v622_v21 = vld [vmem:[#allocation8 + $0x6e0] sm:$0xff]  ;;  %1910 = vmatpush2.bf16.msra.mxu1 %v5304_v23  ;;  %v439_v19 = vld [vmem:[#allocation8 + $0x128] sm:$0xff] }
  0x90   :  { %v5297_v25 = vcombine.high %v618_v20, %v622_v21  ;;  %v498_v26 = vld [vmem:[#allocation8 + $0x300] sm:$0xff]  ;;  %1866 = vmatprep.subr.bf16.mxu0 %v5185_v24  ;;  %v5296_v31 = vcombine.low %v618_v20, %v622_v21  ;;  %v5266_v20 = vcombine.low %v587_v6, %v591_v7  ;;  %v5122_v21 = vcombine.low %v443_v8, %v447_v9  ;;  %v427_v23 = vld [vmem:[#allocation8 + $0xc8] sm:$0xff] }
  0x91   :  { %v502_v27 = vld [vmem:[#allocation8 + $0x320] sm:$0xff]  ;;  %1867 = vmatpush2.bf16.msra.mxu0 %v5184_v30  ;;  %v431_v24 = vld [vmem:[#allocation8 + $0xe8] sm:$0xff] }
  0x92   :  { %v610_v28 = vld [vmem:[#allocation8 + $0x680] sm:$0xff]  ;;  %v5177_v32 = vcombine.high %v498_v26, %v502_v27  ;;  %1911 = vmatprep.subr.bf16.mxu1 %v5297_v25  ;;  %v5176_v38 = vcombine.low %v498_v26, %v502_v27  ;;  %v5115_v25 = vcombine.high %v435_v18, %v439_v19  ;;  %v571_v26 = vld [vmem:[#allocation8 + $0x548] sm:$0xff] }
  0x93   :  { %v614_v29 = vld [vmem:[#allocation8 + $0x6a0] sm:$0xff]  ;;  %1912 = vmatpush2.bf16.msra.mxu1 %v5296_v31  ;;  %v575_v27 = vld [vmem:[#allocation8 + $0x568] sm:$0xff] }
  0x94   :  { %v5289_v33 = vcombine.high %v610_v28, %v614_v29  ;;  %v490_v34 = vld [vmem:[#allocation8 + $0x2c0] sm:$0xff]  ;;  %1868 = vmatprep.subr.bf16.mxu0 %v5177_v32  ;;  %v5288_v39 = vcombine.low %v610_v28, %v614_v29  ;;  %v5258_v28 = vcombine.low %v579_v15, %v583_v16  ;;  %v5114_v29 = vcombine.low %v435_v18, %v439_v19  ;;  %v419_v31 = vld [vmem:[#allocation8 + $0x88] sm:$0xff] }
  0x95   :  { %v494_v35 = vld [vmem:[#allocation8 + $0x2e0] sm:$0xff]  ;;  %1869 = vmatpush2.bf16.msra.mxu0 %v5176_v38  ;;  %v5251_v30 = vcombine.high %v571_v26, %v575_v27  ;;  %v423_v32 = vld [vmem:[#allocation8 + $0xa8] sm:$0xff] }
  0x96   :  { %v602_v36 = vld [vmem:[#allocation8 + $0x640] sm:$0xff]  ;;  %v5169_v40 = vcombine.high %v490_v34, %v494_v35  ;;  %1913 = vmatprep.subr.bf16.mxu1 %v5289_v33  ;;  %v5168_v46 = vcombine.low %v490_v34, %v494_v35  ;;  %v563_v33 = vld [vmem:[#allocation8 + $0x508] sm:$0xff]  ;;  %v5107_v34 = vcombine.high %v427_v23, %v431_v24 }
  0x97   :  { %v606_v37 = vld [vmem:[#allocation8 + $0x660] sm:$0xff]  ;;  %1914 = vmatpush2.bf16.msra.mxu1 %v5288_v39  ;;  %v567_v35 = vld [vmem:[#allocation8 + $0x528] sm:$0xff] }
  0x98   :  { %v5281_v41 = vcombine.high %v602_v36, %v606_v37  ;;  %v482_v42 = vld [vmem:[#allocation8 + $0x280] sm:$0xff]  ;;  %1870 = vmatprep.subr.bf16.mxu0 %v5169_v40  ;;  %v5280_v47 = vcombine.low %v602_v36, %v606_v37  ;;  %v5250_v36 = vcombine.low %v571_v26, %v575_v27  ;;  %v5106_v37 = vcombine.low %v427_v23, %v431_v24  ;;  %v411_v39 = vld [vmem:[#allocation8 + $0x48] sm:$0xff] }
  0x99   :  { %v486_v43 = vld [vmem:[#allocation8 + $0x2a0] sm:$0xff]  ;;  %1871 = vmatpush2.bf16.msra.mxu0 %v5168_v46  ;;  %v5243_v38 = vcombine.high %v563_v33, %v567_v35  ;;  %v415_v40 = vld [vmem:[#allocation8 + $0x68] sm:$0xff] }
  0x9a   :  { %v594_v44 = vld [vmem:[#allocation8 + $0x600] sm:$0xff]  ;;  %v5161_v48 = vcombine.high %v482_v42, %v486_v43  ;;  %1915 = vmatprep.subr.bf16.mxu1 %v5281_v41  ;;  %v5160_v55 = vcombine.low %v482_v42, %v486_v43  ;;  %v555_v41 = vld [vmem:[#allocation8 + $0x4c8] sm:$0xff]  ;;  %v5099_v42 = vcombine.high %v419_v31, %v423_v32  ;;  %v5090_v54 = vcombine.low %v411_v39, %v415_v40 }
  0x9b   :  { %v598_v45 = vld [vmem:[#allocation8 + $0x620] sm:$0xff]  ;;  %1916 = vmatpush2.bf16.msra.mxu1 %v5280_v47  ;;  %v559_v43 = vld [vmem:[#allocation8 + $0x4e8] sm:$0xff] }
  0x9c   :  { %v5273_v49 = vcombine.high %v594_v44, %v598_v45  ;;  %v474_v50 = vld [vmem:[#allocation8 + $0x240] sm:$0xff]  ;;  %1872 = vmatprep.subr.bf16.mxu0 %v5161_v48  ;;  %v5272_v56 = vcombine.low %v594_v44, %v598_v45  ;;  %v5242_v44 = vcombine.low %v563_v33, %v567_v35  ;;  %v5098_v45 = vcombine.low %v419_v31, %v423_v32  ;;  %v403_v47 = vld [vmem:[#allocation8 + $0x8] sm:$0xff] }
  0x9d   :  { %v478_v52 = vld [vmem:[#allocation8 + $0x260] sm:$0xff]  ;;  %1873 = vmatpush2.bf16.msra.mxu0 %v5160_v55  ;;  %v5235_v46 = vcombine.high %v555_v41, %v559_v43  ;;  %v407_v48 = vld [vmem:[#allocation8 + $0x28] sm:$0xff]  ;;  %v5234_v53 = vcombine.low %v555_v41, %v559_v43 }
  0x9e   :  { %v5153_v57 = vcombine.high %v474_v50, %v478_v52  ;;  %1917 = vmatprep.subr.bf16.mxu1 %v5273_v49  ;;  %v466_v60 = vld [vmem:[#allocation8 + $0x200] sm:$0xff]  ;;  %v5152_v2 = vcombine.low %v474_v50, %v478_v52  ;;  %v547_v49 = vld [vmem:[#allocation8 + $0x488] sm:$0xff]  ;;  %v5091_v50 = vcombine.high %v411_v39, %v415_v40  ;;  %v5082_v63 = vcombine.low %v403_v47, %v407_v48 }
  0x9f   :  { %v470_v62 = vld [vmem:[#allocation8 + $0x220] sm:$0xff]  ;;  %1918 = vmatpush2.bf16.msra.mxu1 %v5272_v56  ;;  %v551_v52 = vld [vmem:[#allocation8 + $0x4a8] sm:$0xff] }
  0xa0   :  { %1874 = vmatprep.subr.bf16.mxu0 %v5153_v57  ;;  %v5145_v4 = vcombine.high %v466_v60, %v470_v62  ;;  %1928 = vmatprep.subr.bf16.mxu1 %v5139_v59  ;;  %v5144_v10 = vcombine.low %v466_v60, %v470_v62  ;;  %v394_v11 = vld [vmem:[#allocation5] sm:$0xff]  ;;  %v5227_v55 = vcombine.high %v547_v49, %v551_v52  ;;  %v523_v56 = vld [vmem:[#allocation8 + $0x3c8] sm:$0xff] }
  0xa1   :  { %1875 = vmatpush2.bf16.msra.mxu0 %v5152_v2  ;;  %v6384_v17 = vpack.c.bf16 %v394_v11, %v394_v11  ;;  %v527_v57 = vld [vmem:[#allocation8 + $0x3e8] sm:$0xff]  ;;  %v5083_v59 = vcombine.high %v403_v47, %v407_v48  ;;  %v5226_v62 = vcombine.low %v547_v49, %v551_v52 }
  0xa2   :  { %1920 = vmatmul.mubr.bf16.vlgmr.msra.gmra.mxu1 %v6380_v1  ;;  %1876 = vmatprep.subr.bf16.mxu0 %v5145_v4  ;;  %v543_v60 = vld [vmem:[#allocation8 + $0x468] sm:$0xff]  ;;  %v5202_v8 = vcombine.low %v523_v56, %v527_v57 }
  0xa3   :  { %1929 = vmatpush1.bf16.msra.mxu1 %v5138_v3  ;;  %1960 = vmatprep.mubr.bf16.mxu1 %v6377_v61  ;;  %v5219_v0 = vcombine.high %v539_v58, %v543_v60  ;;  %v515_v2 = vld [vmem:[#allocation8 + $0x388] sm:$0xff]  ;;  %v5218_v7 = vcombine.low %v539_v58, %v543_v60  ;;  %v460_v60 = vld [vmem:[#allocation8 + $0x1d0] sm:$0xff] }
  0xa4   :  { %1930 = vmatprep.subr.bf16.mxu1 %v5131_v5  ;;  %v519_v3 = vld [vmem:[#allocation8 + $0x3a8] sm:$0xff]  ;;  %v5203_v5 = vcombine.high %v523_v56, %v527_v57 }
  0xa5   :  { %1877 = vmatpush2.bf16.msra.mxu0 %v5144_v10  ;;  %v531_v4 = vld [vmem:[#allocation8 + $0x408] sm:$0xff]  ;;  %v5194_v16 = vcombine.low %v515_v2, %v519_v3 }
  0xa6   :  { %1969 = vmatprep.subr.bf16.mxu0 %v5267_v13  ;;  %v535_v6 = vld [vmem:[#allocation8 + $0x428] sm:$0xff]  ;;  %v5195_v13 = vcombine.high %v515_v2, %v519_v3  ;;  %v592_v2 = vld [vmem:[#allocation8 + $0x5f0] sm:$0xff] }
  0xa7   :  { %1931 = vmatpush1.bf16.msra.mxu1 %v5130_v12  ;;  %v5211_v9 = vcombine.high %v531_v4, %v535_v6  ;;  %v507_v10 = vld [vmem:[#allocation8 + $0x348] sm:$0xff]  ;;  %v5210_v15 = vcombine.low %v531_v4, %v535_v6  ;;  %v452_v6 = vld [vmem:[#allocation8 + $0x190] sm:$0xff] }
  0xa8   :  { %1932 = vmatprep.subr.bf16.mxu1 %v5123_v14  ;;  %1879 = vmatmul.mubr.bf16.vlgmr.msra.gmra.mxu0 %v6384_v17  ;;  %v511_v11 = vld [vmem:[#allocation8 + $0x368] sm:$0xff] }
  0xa9   :  { %1970 = vmatpush1.bf16.msra.mxu0 %v5266_v20  ;;  %5321 = vmatprep.mubr.msk.bf16.mxu0 %vm1842_vm0, %v6373_v51  ;;  %v635_v12 = vld [vmem:[#allocation8 + $0x748] sm:$0xff] }
  0xaa   :  { %1971 = vmatprep.subr.bf16.mxu0 %v5259_v22  ;;  %v639_v14 = vld [vmem:[#allocation8 + $0x768] sm:$0xff]  ;;  %v5187_v22 = vcombine.high %v507_v10, %v511_v11 }
  0xab   :  { %1933 = vmatpush1.bf16.msra.mxu1 %v5122_v21  ;;  %v5315_v18 = vcombine.high %v635_v12, %v639_v14  ;;  %v499_v19 = vld [vmem:[#allocation8 + $0x308] sm:$0xff]  ;;  %v5314_v24 = vcombine.low %v635_v12, %v639_v14  ;;  %v444_v14 = vld [vmem:[#allocation8 + $0x150] sm:$0xff] }
  0xac   :  { %1934 = vmatprep.subr.bf16.mxu1 %v5115_v25  ;;  %v503_v20 = vld [vmem:[#allocation8 + $0x328] sm:$0xff]  ;;  %v5186_v25 = vcombine.low %v507_v10, %v511_v11  ;;  %v584_v10 = vld [vmem:[#allocation8 + $0x5b0] sm:$0xff] }
  0xad   :  { %1972 = vmatpush1.bf16.msra.mxu0 %v5258_v28  ;;  %v627_v21 = vld [vmem:[#allocation8 + $0x708] sm:$0xff]  ;;  %v5178_v33 = vcombine.low %v499_v19, %v503_v20 }
  0xae   :  { %1973 = vmatprep.subr.bf16.mxu0 %v5251_v30  ;;  %v631_v23 = vld [vmem:[#allocation8 + $0x728] sm:$0xff]  ;;  %v5179_v30 = vcombine.high %v499_v19, %v503_v20  ;;  %v576_v19 = vld [vmem:[#allocation8 + $0x570] sm:$0xff] }
  0xaf   :  { %1935 = vmatpush1.bf16.msra.mxu1 %v5114_v29  ;;  %v5307_v26 = vcombine.high %v627_v21, %v631_v23  ;;  %v491_v27 = vld [vmem:[#allocation8 + $0x2c8] sm:$0xff]  ;;  %v5306_v32 = vcombine.low %v627_v21, %v631_v23  ;;  %v436_v23 = vld [vmem:[#allocation8 + $0x110] sm:$0xff] }
  0xb0   :  { %1936 = vmatprep.subr.bf16.mxu1 %v5107_v34  ;;  %v495_v28 = vld [vmem:[#allocation8 + $0x2e8] sm:$0xff] }
  0xb1   :  { %1974 = vmatpush1.bf16.msra.mxu0 %v5250_v36  ;;  %v619_v29 = vld [vmem:[#allocation8 + $0x6c8] sm:$0xff]  ;;  %v5170_v41 = vcombine.low %v491_v27, %v495_v28 }
  0xb2   :  { %1975 = vmatprep.subr.bf16.mxu0 %v5243_v38  ;;  %v623_v31 = vld [vmem:[#allocation8 + $0x6e8] sm:$0xff]  ;;  %v5171_v38 = vcombine.high %v491_v27, %v495_v28  ;;  %v568_v27 = vld [vmem:[#allocation8 + $0x530] sm:$0xff] }
  0xb3   :  { %1937 = vmatpush1.bf16.msra.mxu1 %v5106_v37  ;;  %v5299_v34 = vcombine.high %v619_v29, %v623_v31  ;;  %v483_v35 = vld [vmem:[#allocation8 + $0x288] sm:$0xff]  ;;  %v5298_v40 = vcombine.low %v619_v29, %v623_v31  ;;  %v428_v31 = vld [vmem:[#allocation8 + $0xd0] sm:$0xff] }
  0xb4   :  { %1938 = vmatprep.subr.bf16.mxu1 %v5099_v42  ;;  %v487_v36 = vld [vmem:[#allocation8 + $0x2a8] sm:$0xff] }
  0xb5   :  { %1976 = vmatpush1.bf16.msra.mxu0 %v5242_v44  ;;  %v611_v37 = vld [vmem:[#allocation8 + $0x688] sm:$0xff]  ;;  %v5162_v49 = vcombine.low %v483_v35, %v487_v36 }
  0xb6   :  { %1977 = vmatprep.subr.bf16.mxu0 %v5235_v46  ;;  %v615_v39 = vld [vmem:[#allocation8 + $0x6a8] sm:$0xff]  ;;  %v5163_v46 = vcombine.high %v483_v35, %v487_v36  ;;  %v560_v35 = vld [vmem:[#allocation8 + $0x4f0] sm:$0xff] }
  0xb7   :  { %1939 = vmatpush1.bf16.msra.mxu1 %v5098_v45  ;;  %v5291_v42 = vcombine.high %v611_v37, %v615_v39  ;;  %v475_v43 = vld [vmem:[#allocation8 + $0x248] sm:$0xff]  ;;  %v5290_v48 = vcombine.low %v611_v37, %v615_v39  ;;  %v420_v39 = vld [vmem:[#allocation8 + $0x90] sm:$0xff] }
  0xb8   :  { %1940 = vmatprep.subr.bf16.mxu1 %v5091_v50  ;;  %v479_v44 = vld [vmem:[#allocation8 + $0x268] sm:$0xff] }
  0xb9   :  { %1978 = vmatpush1.bf16.msra.mxu0 %v5234_v53  ;;  %v603_v45 = vld [vmem:[#allocation8 + $0x648] sm:$0xff]  ;;  %v5154_v58 = vcombine.low %v475_v43, %v479_v44 }
  0xba   :  { %1979 = vmatprep.subr.bf16.mxu0 %v5227_v55  ;;  %v607_v47 = vld [vmem:[#allocation8 + $0x668] sm:$0xff]  ;;  %v5155_v55 = vcombine.high %v475_v43, %v479_v44  ;;  %v552_v43 = vld [vmem:[#allocation8 + $0x4b0] sm:$0xff] }
  0xbb   :  { %1941 = vmatpush1.bf16.msra.mxu1 %v5090_v54  ;;  %v5283_v50 = vcombine.high %v603_v45, %v607_v47  ;;  %v467_v52 = vld [vmem:[#allocation8 + $0x208] sm:$0xff]  ;;  %v5282_v57 = vcombine.low %v603_v45, %v607_v47  ;;  %v412_v47 = vld [vmem:[#allocation8 + $0x50] sm:$0xff] }
  0xbc   :  { %1942 = vmatprep.subr.bf16.mxu1 %v5083_v59  ;;  %v471_v53 = vld [vmem:[#allocation8 + $0x228] sm:$0xff] }
  0xbd   :  { %1980 = vmatpush1.bf16.msra.mxu0 %v5226_v62  ;;  %v595_v54 = vld [vmem:[#allocation8 + $0x608] sm:$0xff]  ;;  %v464_v62 = vld [vmem:[#allocation8 + $0x1f0] sm:$0xff]  ;;  %v5146_v4 = vcombine.low %v467_v52, %v471_v53 }
  0xbe   :  { %1981 = vmatprep.subr.bf16.mxu0 %v5219_v0  ;;  %v599_v56 = vld [vmem:[#allocation8 + $0x628] sm:$0xff]  ;;  %v5147_v0 = vcombine.high %v467_v52, %v471_v53  ;;  %v5140_v11 = vcombine.low %v460_v60, %v464_v62  ;;  %v544_v52 = vld [vmem:[#allocation8 + $0x470] sm:$0xff] }
  0xbf   :  { %1943 = vmatpush1.bf16.msra.mxu1 %v5082_v63  ;;  %v5275_v59 = vcombine.high %v595_v54, %v599_v56  ;;  %v588_v63 = vld [vmem:[#allocation8 + $0x5d0] sm:$0xff]  ;;  %v5274_v3 = vcombine.low %v595_v54, %v599_v56 }
  0xc0   :  { %1944 = vmatprep.subr.bf16.mxu1 %v5203_v5  ;;  %v5141_v5 = vcombine.high %v460_v60, %v464_v62  ;;  %v5268_v12 = vcombine.low %v588_v63, %v592_v2  ;;  %v404_v56 = vld [vmem:[#allocation8 + $0x10] sm:$0xff] }
  0xc1   :  { %1982 = vmatpush1.bf16.msra.mxu0 %v5218_v7  ;;  %v456_v7 = vld [vmem:[#allocation8 + $0x1b0] sm:$0xff] }
  0xc2   :  { %1983 = vmatprep.subr.bf16.mxu0 %v5211_v9  ;;  %v5269_v9 = vcombine.high %v588_v63, %v592_v2  ;;  %v5132_v20 = vcombine.low %v452_v6, %v456_v7  ;;  %v536_v60 = vld [vmem:[#allocation8 + $0x430] sm:$0xff] }
  0xc3   :  { %1945 = vmatpush2.bf16.msra.mxu1 %v5202_v8  ;;  %v580_v8 = vld [vmem:[#allocation8 + $0x590] sm:$0xff] }
  0xc4   :  { %1946 = vmatprep.subr.bf16.mxu1 %v5195_v13  ;;  %v5133_v13 = vcombine.high %v452_v6, %v456_v7  ;;  %v5260_v21 = vcombine.low %v580_v8, %v584_v10  ;;  %v640_v6 = vld [vmem:[#allocation8 + $0x770] sm:$0xff] }
  0xc5   :  { %1984 = vmatpush1.bf16.msra.mxu0 %v5210_v15  ;;  %v448_v15 = vld [vmem:[#allocation8 + $0x170] sm:$0xff] }
  0xc6   :  { %1989 = vmatprep.subr.bf16.mxu0 %v5315_v18  ;;  %v5261_v18 = vcombine.high %v580_v8, %v584_v10  ;;  %v5124_v28 = vcombine.low %v444_v14, %v448_v15 }
  0xc7   :  { %1947 = vmatpush2.bf16.msra.mxu1 %v5194_v16  ;;  %v572_v16 = vld [vmem:[#allocation8 + $0x550] sm:$0xff] }
  0xc8   :  { %1948 = vmatprep.subr.bf16.mxu1 %v5187_v22  ;;  %v5125_v22 = vcombine.high %v444_v14, %v448_v15  ;;  %v5252_v29 = vcombine.low %v572_v16, %v576_v19  ;;  %v632_v14 = vld [vmem:[#allocation8 + $0x730] sm:$0xff] }
  0xc9   :  { %1990 = vmatpush2.bf16.msra.mxu0 %v5314_v24  ;;  %v440_v24 = vld [vmem:[#allocation8 + $0x130] sm:$0xff] }
  0xca   :  { %1991 = vmatprep.subr.bf16.mxu0 %v5307_v26  ;;  %v5253_v26 = vcombine.high %v572_v16, %v576_v19  ;;  %v5116_v36 = vcombine.low %v436_v23, %v440_v24 }
  0xcb   :  { %1949 = vmatpush2.bf16.msra.mxu1 %v5186_v25  ;;  %v564_v25 = vld [vmem:[#allocation8 + $0x510] sm:$0xff] }
  0xcc   :  { %1950 = vmatprep.subr.bf16.mxu1 %v5179_v30  ;;  %v5117_v30 = vcombine.high %v436_v23, %v440_v24  ;;  %v5244_v37 = vcombine.low %v564_v25, %v568_v27  ;;  %v624_v23 = vld [vmem:[#allocation8 + $0x6f0] sm:$0xff] }
  0xcd   :  { %1992 = vmatpush2.bf16.msra.mxu0 %v5306_v32  ;;  %v432_v32 = vld [vmem:[#allocation8 + $0xf0] sm:$0xff] }
  0xce   :  { %1993 = vmatprep.subr.bf16.mxu0 %v5299_v34  ;;  %v5245_v34 = vcombine.high %v564_v25, %v568_v27  ;;  %v5108_v44 = vcombine.low %v428_v31, %v432_v32 }
  0xcf   :  { %1951 = vmatpush2.bf16.msra.mxu1 %v5178_v33  ;;  %v556_v33 = vld [vmem:[#allocation8 + $0x4d0] sm:$0xff] }
  0xd0   :  { %1952 = vmatprep.subr.bf16.mxu1 %v5171_v38  ;;  %v5109_v38 = vcombine.high %v428_v31, %v432_v32  ;;  %v5236_v45 = vcombine.low %v556_v33, %v560_v35  ;;  %v616_v31 = vld [vmem:[#allocation8 + $0x6b0] sm:$0xff] }
  0xd1   :  { %1994 = vmatpush2.bf16.msra.mxu0 %v5298_v40  ;;  %v424_v40 = vld [vmem:[#allocation8 + $0xb0] sm:$0xff] }
  0xd2   :  { %1995 = vmatprep.subr.bf16.mxu0 %v5291_v42  ;;  %v5237_v42 = vcombine.high %v556_v33, %v560_v35  ;;  %v5100_v53 = vcombine.low %v420_v39, %v424_v40 }
  0xd3   :  { %1953 = vmatpush2.bf16.msra.mxu1 %v5170_v41  ;;  %v548_v41 = vld [vmem:[#allocation8 + $0x490] sm:$0xff] }
  0xd4   :  { %1954 = vmatprep.subr.bf16.mxu1 %v5163_v46  ;;  %v5101_v46 = vcombine.high %v420_v39, %v424_v40  ;;  %v5228_v54 = vcombine.low %v548_v41, %v552_v43  ;;  %v608_v39 = vld [vmem:[#allocation8 + $0x670] sm:$0xff] }
  0xd5   :  { %1996 = vmatpush2.bf16.msra.mxu0 %v5290_v48  ;;  %v416_v48 = vld [vmem:[#allocation8 + $0x70] sm:$0xff] }
  0xd6   :  { %1997 = vmatprep.subr.bf16.mxu0 %v5283_v50  ;;  %v5229_v50 = vcombine.high %v548_v41, %v552_v43  ;;  %v5092_v62 = vcombine.low %v412_v47, %v416_v48 }
  0xd7   :  { %1955 = vmatpush2.bf16.msra.mxu1 %v5162_v49  ;;  %v540_v49 = vld [vmem:[#allocation8 + $0x450] sm:$0xff] }
  0xd8   :  { %1956 = vmatprep.subr.bf16.mxu1 %v5155_v55  ;;  %v5093_v55 = vcombine.high %v412_v47, %v416_v48  ;;  %v5220_v63 = vcombine.low %v540_v49, %v544_v52  ;;  %v600_v47 = vld [vmem:[#allocation8 + $0x630] sm:$0xff] }
  0xd9   :  { %1998 = vmatpush2.bf16.msra.mxu0 %v5282_v57  ;;  %v408_v57 = vld [vmem:[#allocation8 + $0x30] sm:$0xff] }
  0xda   :  { %1999 = vmatprep.subr.bf16.mxu0 %v5275_v59  ;;  %v5221_v59 = vcombine.high %v540_v49, %v544_v52  ;;  %v5084_v7 = vcombine.low %v404_v56, %v408_v57 }
  0xdb   :  { %1957 = vmatpush2.bf16.msra.mxu1 %v5154_v58  ;;  %v532_v58 = vld [vmem:[#allocation8 + $0x410] sm:$0xff] }
  0xdc   :  { %1958 = vmatprep.subr.bf16.mxu1 %v5147_v0  ;;  %v5085_v0 = vcombine.high %v404_v56, %v408_v57  ;;  %v5213_v2 = vcombine.high %v532_v58, %v536_v60  ;;  %v5212_v8 = vcombine.low %v532_v58, %v536_v60  ;;  %v465_v56 = vld [vmem:[#allocation8 + $0x1f8] sm:$0xff] }
  0xdd   :  { %2000 = vmatpush2.bf16.msra.mxu0 %v5274_v3  ;;  %v524_v3 = vld [vmem:[#allocation8 + $0x3d0] sm:$0xff] }
  0xde   :  { %2010 = vmatprep.subr.bf16.mxu0 %v5141_v5  ;;  %v636_v5 = vld [vmem:[#allocation8 + $0x750] sm:$0xff] }
  0xdf   :  { %1959 = vmatpush2.bf16.msra.mxu1 %v5146_v4  ;;  %v528_v4 = vld [vmem:[#allocation8 + $0x3f0] sm:$0xff]  ;;  %v5317_v10 = vcombine.high %v636_v5, %v640_v6  ;;  %v5316_v16 = vcombine.low %v636_v5, %v640_v6 }
  0xe0   :  { %2051 = vmatprep.subr.bf16.mxu1 %v5269_v9  ;;  %2002 = vmatmul.mubr.bf16.vlgmr.msra.gmra.mxu0 %v6380_v1  ;;  %v5205_v9 = vcombine.high %v524_v3, %v528_v4  ;;  %v5204_v15 = vcombine.low %v524_v3, %v528_v4 }
  0xe1   :  { %2011 = vmatpush1.bf16.msra.mxu0 %v5140_v11  ;;  %2042 = vmatprep.mubr.bf16.mxu0 %v6377_v61  ;;  %v516_v11 = vld [vmem:[#allocation8 + $0x390] sm:$0xff] }
  0xe2   :  { %1961 = vmatmul.mubr.bf16.vlgmr.msra.gmra.mxu1 %v6384_v17  ;;  %2012 = vmatprep.subr.bf16.mxu0 %v5133_v13  ;;  %v628_v13 = vld [vmem:[#allocation8 + $0x710] sm:$0xff] }
  0xe3   :  { %2052 = vmatpush1.bf16.msra.mxu1 %v5268_v12  ;;  %5322 = vmatprep.mubr.msk.bf16.mxu1 %vm1842_vm0, %v6373_v51  ;;  %v520_v12 = vld [vmem:[#allocation8 + $0x3b0] sm:$0xff]  ;;  %v5309_v19 = vcombine.high %v628_v13, %v632_v14  ;;  %v5308_v25 = vcombine.low %v628_v13, %v632_v14 }
  0xe4   :  { %2053 = vmatprep.subr.bf16.mxu1 %v5261_v18  ;;  %v5197_v18 = vcombine.high %v516_v11, %v520_v12  ;;  %v5196_v24 = vcombine.low %v516_v11, %v520_v12 }
  0xe5   :  { %2013 = vmatpush1.bf16.msra.mxu0 %v5132_v20  ;;  %v508_v20 = vld [vmem:[#allocation8 + $0x350] sm:$0xff] }
  0xe6   :  { %2014 = vmatprep.subr.bf16.mxu0 %v5125_v22  ;;  %v620_v22 = vld [vmem:[#allocation8 + $0x6d0] sm:$0xff] }
  0xe7   :  { %2054 = vmatpush1.bf16.msra.mxu1 %v5260_v21  ;;  %v512_v21 = vld [vmem:[#allocation8 + $0x370] sm:$0xff]  ;;  %v5301_v27 = vcombine.high %v620_v22, %v624_v23  ;;  %v5300_v33 = vcombine.low %v620_v22, %v624_v23 }
  0xe8   :  { %2055 = vmatprep.subr.bf16.mxu1 %v5253_v26  ;;  %v5189_v26 = vcombine.high %v508_v20, %v512_v21  ;;  %v5188_v32 = vcombine.low %v508_v20, %v512_v21 }
  0xe9   :  { %2015 = vmatpush1.bf16.msra.mxu0 %v5124_v28  ;;  %v500_v28 = vld [vmem:[#allocation8 + $0x310] sm:$0xff] }
  0xea   :  { %2016 = vmatprep.subr.bf16.mxu0 %v5117_v30  ;;  %v612_v30 = vld [vmem:[#allocation8 + $0x690] sm:$0xff] }
  0xeb   :  { %2056 = vmatpush1.bf16.msra.mxu1 %v5252_v29  ;;  %v504_v29 = vld [vmem:[#allocation8 + $0x330] sm:$0xff]  ;;  %v5293_v35 = vcombine.high %v612_v30, %v616_v31  ;;  %v5292_v41 = vcombine.low %v612_v30, %v616_v31  ;;  %v565_v31 = vld [vmem:[#allocation8 + $0x518] sm:$0xff] }
  0xec   :  { %2057 = vmatprep.subr.bf16.mxu1 %v5245_v34  ;;  %v5181_v34 = vcombine.high %v500_v28, %v504_v29  ;;  %v5180_v40 = vcombine.low %v500_v28, %v504_v29 }
  0xed   :  { %2017 = vmatpush1.bf16.msra.mxu0 %v5116_v36  ;;  %v492_v36 = vld [vmem:[#allocation8 + $0x2d0] sm:$0xff] }
  0xee   :  { %2018 = vmatprep.subr.bf16.mxu0 %v5109_v38  ;;  %v604_v38 = vld [vmem:[#allocation8 + $0x650] sm:$0xff] }
  0xef   :  { %2058 = vmatpush1.bf16.msra.mxu1 %v5244_v37  ;;  %v496_v37 = vld [vmem:[#allocation8 + $0x2f0] sm:$0xff]  ;;  %v5285_v43 = vcombine.high %v604_v38, %v608_v39  ;;  %v5284_v49 = vcombine.low %v604_v38, %v608_v39  ;;  %v557_v39 = vld [vmem:[#allocation8 + $0x4d8] sm:$0xff] }
  0xf0   :  { %2059 = vmatprep.subr.bf16.mxu1 %v5237_v42  ;;  %v5173_v42 = vcombine.high %v492_v36, %v496_v37  ;;  %v5172_v48 = vcombine.low %v492_v36, %v496_v37 }
  0xf1   :  { %2019 = vmatpush1.bf16.msra.mxu0 %v5108_v44  ;;  %v484_v44 = vld [vmem:[#allocation8 + $0x290] sm:$0xff] }
  0xf2   :  { %2020 = vmatprep.subr.bf16.mxu0 %v5101_v46  ;;  %v596_v46 = vld [vmem:[#allocation8 + $0x610] sm:$0xff] }
  0xf3   :  { %2060 = vmatpush1.bf16.msra.mxu1 %v5236_v45  ;;  %v488_v45 = vld [vmem:[#allocation8 + $0x2b0] sm:$0xff]  ;;  %v5277_v52 = vcombine.high %v596_v46, %v600_v47  ;;  %v5276_v58 = vcombine.low %v596_v46, %v600_v47  ;;  %v549_v46 = vld [vmem:[#allocation8 + $0x498] sm:$0xff] }
  0xf4   :  { %2061 = vmatprep.subr.bf16.mxu1 %v5229_v50  ;;  %v5165_v50 = vcombine.high %v484_v44, %v488_v45  ;;  %v5164_v57 = vcombine.low %v484_v44, %v488_v45  ;;  %v553_v47 = vld [vmem:[#allocation8 + $0x4b8] sm:$0xff] }
  0xf5   :  { %2021 = vmatpush1.bf16.msra.mxu0 %v5100_v53  ;;  %v476_v53 = vld [vmem:[#allocation8 + $0x250] sm:$0xff] }
  0xf6   :  { %2022 = vmatprep.subr.bf16.mxu0 %v5093_v55  ;;  %v461_v55 = vld [vmem:[#allocation8 + $0x1d8] sm:$0xff] }
  0xf7   :  { %2062 = vmatpush1.bf16.msra.mxu1 %v5228_v54  ;;  %v480_v54 = vld [vmem:[#allocation8 + $0x270] sm:$0xff]  ;;  %v5143_v60 = vcombine.high %v461_v55, %v465_v56  ;;  %v5142_v4 = vcombine.low %v461_v55, %v465_v56  ;;  %v541_v55 = vld [vmem:[#allocation8 + $0x458] sm:$0xff] }
  0xf8   :  { %2063 = vmatprep.subr.bf16.mxu1 %v5221_v59  ;;  %v5157_v59 = vcombine.high %v476_v53, %v480_v54  ;;  %v5156_v3 = vcombine.low %v476_v53, %v480_v54  ;;  %v5231_v53 = vcombine.high %v549_v46, %v553_v47  ;;  %v545_v56 = vld [vmem:[#allocation8 + $0x478] sm:$0xff] }
  0xf9   :  { %2023 = vmatpush1.bf16.msra.mxu0 %v5092_v62  ;;  %v468_v62 = vld [vmem:[#allocation8 + $0x210] sm:$0xff] }
  0xfa   :  { %2024 = vmatprep.subr.bf16.mxu0 %v5085_v0  ;;  %v453_v0 = vld [vmem:[#allocation8 + $0x198] sm:$0xff] }
  0xfb   :  { %2064 = vmatpush1.bf16.msra.mxu1 %v5220_v63  ;;  %v472_v63 = vld [vmem:[#allocation8 + $0x230] sm:$0xff] }
  0xfc   :  { %2065 = vmatprep.subr.bf16.mxu1 %v5213_v2  ;;  %v457_v2 = vld [vmem:[#allocation8 + $0x1b8] sm:$0xff]  ;;  %v5149_v5 = vcombine.high %v468_v62, %v472_v63  ;;  %v5148_v11 = vcombine.low %v468_v62, %v472_v63  ;;  %v5223_v62 = vcombine.high %v541_v55, %v545_v56 }
  0xfd   :  { %2025 = vmatpush1.bf16.msra.mxu0 %v5084_v7  ;;  %v5135_v6 = vcombine.high %v453_v0, %v457_v2  ;;  %v589_v7 = vld [vmem:[#allocation8 + $0x5d8] sm:$0xff]  ;;  %v5134_v12 = vcombine.low %v453_v0, %v457_v2 }
  0xfe   :  { %2026 = vmatprep.subr.bf16.mxu0 %v5205_v9  ;;  %v445_v9 = vld [vmem:[#allocation8 + $0x158] sm:$0xff] }
  0xff   :  { %2066 = vmatpush1.bf16.msra.mxu1 %v5212_v8  ;;  %v593_v8 = vld [vmem:[#allocation8 + $0x5f8] sm:$0xff] }
 0x100   :  { %2071 = vmatprep.subr.bf16.mxu1 %v5317_v10  ;;  %v449_v10 = vld [vmem:[#allocation8 + $0x178] sm:$0xff]  ;;  %v5271_v13 = vcombine.high %v589_v7, %v593_v8  ;;  %v5270_v20 = vcombine.low %v589_v7, %v593_v8 }
 0x101   :  { %2027 = vmatpush2.bf16.msra.mxu0 %v5204_v15  ;;  %v5127_v14 = vcombine.high %v445_v9, %v449_v10  ;;  %v581_v15 = vld [vmem:[#allocation8 + $0x598] sm:$0xff]  ;;  %v5126_v21 = vcombine.low %v445_v9, %v449_v10 }
 0x102   :  { %2028 = vmatprep.subr.bf16.mxu0 %v5197_v18  ;;  %v437_v18 = vld [vmem:[#allocation8 + $0x118] sm:$0xff] }
 0x103   :  { %2072 = vmatpush2.bf16.msra.mxu1 %v5316_v16  ;;  %v585_v16 = vld [vmem:[#allocation8 + $0x5b8] sm:$0xff] }
 0x104   :  { %2073 = vmatprep.subr.bf16.mxu1 %v5309_v19  ;;  %v441_v19 = vld [vmem:[#allocation8 + $0x138] sm:$0xff]  ;;  %v5263_v22 = vcombine.high %v581_v15, %v585_v16  ;;  %v5262_v28 = vcombine.low %v581_v15, %v585_v16 }
 0x105   :  { %2029 = vmatpush2.bf16.msra.mxu0 %v5196_v24  ;;  %v5119_v23 = vcombine.high %v437_v18, %v441_v19  ;;  %v573_v24 = vld [vmem:[#allocation8 + $0x558] sm:$0xff] }
 0x106   :  { %2030 = vmatprep.subr.bf16.mxu0 %v5189_v26  ;;  %v429_v26 = vld [vmem:[#allocation8 + $0xd8] sm:$0xff] }
 0x107   :  { %2074 = vmatpush2.bf16.msra.mxu1 %v5308_v25  ;;  %v577_v25 = vld [vmem:[#allocation8 + $0x578] sm:$0xff] }
 0x108   :  { %2075 = vmatprep.subr.bf16.mxu1 %v5301_v27  ;;  %v433_v27 = vld [vmem:[#allocation8 + $0xf8] sm:$0xff]  ;;  %v5255_v29 = vcombine.high %v573_v24, %v577_v25 }
 0x109   :  { %2031 = vmatpush2.bf16.msra.mxu0 %v5188_v32  ;;  %v5111_v30 = vcombine.high %v429_v26, %v433_v27  ;;  %v569_v32 = vld [vmem:[#allocation8 + $0x538] sm:$0xff]  ;;  %v5110_v36 = vcombine.low %v429_v26, %v433_v27 }
 0x10a   :  { %2032 = vmatprep.subr.bf16.mxu0 %v5181_v34  ;;  %v425_v34 = vld [vmem:[#allocation8 + $0xb8] sm:$0xff]  ;;  %v5247_v37 = vcombine.high %v565_v31, %v569_v32 }
 0x10b   :  { %2076 = vmatpush2.bf16.msra.mxu1 %v5300_v33  ;;  %v421_v33 = vld [vmem:[#allocation8 + $0x98] sm:$0xff] }
 0x10c   :  { %2077 = vmatprep.subr.bf16.mxu1 %v5293_v35  ;;  %v5254_v35 = vcombine.low %v573_v24, %v577_v25  ;;  %v5103_v38 = vcombine.high %v421_v33, %v425_v34  ;;  %v533_v0 = vld [vmem:[#allocation8 + $0x418] sm:$0xff] }
 0x10d   :  { %2033 = vmatpush2.bf16.msra.mxu0 %v5180_v40  ;;  %v413_v40 = vld [vmem:[#allocation8 + $0x58] sm:$0xff] }
 0x10e   :  { %2034 = vmatprep.subr.bf16.mxu0 %v5173_v42  ;;  %v5246_v42 = vcombine.low %v565_v31, %v569_v32  ;;  %v537_v2 = vld [vmem:[#allocation8 + $0x438] sm:$0xff] }
 0x10f   :  { %2078 = vmatpush2.bf16.msra.mxu1 %v5292_v41  ;;  %v417_v41 = vld [vmem:[#allocation8 + $0x78] sm:$0xff]  ;;  %v5215_v7 = vcombine.high %v533_v0, %v537_v2 }
 0x110   :  { %2079 = vmatprep.subr.bf16.mxu1 %v5285_v43  ;;  %v5102_v43 = vcombine.low %v421_v33, %v425_v34  ;;  %v5095_v45 = vcombine.high %v413_v40, %v417_v41  ;;  %v637_v9 = vld [vmem:[#allocation8 + $0x758] sm:$0xff] }
 0x111   :  { %2035 = vmatpush2.bf16.msra.mxu0 %v5172_v48  ;;  %v405_v48 = vld [vmem:[#allocation8 + $0x18] sm:$0xff] }
 0x112   :  { %2036 = vmatprep.subr.bf16.mxu0 %v5165_v50  ;;  %v641_v10 = vld [vmem:[#allocation8 + $0x778] sm:$0xff] }
 0x113   :  { %2080 = vmatpush2.bf16.msra.mxu1 %v5284_v49  ;;  %v409_v49 = vld [vmem:[#allocation8 + $0x38] sm:$0xff]  ;;  %v5319_v15 = vcombine.high %v637_v9, %v641_v10 }
 0x114   :  { %2081 = vmatprep.subr.bf16.mxu1 %v5277_v52  ;;  %v5094_v52 = vcombine.low %v413_v40, %v417_v41  ;;  %v5087_v54 = vcombine.high %v405_v48, %v409_v49  ;;  %v621_v26 = vld [vmem:[#allocation8 + $0x6d8] sm:$0xff] }
 0x115   :  { %2037 = vmatpush2.bf16.msra.mxu0 %v5164_v57  ;;  %v525_v57 = vld [vmem:[#allocation8 + $0x3d8] sm:$0xff] }
 0x116   :  { %2038 = vmatprep.subr.bf16.mxu0 %v5157_v59  ;;  %v5230_v59 = vcombine.low %v549_v46, %v553_v47  ;;  %v625_v27 = vld [vmem:[#allocation8 + $0x6f8] sm:$0xff] }
 0x117   :  { %2082 = vmatpush2.bf16.msra.mxu1 %v5276_v58  ;;  %v529_v58 = vld [vmem:[#allocation8 + $0x3f8] sm:$0xff]  ;;  %v5303_v31 = vcombine.high %v621_v26, %v625_v27 }
 0x118   :  { %2092 = vmatprep.subr.bf16.mxu1 %v5143_v60  ;;  %v5086_v60 = vcombine.low %v405_v48, %v409_v49  ;;  %v5207_v63 = vcombine.high %v525_v57, %v529_v58  ;;  %v613_v33 = vld [vmem:[#allocation8 + $0x698] sm:$0xff] }
 0x119   :  { %2039 = vmatpush2.bf16.msra.mxu0 %v5156_v3  ;;  %v517_v3 = vld [vmem:[#allocation8 + $0x398] sm:$0xff] }
 0x11a   :  { %2084 = vmatmul.mubr.bf16.vlgmr.msra.gmra.mxu1 %v6380_v1  ;;  %2040 = vmatprep.subr.bf16.mxu0 %v5149_v5  ;;  %v5222_v5 = vcombine.low %v541_v55, %v545_v56  ;;  %v617_v34 = vld [vmem:[#allocation8 + $0x6b8] sm:$0xff] }
 0x11b   :  { %2093 = vmatpush1.bf16.msra.mxu1 %v5142_v4  ;;  %2124 = vmatprep.mubr.bf16.mxu1 %v6377_v61  ;;  %v5118_v61 = vcombine.low %v437_v18, %v441_v19  ;;  %v521_v4 = vld [vmem:[#allocation8 + $0x3b8] sm:$0xff] }
 0x11c   :  { %2094 = vmatprep.subr.bf16.mxu1 %v5135_v6  ;;  %v5206_v6 = vcombine.low %v525_v57, %v529_v58  ;;  %v5199_v8 = vcombine.high %v517_v3, %v521_v4  ;;  %v629_v18 = vld [vmem:[#allocation8 + $0x718] sm:$0xff]  ;;  %v210_v57 = vld [vmem:[#allocation7 + $0x1c0] sm:$0xff] }
 0x11d   :  { %2041 = vmatpush2.bf16.msra.mxu0 %v5148_v11  ;;  %v509_v11 = vld [vmem:[#allocation8 + $0x358] sm:$0xff]  ;;  %v214_v58 = vld [vmem:[#allocation7 + $0x1e0] sm:$0xff] }
 0x11e   :  { %2133 = vmatprep.subr.bf16.mxu0 %v5271_v13  ;;  %v5214_v13 = vcombine.low %v533_v0, %v537_v2  ;;  %v633_v19 = vld [vmem:[#allocation8 + $0x738] sm:$0xff]  ;;  %v5381_v0 = vcombine.high %v210_v57, %v214_v58 }
 0x11f   :  { %2095 = vmatpush1.bf16.msra.mxu1 %v5134_v12  ;;  %v513_v12 = vld [vmem:[#allocation8 + $0x378] sm:$0xff]  ;;  %v5311_v24 = vcombine.high %v629_v18, %v633_v19 }
 0x120   :  { %2096 = vmatprep.subr.bf16.mxu1 %v5127_v14  ;;  %2043 = vmatmul.mubr.bf16.vlgmr.msra.gmra.mxu0 %v6384_v17  ;;  %v5198_v14 = vcombine.low %v517_v3, %v521_v4  ;;  %v5191_v16 = vcombine.high %v509_v11, %v513_v12  ;;  %v605_v40 = vld [vmem:[#allocation8 + $0x658] sm:$0xff]  ;;  %v202_v3 = vld [vmem:[#allocation7 + $0x180] sm:$0xff] }
 0x121   :  { %2134 = vmatpush1.bf16.msra.mxu0 %v5270_v20  ;;  %5323 = vmatprep.mubr.msk.bf16.mxu0 %vm1842_vm0, %v6373_v51  ;;  %v561_v51 = vld [vmem:[#allocation8 + $0x4f8] sm:$0xff]  ;;  %v206_v4 = vld [vmem:[#allocation7 + $0x1a0] sm:$0xff] }
 0x122   :  { %2135 = vmatprep.subr.bf16.mxu0 %v5263_v22  ;;  %v5239_v44 = vcombine.high %v557_v39, %v561_v51  ;;  %v5238_v50 = vcombine.low %v557_v39, %v561_v51  ;;  %v501_v20 = vld [vmem:[#allocation8 + $0x318] sm:$0xff]  ;;  %v5318_v22 = vcombine.low %v637_v9, %v641_v10  ;;  %v5295_v39 = vcombine.high %v613_v33, %v617_v34  ;;  %v147_v9 = vld [vmem:[#allocation2 + $0x8] sm:$0xff] }
 0x123   :  { %2097 = vmatpush1.bf16.msra.mxu1 %v5126_v21  ;;  %v505_v21 = vld [vmem:[#allocation8 + $0x338] sm:$0xff] }
 0x124   :  { %2098 = vmatprep.subr.bf16.mxu1 %v5119_v23  ;;  %v5190_v23 = vcombine.low %v509_v11, %v513_v12  ;;  %v5183_v25 = vcombine.high %v501_v20, %v505_v21  ;;  %v609_v41 = vld [vmem:[#allocation8 + $0x678] sm:$0xff]  ;;  %v5373_v11 = vcombine.high %v202_v3, %v206_v4 }
 0x125   :  { %2136 = vmatpush1.bf16.msra.mxu0 %v5262_v28  ;;  %v493_v28 = vld [vmem:[#allocation8 + $0x2d8] sm:$0xff]  ;;  %v5287_v46 = vcombine.high %v605_v40, %v609_v41 }
 0x126   :  { %2137 = vmatprep.subr.bf16.mxu0 %v5255_v29  ;;  %v5310_v29 = vcombine.low %v629_v18, %v633_v19  ;;  %v597_v48 = vld [vmem:[#allocation8 + $0x618] sm:$0xff]  ;;  %v326_v18 = vld [vmem:[#allocation7 + $0x560] sm:$0xff]  ;;  %v6402_v19 = vpack.c.bf16 %v147_v9, %v147_v9 }
 0x127   :  { %2099 = vmatpush1.bf16.msra.mxu1 %v5118_v61  ;;  %v497_v61 = vld [vmem:[#allocation8 + $0x2f8] sm:$0xff]  ;;  %v274_v9 = vld [vmem:[#allocation7 + $0x3c0] sm:$0xff] }
 0x128   :  { %2100 = vmatprep.subr.bf16.mxu1 %v5111_v30  ;;  %v5182_v30 = vcombine.low %v501_v20, %v505_v21  ;;  %v5175_v32 = vcombine.high %v493_v28, %v497_v61  ;;  %v601_v49 = vld [vmem:[#allocation8 + $0x638] sm:$0xff]  ;;  %v5372_v20 = vcombine.low %v202_v3, %v206_v4  ;;  %v286_v3 = vld [vmem:[#allocation7 + $0x420] sm:$0xff] }
 0x129   :  { %2138 = vmatpush1.bf16.msra.mxu0 %v5254_v35  ;;  %v485_v35 = vld [vmem:[#allocation8 + $0x298] sm:$0xff]  ;;  %v5279_v55 = vcombine.high %v597_v48, %v601_v49 }
 0x12a   :  { %2139 = vmatprep.subr.bf16.mxu0 %v5247_v37  ;;  %v5302_v37 = vcombine.low %v621_v26, %v625_v27  ;;  %v318_v26 = vld [vmem:[#allocation7 + $0x520] sm:$0xff] }
 0x12b   :  { %2101 = vmatpush1.bf16.msra.mxu1 %v5110_v36  ;;  %v489_v36 = vld [vmem:[#allocation8 + $0x2b8] sm:$0xff] }
 0x12c   :  { %2102 = vmatprep.subr.bf16.mxu1 %v5103_v38  ;;  %v5174_v38 = vcombine.low %v493_v28, %v497_v61  ;;  %v5167_v51 = vcombine.high %v485_v35, %v489_v36 }
 0x12d   :  { %2140 = vmatpush1.bf16.msra.mxu0 %v5246_v42  ;;  %v477_v42 = vld [vmem:[#allocation8 + $0x258] sm:$0xff] }
 0x12e   :  { %2141 = vmatprep.subr.bf16.mxu0 %v5239_v44  ;;  %v5294_v44 = vcombine.low %v613_v33, %v617_v34 }
 0x12f   :  { %2103 = vmatpush1.bf16.msra.mxu1 %v5102_v43  ;;  %v481_v43 = vld [vmem:[#allocation8 + $0x278] sm:$0xff] }
 0x130   :  { %2104 = vmatprep.subr.bf16.mxu1 %v5095_v45  ;;  %v5166_v45 = vcombine.low %v485_v35, %v489_v36  ;;  %v5159_v47 = vcombine.high %v477_v42, %v481_v43 }
 0x131   :  { %2142 = vmatpush1.bf16.msra.mxu0 %v5238_v50  ;;  %v469_v50 = vld [vmem:[#allocation8 + $0x218] sm:$0xff] }
 0x132   :  { %2143 = vmatprep.subr.bf16.mxu0 %v5231_v53  ;;  %v5286_v53 = vcombine.low %v605_v40, %v609_v41  ;;  %v298_v40 = vld [vmem:[#allocation7 + $0x480] sm:$0xff] }
 0x133   :  { %2105 = vmatpush1.bf16.msra.mxu1 %v5094_v52  ;;  %v473_v52 = vld [vmem:[#allocation8 + $0x238] sm:$0xff]  ;;  %v302_v41 = vld [vmem:[#allocation7 + $0x4a0] sm:$0xff] }
 0x134   :  { %2106 = vmatprep.subr.bf16.mxu1 %v5087_v54  ;;  %v5158_v54 = vcombine.low %v477_v42, %v481_v43  ;;  %v5151_v56 = vcombine.high %v469_v50, %v473_v52 }
 0x135   :  { %2144 = vmatpush1.bf16.msra.mxu0 %v5230_v59  ;;  %v338_v59 = vld [vmem:[#allocation7 + $0x5c0] sm:$0xff] }
 0x136   :  { %2145 = vmatprep.subr.bf16.mxu0 %v5223_v62  ;;  %v5278_v62 = vcombine.low %v597_v48, %v601_v49  ;;  %v162_v48 = vld [vmem:[#allocation7 + $0x40] sm:$0xff] }
 0x137   :  { %2107 = vmatpush1.bf16.msra.mxu1 %v5086_v60  ;;  %v342_v60 = vld [vmem:[#allocation7 + $0x5e0] sm:$0xff] }
 0x138   :  { %2108 = vmatprep.subr.bf16.mxu1 %v5207_v63  ;;  %v5150_v63 = vcombine.low %v469_v50, %v473_v52  ;;  %v5509_v2 = vcombine.high %v338_v59, %v342_v60  ;;  %v5508_v10 = vcombine.low %v338_v59, %v342_v60  ;;  %v166_v49 = vld [vmem:[#allocation7 + $0x60] sm:$0xff] }
 0x139   :  { %2146 = vmatpush1.bf16.msra.mxu0 %v5222_v5  ;;  %v330_v5 = vld [vmem:[#allocation7 + $0x580] sm:$0xff]  ;;  %v5332_v4 = vcombine.low %v162_v48, %v166_v49 }
 0x13a   :  { %2147 = vmatprep.subr.bf16.mxu0 %v5215_v7  ;;  %v149_v7 = vld [vmem:[#allocation2 + $0x18] sm:$0xff]  ;;  %v290_v52 = vld [vmem:[#allocation7 + $0x440] sm:$0xff] }
 0x13b   :  { %2109 = vmatpush2.bf16.msra.mxu1 %v5206_v6  ;;  %v334_v6 = vld [vmem:[#allocation7 + $0x5a0] sm:$0xff] }
 0x13c   :  { %2110 = vmatprep.subr.bf16.mxu1 %v5199_v8  ;;  %v5380_v8 = vcombine.low %v210_v57, %v214_v58  ;;  %v5501_v12 = vcombine.high %v330_v5, %v334_v6  ;;  %v5500_v21 = vcombine.low %v330_v5, %v334_v6  ;;  %v5468_v57 = vcombine.low %v298_v40, %v302_v41 }
 0x13d   :  { %2148 = vmatpush1.bf16.msra.mxu0 %v5214_v13  ;;  %v194_v13 = vld [vmem:[#allocation7 + $0x140] sm:$0xff]  ;;  %v5333_v58 = vcombine.high %v162_v48, %v166_v49 }
 0x13e   :  { %2153 = vmatprep.subr.bf16.mxu0 %v5319_v15  ;;  %v6399_v15 = vpack.c.bf16 %v149_v7, %v149_v7  ;;  %v234_v48 = vld [vmem:[#allocation7 + $0x280] sm:$0xff] }
 0x13f   :  { %2111 = vmatpush2.bf16.msra.mxu1 %v5198_v14  ;;  %v198_v14 = vld [vmem:[#allocation7 + $0x160] sm:$0xff] }
 0x140   :  { %2112 = vmatprep.subr.bf16.mxu1 %v5191_v16  ;;  %v322_v16 = vld [vmem:[#allocation7 + $0x540] sm:$0xff]  ;;  %v5364_v27 = vcombine.low %v194_v13, %v198_v14 }
 0x141   :  { %2154 = vmatpush2.bf16.msra.mxu0 %v5318_v22  ;;  %v5365_v22 = vcombine.high %v194_v13, %v198_v14  ;;  %v238_v49 = vld [vmem:[#allocation7 + $0x2a0] sm:$0xff] }
 0x142   :  { %2155 = vmatprep.subr.bf16.mxu0 %v5311_v24  ;;  %v186_v24 = vld [vmem:[#allocation7 + $0x100] sm:$0xff] }
 0x143   :  { %2113 = vmatpush2.bf16.msra.mxu1 %v5190_v23  ;;  %v5493_v23 = vcombine.high %v322_v16, %v326_v18 }
 0x144   :  { %2114 = vmatprep.subr.bf16.mxu1 %v5183_v25  ;;  %v190_v25 = vld [vmem:[#allocation7 + $0x120] sm:$0xff] }
 0x145   :  { %2156 = vmatpush2.bf16.msra.mxu0 %v5310_v29  ;;  %v5357_v28 = vcombine.high %v186_v24, %v190_v25  ;;  %v178_v29 = vld [vmem:[#allocation7 + $0xc0] sm:$0xff]  ;;  %v5356_v34 = vcombine.low %v186_v24, %v190_v25 }
 0x146   :  { %2157 = vmatprep.subr.bf16.mxu0 %v5303_v31  ;;  %v306_v31 = vld [vmem:[#allocation7 + $0x4c0] sm:$0xff] }
 0x147   :  { %2115 = vmatpush2.bf16.msra.mxu1 %v5182_v30  ;;  %v182_v30 = vld [vmem:[#allocation7 + $0xe0] sm:$0xff] }
 0x148   :  { %2116 = vmatprep.subr.bf16.mxu1 %v5175_v32  ;;  %v310_v32 = vld [vmem:[#allocation7 + $0x4e0] sm:$0xff]  ;;  %v5349_v36 = vcombine.high %v178_v29, %v182_v30  ;;  %v5348_v43 = vcombine.low %v178_v29, %v182_v30 }
 0x149   :  { %2158 = vmatpush2.bf16.msra.mxu0 %v5302_v37 }
 0x14a   :  { %2159 = vmatprep.subr.bf16.mxu0 %v5295_v39  ;;  %v170_v39 = vld [vmem:[#allocation7 + $0x80] sm:$0xff] }
 0x14b   :  { %2117 = vmatpush2.bf16.msra.mxu1 %v5174_v38  ;;  %v5477_v38 = vcombine.high %v306_v31, %v310_v32 }
 0x14c   :  { %2118 = vmatprep.subr.bf16.mxu1 %v5167_v51  ;;  %v174_v51 = vld [vmem:[#allocation7 + $0xa0] sm:$0xff] }
 0x14d   :  { %2160 = vmatpush2.bf16.msra.mxu0 %v5294_v44  ;;  %v5476_v44 = vcombine.low %v306_v31, %v310_v32 }
 0x14e   :  { %2161 = vmatprep.subr.bf16.mxu0 %v5287_v46 }
 0x14f   :  { %2119 = vmatpush2.bf16.msra.mxu1 %v5166_v45  ;;  %v5341_v45 = vcombine.high %v170_v39, %v174_v51 }
 0x150   :  { %2120 = vmatprep.subr.bf16.mxu1 %v5159_v47  ;;  %v5469_v47 = vcombine.high %v298_v40, %v302_v41  ;;  %v242_v40 = vld [vmem:[#allocation7 + $0x2c0] sm:$0xff] }
 0x151   :  { %2162 = vmatpush2.bf16.msra.mxu0 %v5286_v53  ;;  %v294_v53 = vld [vmem:[#allocation7 + $0x460] sm:$0xff] }
 0x152   :  { %2163 = vmatprep.subr.bf16.mxu0 %v5279_v55  ;;  %v5340_v55 = vcombine.low %v170_v39, %v174_v51  ;;  %v5461_v60 = vcombine.high %v290_v52, %v294_v53  ;;  %v5460_v6 = vcombine.low %v290_v52, %v294_v53  ;;  %v246_v41 = vld [vmem:[#allocation7 + $0x2e0] sm:$0xff] }
 0x153   :  { %2121 = vmatpush2.bf16.msra.mxu1 %v5158_v54  ;;  %v350_v52 = vld [vmem:[#allocation7 + $0x620] sm:$0xff]  ;;  %v5412_v53 = vcombine.low %v242_v40, %v246_v41 }
 0x154   :  { %2122 = vmatprep.subr.bf16.mxu1 %v5151_v56 }
 0x155   :  { %2164 = vmatpush2.bf16.msra.mxu0 %v5278_v62  ;;  %v154_v62 = vld [vmem:[#allocation7] sm:$0xff] }
 0x156   :  { %3377 = vmatprep.subr.bf16.mxu0 %v5381_v0 }
 0x157   :  { %2123 = vmatpush2.bf16.msra.mxu1 %v5150_v63  ;;  %v158_v63 = vld [vmem:[#allocation7 + $0x20] sm:$0xff] }
 0x158   :  { %3418 = vmatprep.subr.bf16.mxu1 %v5509_v2  ;;  %2166 = vmatmul.mubr.bf16.vlgmr.msra.gmra.mxu0 %v6380_v1  ;;  %v314_v1 = vld [vmem:[#allocation7 + $0x500] sm:$0xff]  ;;  %v5325_v7 = vcombine.high %v154_v62, %v158_v63  ;;  %v5324_v13 = vcombine.low %v154_v62, %v158_v63  ;;  %v211_v62 = vld [vmem:[#allocation7 + $0x1c8] sm:$0xff] }
 0x159   :  { %3378 = vmatpush1.bf16.msra.mxu0 %v5380_v8  ;;  %3409 = vmatprep.mubr.bf16.mxu0 %v6402_v19  ;;  %v5485_v61 = vcombine.high %v314_v1, %v318_v26  ;;  %v5484_v35 = vcombine.low %v314_v1, %v318_v26  ;;  %v282_v2 = vld [vmem:[#allocation7 + $0x400] sm:$0xff]  ;;  %v215_v63 = vld [vmem:[#allocation7 + $0x1e8] sm:$0xff] }
 0x15a   :  { %2125 = vmatmul.mubr.bf16.vlgmr.msra.gmra.mxu1 %v6384_v17  ;;  %3379 = vmatprep.subr.bf16.mxu0 %v5373_v11  ;;  %v5492_v17 = vcombine.low %v322_v16, %v326_v18  ;;  %v5453_v8 = vcombine.high %v282_v2, %v286_v3  ;;  %v386_v11 = vld [vmem:[#allocation7 + $0x740] sm:$0xff]  ;;  %v5452_v14 = vcombine.low %v282_v2, %v286_v3 }
 0x15b   :  { %3419 = vmatpush1.bf16.msra.mxu1 %v5508_v10  ;;  %5564 = vmatprep.mubr.msk.bf16.mxu1 %vm1842_vm0, %v6399_v15  ;;  %v278_v10 = vld [vmem:[#allocation7 + $0x3e0] sm:$0xff] }
 0x15c   :  { %3420 = vmatprep.subr.bf16.mxu1 %v5501_v12  ;;  %v390_v12 = vld [vmem:[#allocation7 + $0x760] sm:$0xff]  ;;  %v5445_v16 = vcombine.high %v274_v9, %v278_v10  ;;  %v5444_v24 = vcombine.low %v274_v9, %v278_v10  ;;  %v207_v9 = vld [vmem:[#allocation7 + $0x1a8] sm:$0xff] }
 0x15d   :  { %3380 = vmatpush1.bf16.msra.mxu0 %v5372_v20  ;;  %v5557_v18 = vcombine.high %v386_v11, %v390_v12  ;;  %v266_v20 = vld [vmem:[#allocation7 + $0x380] sm:$0xff]  ;;  %v5556_v25 = vcombine.low %v386_v11, %v390_v12  ;;  %v5382_v12 = vcombine.low %v211_v62, %v215_v63 }
 0x15e   :  { %3381 = vmatprep.subr.bf16.mxu0 %v5365_v22  ;;  %v378_v22 = vld [vmem:[#allocation7 + $0x700] sm:$0xff] }
 0x15f   :  { %3421 = vmatpush1.bf16.msra.mxu1 %v5500_v21  ;;  %v270_v21 = vld [vmem:[#allocation7 + $0x3a0] sm:$0xff] }
 0x160   :  { %3422 = vmatprep.subr.bf16.mxu1 %v5493_v23  ;;  %v382_v23 = vld [vmem:[#allocation7 + $0x720] sm:$0xff]  ;;  %v5437_v1 = vcombine.high %v266_v20, %v270_v21  ;;  %v5436_v29 = vcombine.low %v266_v20, %v270_v21  ;;  %v195_v20 = vld [vmem:[#allocation7 + $0x148] sm:$0xff] }
 0x161   :  { %3382 = vmatpush1.bf16.msra.mxu0 %v5364_v27  ;;  %v5549_v26 = vcombine.high %v378_v22, %v382_v23  ;;  %v258_v27 = vld [vmem:[#allocation7 + $0x340] sm:$0xff]  ;;  %v5548_v30 = vcombine.low %v378_v22, %v382_v23  ;;  %v199_v21 = vld [vmem:[#allocation7 + $0x168] sm:$0xff] }
 0x162   :  { %v1921_v33 = vpop.f32.mrf.mxu1  ;;  %3383 = vmatprep.subr.bf16.mxu0 %v5357_v28  ;;  %v370_v28 = vld [vmem:[#allocation7 + $0x6c0] sm:$0xff] }
 0x163   :  { %3423 = vmatpush1.bf16.msra.mxu1 %v5492_v17  ;;  %v262_v17 = vld [vmem:[#allocation7 + $0x360] sm:$0xff] }
 0x164   :  { %v1923_v37 = vpop.f32.mrf.mxu1  ;;  %3424 = vmatprep.subr.bf16.mxu1 %v5485_v61  ;;  %v374_v61 = vld [vmem:[#allocation7 + $0x6e0] sm:$0xff]  ;;  %v5429_v31 = vcombine.high %v258_v27, %v262_v17 }
 0x165   :  { %3384 = vmatpush1.bf16.msra.mxu0 %v5356_v34  ;;  %v5541_v32 = vcombine.high %v370_v28, %v374_v61  ;;  %v254_v34 = vld [vmem:[#allocation7 + $0x320] sm:$0xff] }
 0x166   :  { %v1925_v42 = vpop.f32.mrf.mxu1  ;;  %3385 = vmatprep.subr.bf16.mxu0 %v5349_v36  ;;  %v366_v36 = vld [vmem:[#allocation7 + $0x6a0] sm:$0xff] }
 0x167   :  { %3425 = vmatpush1.bf16.msra.mxu1 %v5484_v35  ;;  %v362_v35 = vld [vmem:[#allocation7 + $0x680] sm:$0xff] }
 0x168   :  { %v1926_v46 = vpop.f32.mrf.mxu1  ;;  %3426 = vmatprep.subr.bf16.mxu1 %v5477_v38  ;;  %v1880_v50 = vpop.f32.mrf.mxu0  ;;  %v5540_v38 = vcombine.low %v370_v28, %v374_v61  ;;  %v5533_v51 = vcombine.high %v362_v35, %v366_v36  ;;  %v354_v42 = vld [vmem:[#allocation7 + $0x640] sm:$0xff]  ;;  %v187_v28 = vld [vmem:[#allocation7 + $0x108] sm:$0xff] }
 0x169   :  { %v6408_v54 = vadd.f32 %v1921_v33, %v1880_v50  ;;  %3386 = vmatpush1.bf16.msra.mxu0 %v5348_v43  ;;  %v250_v33 = vld [vmem:[#allocation7 + $0x300] sm:$0xff]  ;;  %v5413_v46 = vcombine.high %v242_v40, %v246_v41  ;;  %v191_v61 = vld [vmem:[#allocation7 + $0x128] sm:$0xff] }
 0x16a   :  { %v1882_v56 = vpop.f32.mrf.mxu0  ;;  %3387 = vmatprep.subr.bf16.mxu0 %v5341_v45  ;;  %v5421_v39 = vcombine.high %v250_v33, %v254_v34  ;;  %v358_v43 = vld [vmem:[#allocation7 + $0x660] sm:$0xff]  ;;  %v5532_v45 = vcombine.low %v362_v35, %v366_v36  ;;  %v179_v35 = vld [vmem:[#allocation7 + $0xc8] sm:$0xff] }
 0x16b   :  { %3427 = vmatpush1.bf16.msra.mxu1 %v5476_v44  ;;  %v6410_v59 = vadd.f32 %v1923_v37, %v1882_v56  ;;  %v5428_v37 = vcombine.low %v258_v27, %v262_v17  ;;  %v5420_v44 = vcombine.low %v250_v33, %v254_v34  ;;  %v346_v50 = vld [vmem:[#allocation7 + $0x600] sm:$0xff]  ;;  %v5405_v56 = vcombine.high %v234_v48, %v238_v49  ;;  %v335_v27 = vld [vmem:[#allocation7 + $0x5a8] sm:$0xff] }
 0x16c   :  { %3428 = vmatprep.subr.bf16.mxu1 %v5469_v47  ;;  %v1884_v0 = vpop.f32.mrf.mxu0  ;;  %v5525_v47 = vcombine.high %v354_v42, %v358_v43  ;;  %v5516_v2 = vcombine.low %v346_v50, %v350_v52  ;;  %v146_v23 = vld [vmem:[#allocation2] sm:$0xff]  ;;  %v323_v33 = vld [vmem:[#allocation7 + $0x548] sm:$0xff] }
 0x16d   :  { %3388 = vmatpush1.bf16.msra.mxu0 %v5340_v55  ;;  %v5524_v55 = vcombine.low %v354_v42, %v358_v43  ;;  %v5404_v0 = vcombine.low %v234_v48, %v238_v49  ;;  %v6416_v17 = vpack.c.bf16 %v146_v23, %v146_v23  ;;  %v327_v34 = vld [vmem:[#allocation7 + $0x568] sm:$0xff] }
 0x16e   :  { %v1885_v5 = vpop.f32.mrf.mxu0  ;;  %3389 = vmatprep.subr.bf16.mxu0 %v5333_v58  ;;  %v226_v58 = vld [vmem:[#allocation7 + $0x240] sm:$0xff]  ;;  %v183_v36 = vld [vmem:[#allocation7 + $0xe8] sm:$0xff] }
 0x16f   :  { %3429 = vmatpush1.bf16.msra.mxu1 %v5468_v57  ;;  %v5517_v57 = vcombine.high %v346_v50, %v350_v52  ;;  %v5383_v5 = vcombine.high %v211_v62, %v215_v63  ;;  %v315_v40 = vld [vmem:[#allocation7 + $0x508] sm:$0xff] }
 0x170   :  { %3430 = vmatprep.subr.bf16.mxu1 %v5461_v60  ;;  %v230_v60 = vld [vmem:[#allocation7 + $0x260] sm:$0xff]  ;;  %v319_v41 = vld [vmem:[#allocation7 + $0x528] sm:$0xff] }
 0x171   :  { %3390 = vmatpush1.bf16.msra.mxu0 %v5332_v4  ;;  %v5397_v3 = vcombine.high %v226_v58, %v230_v60  ;;  %v148_v4 = vld [vmem:[#allocation2 + $0x10] sm:$0xff]  ;;  %v5396_v10 = vcombine.low %v226_v58, %v230_v60  ;;  %v171_v42 = vld [vmem:[#allocation7 + $0x88] sm:$0xff] }
 0x172   :  { %3391 = vmatprep.subr.bf16.mxu0 %v5325_v7  ;;  %v222_v7 = vld [vmem:[#allocation7 + $0x220] sm:$0xff]  ;;  %v6412_v11 = vpack.c.bf16 %v148_v4, %v148_v4  ;;  %v175_v43 = vld [vmem:[#allocation7 + $0xa8] sm:$0xff] }
 0x173   :  { %3431 = vmatpush1.bf16.msra.mxu1 %v5460_v6  ;;  %v218_v6 = vld [vmem:[#allocation7 + $0x200] sm:$0xff]  ;;  %v307_v48 = vld [vmem:[#allocation7 + $0x4c8] sm:$0xff]  ;;  %v5342_v60 = vcombine.low %v171_v42, %v175_v43 }
 0x174   :  { %3432 = vmatprep.subr.bf16.mxu1 %v5453_v8  ;;  %v203_v8 = vld [vmem:[#allocation7 + $0x188] sm:$0xff]  ;;  %v5388_v22 = vcombine.low %v218_v6, %v222_v7 }
 0x175   :  { %3392 = vmatpush1.bf16.msra.mxu0 %v5324_v13  ;;  %v5389_v13 = vcombine.high %v218_v6, %v222_v7  ;;  %v311_v49 = vld [vmem:[#allocation7 + $0x4e8] sm:$0xff] }
 0x176   :  { %3393 = vmatprep.subr.bf16.mxu0 %v5445_v16  ;;  %v339_v16 = vld [vmem:[#allocation7 + $0x5c8] sm:$0xff]  ;;  %v5479_v62 = vcombine.high %v307_v48, %v311_v49 }
 0x177   :  { %3433 = vmatpush1.bf16.msra.mxu1 %v5452_v14  ;;  %v5375_v14 = vcombine.high %v203_v8, %v207_v9  ;;  %v163_v52 = vld [vmem:[#allocation7 + $0x48] sm:$0xff] }
 0x178   :  { %3438 = vmatprep.subr.bf16.mxu1 %v5557_v18  ;;  %v343_v18 = vld [vmem:[#allocation7 + $0x5e8] sm:$0xff] }
 0x179   :  { %3394 = vmatpush2.bf16.msra.mxu0 %v5444_v24  ;;  %v5374_v24 = vcombine.low %v203_v8, %v207_v9  ;;  %v155_v6 = vld [vmem:[#allocation7 + $0x8] sm:$0xff]  ;;  %v5478_v9 = vcombine.low %v307_v48, %v311_v49 }
 0x17a   :  { %3395 = vmatprep.subr.bf16.mxu0 %v5437_v1  ;;  %v5367_v1 = vcombine.high %v195_v20, %v199_v21  ;;  %v159_v7 = vld [vmem:[#allocation7 + $0x28] sm:$0xff] }
 0x17b   :  { %3439 = vmatpush2.bf16.msra.mxu1 %v5556_v25  ;;  %v5511_v25 = vcombine.high %v339_v16, %v343_v18  ;;  %v371_v48 = vld [vmem:[#allocation7 + $0x6c8] sm:$0xff] }
 0x17c   :  { %3440 = vmatprep.subr.bf16.mxu1 %v5549_v26  ;;  %v331_v26 = vld [vmem:[#allocation7 + $0x588] sm:$0xff] }
 0x17d   :  { %3396 = vmatpush2.bf16.msra.mxu0 %v5436_v29  ;;  %v5510_v29 = vcombine.low %v339_v16, %v343_v18  ;;  %v5327_v16 = vcombine.high %v155_v6, %v159_v7  ;;  %v291_v18 = vld [vmem:[#allocation7 + $0x448] sm:$0xff] }
 0x17e   :  { %3397 = vmatprep.subr.bf16.mxu0 %v5429_v31  ;;  %v5503_v31 = vcombine.high %v331_v26, %v335_v27  ;;  %v375_v49 = vld [vmem:[#allocation7 + $0x6e8] sm:$0xff] }
 0x17f   :  { %3441 = vmatpush2.bf16.msra.mxu1 %v5548_v30  ;;  %v5366_v30 = vcombine.low %v195_v20, %v199_v21  ;;  %v295_v20 = vld [vmem:[#allocation7 + $0x468] sm:$0xff] }
 0x180   :  { %3442 = vmatprep.subr.bf16.mxu1 %v5541_v32  ;;  %v5359_v32 = vcombine.high %v187_v28, %v191_v61  ;;  %v275_v21 = vld [vmem:[#allocation7 + $0x3c8] sm:$0xff] }
 0x181   :  { %3398 = vmatpush2.bf16.msra.mxu0 %v5428_v37  ;;  %v5502_v37 = vcombine.low %v331_v26, %v335_v27  ;;  %v283_v26 = vld [vmem:[#allocation7 + $0x408] sm:$0xff] }
 0x182   :  { %3399 = vmatprep.subr.bf16.mxu0 %v5421_v39  ;;  %v5495_v39 = vcombine.high %v323_v33, %v327_v34  ;;  %v287_v27 = vld [vmem:[#allocation7 + $0x428] sm:$0xff] }
 0x183   :  { %3443 = vmatpush2.bf16.msra.mxu1 %v5540_v38  ;;  %v5358_v38 = vcombine.low %v187_v28, %v191_v61  ;;  %v267_v28 = vld [vmem:[#allocation7 + $0x388] sm:$0xff] }
 0x184   :  { %3444 = vmatprep.subr.bf16.mxu1 %v5533_v51  ;;  %v5351_v51 = vcombine.high %v179_v35, %v183_v36  ;;  %v271_v61 = vld [vmem:[#allocation7 + $0x3a8] sm:$0xff] }
 0x185   :  { %3400 = vmatpush2.bf16.msra.mxu0 %v5420_v44  ;;  %v5494_v44 = vcombine.low %v323_v33, %v327_v34  ;;  %v387_v33 = vld [vmem:[#allocation7 + $0x748] sm:$0xff] }
 0x186   :  { %3401 = vmatprep.subr.bf16.mxu0 %v5413_v46  ;;  %v5487_v46 = vcombine.high %v315_v40, %v319_v41  ;;  %v391_v34 = vld [vmem:[#allocation7 + $0x768] sm:$0xff] }
 0x187   :  { %3445 = vmatpush2.bf16.msra.mxu1 %v5532_v45  ;;  %v5350_v45 = vcombine.low %v179_v35, %v183_v36  ;;  %v259_v35 = vld [vmem:[#allocation7 + $0x348] sm:$0xff] }
 0x188   :  { %3446 = vmatprep.subr.bf16.mxu1 %v5525_v47  ;;  %v5343_v47 = vcombine.high %v171_v42, %v175_v43  ;;  %v263_v36 = vld [vmem:[#allocation7 + $0x368] sm:$0xff] }
 0x189   :  { %3402 = vmatpush2.bf16.msra.mxu0 %v5412_v53  ;;  %v167_v53 = vld [vmem:[#allocation7 + $0x68] sm:$0xff] }
 0x18a   :  { %3403 = vmatprep.subr.bf16.mxu0 %v5405_v56  ;;  %v5486_v56 = vcombine.low %v315_v40, %v319_v41  ;;  %v379_v40 = vld [vmem:[#allocation7 + $0x708] sm:$0xff] }
 0x18b   :  { %3447 = vmatpush2.bf16.msra.mxu1 %v5524_v55  ;;  %v383_v41 = vld [vmem:[#allocation7 + $0x728] sm:$0xff] }
 0x18c   :  { %3448 = vmatprep.subr.bf16.mxu1 %v5517_v57  ;;  %v251_v42 = vld [vmem:[#allocation7 + $0x308] sm:$0xff] }
 0x18d   :  { %3404 = vmatpush2.bf16.msra.mxu0 %v5404_v0  ;;  %v5335_v0 = vcombine.high %v163_v52, %v167_v53  ;;  %v255_v43 = vld [vmem:[#allocation7 + $0x328] sm:$0xff] }
 0x18e   :  { %3405 = vmatprep.subr.bf16.mxu0 %v5397_v3  ;;  %v303_v3 = vld [vmem:[#allocation7 + $0x4a8] sm:$0xff] }
 0x18f   :  { %3449 = vmatpush2.bf16.msra.mxu1 %v5516_v2  ;;  %v299_v2 = vld [vmem:[#allocation7 + $0x488] sm:$0xff] }
 0x190   :  { %3459 = vmatprep.subr.bf16.mxu1 %v5383_v5  ;;  %v5470_v23 = vcombine.low %v299_v2, %v303_v3 }
 0x191   :  { %3406 = vmatpush2.bf16.msra.mxu0 %v5396_v10 }
 0x192   :  { %3451 = vmatmul.mubr.bf16.vlgmr.msra.gmra.mxu1 %v6412_v11  ;;  %3407 = vmatprep.subr.bf16.mxu0 %v5389_v13  ;;  %v5471_v13 = vcombine.high %v299_v2, %v303_v3  ;;  %v5542_v2 = vcombine.low %v371_v48, %v375_v49 }
 0x193   :  { %3460 = vmatpush1.bf16.msra.mxu1 %v5382_v12  ;;  %3491 = vmatprep.mubr.bf16.mxu1 %v6402_v19  ;;  %v5334_v12 = vcombine.low %v163_v52, %v167_v53  ;;  %v247_v52 = vld [vmem:[#allocation7 + $0x2e8] sm:$0xff]  ;;  %v5550_v53 = vcombine.low %v379_v40, %v383_v41 }
 0x194   :  { %3461 = vmatprep.subr.bf16.mxu1 %v5375_v14 }
 0x195   :  { %3408 = vmatpush2.bf16.msra.mxu0 %v5388_v22  ;;  %v279_v22 = vld [vmem:[#allocation7 + $0x3e8] sm:$0xff] }
 0x196   :  { %3500 = vmatprep.subr.bf16.mxu0 %v5511_v25  ;;  %v5463_v25 = vcombine.high %v291_v18, %v295_v20 }
 0x197   :  { %3462 = vmatpush1.bf16.msra.mxu1 %v5374_v24  ;;  %v5326_v24 = vcombine.low %v155_v6, %v159_v7  ;;  %v355_v7 = vld [vmem:[#allocation7 + $0x648] sm:$0xff] }
 0x198   :  { %3463 = vmatprep.subr.bf16.mxu1 %v5367_v1  ;;  %3410 = vmatmul.mubr.bf16.vlgmr.msra.gmra.mxu0 %v6416_v17  ;;  %v5447_v1 = vcombine.high %v275_v21, %v279_v22 }
 0x199   :  { %3501 = vmatpush1.bf16.msra.mxu0 %v5510_v29  ;;  %5565 = vmatprep.mubr.msk.bf16.mxu0 %vm1842_vm0, %v6399_v15  ;;  %v5462_v29 = vcombine.low %v291_v18, %v295_v20  ;;  %v347_v18 = vld [vmem:[#allocation7 + $0x608] sm:$0xff] }
 0x19a   :  { %3502 = vmatprep.subr.bf16.mxu0 %v5503_v31  ;;  %v5455_v31 = vcombine.high %v283_v26, %v287_v27  ;;  %v351_v20 = vld [vmem:[#allocation7 + $0x628] sm:$0xff] }
 0x19b   :  { %3464 = vmatpush1.bf16.msra.mxu1 %v5366_v30  ;;  %v5446_v30 = vcombine.low %v275_v21, %v279_v22  ;;  %v219_v21 = vld [vmem:[#allocation7 + $0x208] sm:$0xff] }
 0x19c   :  { %3465 = vmatprep.subr.bf16.mxu1 %v5359_v32  ;;  %v5439_v32 = vcombine.high %v267_v28, %v271_v61  ;;  %v223_v22 = vld [vmem:[#allocation7 + $0x228] sm:$0xff] }
 0x19d   :  { %3503 = vmatpush1.bf16.msra.mxu0 %v5502_v37  ;;  %v5454_v37 = vcombine.low %v283_v26, %v287_v27  ;;  %v212_v26 = vld [vmem:[#allocation7 + $0x1d0] sm:$0xff] }
 0x19e   :  { %3504 = vmatprep.subr.bf16.mxu0 %v5495_v39  ;;  %v5559_v39 = vcombine.high %v387_v33, %v391_v34  ;;  %v216_v27 = vld [vmem:[#allocation7 + $0x1f0] sm:$0xff] }
 0x19f   :  { %3466 = vmatpush1.bf16.msra.mxu1 %v5358_v38  ;;  %v5438_v38 = vcombine.low %v267_v28, %v271_v61  ;;  %v340_v28 = vld [vmem:[#allocation7 + $0x5d0] sm:$0xff] }
 0x1a0   :  { %3467 = vmatprep.subr.bf16.mxu1 %v5351_v51  ;;  %v2003_v50 = vpop.f32.mrf.mxu0  ;;  %v5431_v51 = vcombine.high %v259_v35, %v263_v36  ;;  %v344_v61 = vld [vmem:[#allocation7 + $0x5f0] sm:$0xff] }
 0x1a1   :  { %3505 = vmatpush1.bf16.msra.mxu0 %v5494_v44  ;;  %v5558_v44 = vcombine.low %v387_v33, %v391_v34  ;;  %v204_v33 = vld [vmem:[#allocation7 + $0x190] sm:$0xff] }
 0x1a2   :  { %v1962_v55 = vpop.f32.mrf.mxu1  ;;  %v2005_v58 = vpop.f32.mrf.mxu0  ;;  %3506 = vmatprep.subr.bf16.mxu0 %v5487_v46  ;;  %v5551_v46 = vcombine.high %v379_v40, %v383_v41  ;;  %v208_v34 = vld [vmem:[#allocation7 + $0x1b0] sm:$0xff] }
 0x1a3   :  { %v6421_v57 = vadd.f32 %v2003_v50, %v1962_v55  ;;  %3468 = vmatpush1.bf16.msra.mxu1 %v5350_v45  ;;  %v5430_v45 = vcombine.low %v259_v35, %v263_v36  ;;  %v243_v50 = vld [vmem:[#allocation7 + $0x2c8] sm:$0xff]  ;;  %v5422_v55 = vcombine.low %v251_v42, %v255_v43  ;;  %v332_v35 = vld [vmem:[#allocation7 + $0x590] sm:$0xff] }
 0x1a4   :  { %v1964_v63 = vpop.f32.mrf.mxu1  ;;  %3469 = vmatprep.subr.bf16.mxu1 %v5343_v47  ;;  %v2007_v5 = vpop.f32.mrf.mxu0  ;;  %v5423_v47 = vcombine.high %v251_v42, %v255_v43  ;;  %v5414_v3 = vcombine.low %v243_v50, %v247_v52  ;;  %v336_v36 = vld [vmem:[#allocation7 + $0x5b0] sm:$0xff] }
 0x1a5   :  { %v6423_v4 = vadd.f32 %v2005_v58, %v1964_v63  ;;  %3507 = vmatpush1.bf16.msra.mxu0 %v5486_v56  ;;  %v5543_v56 = vcombine.high %v371_v48, %v375_v49  ;;  %v5415_v58 = vcombine.high %v243_v50, %v247_v52  ;;  %v235_v63 = vld [vmem:[#allocation7 + $0x288] sm:$0xff]  ;;  %v196_v40 = vld [vmem:[#allocation7 + $0x150] sm:$0xff] }
 0x1a6   :  { %v1966_v8 = vpop.f32.mrf.mxu1  ;;  %v2008_v10 = vpop.f32.mrf.mxu0  ;;  %3508 = vmatprep.subr.bf16.mxu0 %v5479_v62  ;;  %v367_v62 = vld [vmem:[#allocation7 + $0x6a8] sm:$0xff]  ;;  %v200_v41 = vld [vmem:[#allocation7 + $0x170] sm:$0xff] }
 0x1a7   :  { %3470 = vmatpush1.bf16.msra.mxu1 %v5342_v60  ;;  %v363_v60 = vld [vmem:[#allocation7 + $0x688] sm:$0xff]  ;;  %v324_v42 = vld [vmem:[#allocation7 + $0x550] sm:$0xff] }
 0x1a8   :  { %v1967_v14 = vpop.f32.mrf.mxu1  ;;  %3471 = vmatprep.subr.bf16.mxu1 %v5335_v0  ;;  %v239_v0 = vld [vmem:[#allocation7 + $0x2a8] sm:$0xff]  ;;  %v5535_v5 = vcombine.high %v363_v60, %v367_v62  ;;  %v328_v43 = vld [vmem:[#allocation7 + $0x570] sm:$0xff] }
 0x1a9   :  { %3509 = vmatpush1.bf16.msra.mxu0 %v5478_v9  ;;  %v5407_v6 = vcombine.high %v235_v63, %v239_v0  ;;  %v359_v8 = vld [vmem:[#allocation7 + $0x668] sm:$0xff]  ;;  %v188_v48 = vld [vmem:[#allocation7 + $0x110] sm:$0xff] }
 0x1aa   :  { %3510 = vmatprep.subr.bf16.mxu0 %v5471_v13  ;;  %v227_v9 = vld [vmem:[#allocation7 + $0x248] sm:$0xff]  ;;  %v5406_v13 = vcombine.low %v235_v63, %v239_v0  ;;  %v5527_v14 = vcombine.high %v355_v7, %v359_v8  ;;  %v192_v49 = vld [vmem:[#allocation7 + $0x130] sm:$0xff] }
 0x1ab   :  { %3472 = vmatpush1.bf16.msra.mxu1 %v5334_v12  ;;  %v231_v10 = vld [vmem:[#allocation7 + $0x268] sm:$0xff]  ;;  %v5534_v12 = vcombine.low %v363_v60, %v367_v62  ;;  %v316_v50 = vld [vmem:[#allocation7 + $0x510] sm:$0xff] }
 0x1ac   :  { %3473 = vmatprep.subr.bf16.mxu1 %v5327_v16  ;;  %v5399_v16 = vcombine.high %v227_v9, %v231_v10  ;;  %v320_v52 = vld [vmem:[#allocation7 + $0x530] sm:$0xff] }
 0x1ad   :  { %3511 = vmatpush1.bf16.msra.mxu0 %v5470_v23  ;;  %v5526_v23 = vcombine.low %v355_v7, %v359_v8  ;;  %v180_v60 = vld [vmem:[#allocation7 + $0xd0] sm:$0xff] }
 0x1ae   :  { %3512 = vmatprep.subr.bf16.mxu0 %v5463_v25  ;;  %v5519_v25 = vcombine.high %v347_v18, %v351_v20  ;;  %v184_v62 = vld [vmem:[#allocation7 + $0xf0] sm:$0xff] }
 0x1af   :  { %3474 = vmatpush1.bf16.msra.mxu1 %v5326_v24  ;;  %v5398_v24 = vcombine.low %v227_v9, %v231_v10  ;;  %v308_v63 = vld [vmem:[#allocation7 + $0x4d0] sm:$0xff] }
 0x1b0   :  { %3475 = vmatprep.subr.bf16.mxu1 %v5447_v1  ;;  %v5391_v1 = vcombine.high %v219_v21, %v223_v22  ;;  %v312_v0 = vld [vmem:[#allocation7 + $0x4f0] sm:$0xff] }
 0x1b1   :  { %3513 = vmatpush1.bf16.msra.mxu0 %v5462_v29  ;;  %v5518_v29 = vcombine.low %v347_v18, %v351_v20  ;;  %v5481_v8 = vcombine.high %v308_v63, %v312_v0  ;;  %v172_v9 = vld [vmem:[#allocation7 + $0x90] sm:$0xff]  ;;  %v5480_v18 = vcombine.low %v308_v63, %v312_v0 }
 0x1b2   :  { %3514 = vmatprep.subr.bf16.mxu0 %v5455_v31  ;;  %v5385_v31 = vcombine.high %v212_v26, %v216_v27  ;;  %v176_v10 = vld [vmem:[#allocation7 + $0xb0] sm:$0xff] }
 0x1b3   :  { %3476 = vmatpush2.bf16.msra.mxu1 %v5446_v30  ;;  %v5390_v30 = vcombine.low %v219_v21, %v223_v22  ;;  %v5345_v20 = vcombine.high %v172_v9, %v176_v10  ;;  %v260_v63 = vld [vmem:[#allocation7 + $0x350] sm:$0xff] }
 0x1b4   :  { %3477 = vmatprep.subr.bf16.mxu1 %v5439_v32  ;;  %v5513_v32 = vcombine.high %v340_v28, %v344_v61  ;;  %v264_v0 = vld [vmem:[#allocation7 + $0x370] sm:$0xff] }
 0x1b5   :  { %3515 = vmatpush1.bf16.msra.mxu0 %v5454_v37  ;;  %v5384_v37 = vcombine.low %v212_v26, %v216_v27  ;;  %v296_v26 = vld [vmem:[#allocation7 + $0x470] sm:$0xff] }
 0x1b6   :  { %3520 = vmatprep.subr.bf16.mxu0 %v5559_v39  ;;  %v5377_v39 = vcombine.high %v204_v33, %v208_v34 }
 0x1b7   :  { %3478 = vmatpush2.bf16.msra.mxu1 %v5438_v38  ;;  %v5512_v38 = vcombine.low %v340_v28, %v344_v61  ;;  %v5344_v28 = vcombine.low %v172_v9, %v176_v10  ;;  %v252_v9 = vld [vmem:[#allocation7 + $0x310] sm:$0xff] }
 0x1b8   :  { %3479 = vmatprep.subr.bf16.mxu1 %v5431_v51  ;;  %v5505_v51 = vcombine.high %v332_v35, %v336_v36  ;;  %v256_v10 = vld [vmem:[#allocation7 + $0x330] sm:$0xff] }
 0x1b9   :  { %3521 = vmatpush2.bf16.msra.mxu0 %v5558_v44  ;;  %v5376_v44 = vcombine.low %v204_v33, %v208_v34  ;;  %v156_v33 = vld [vmem:[#allocation7 + $0x10] sm:$0xff] }
 0x1ba   :  { %3522 = vmatprep.subr.bf16.mxu0 %v5551_v46  ;;  %v5369_v46 = vcombine.high %v196_v40, %v200_v41  ;;  %v160_v34 = vld [vmem:[#allocation7 + $0x30] sm:$0xff] }
 0x1bb   :  { %3480 = vmatpush2.bf16.msra.mxu1 %v5430_v45  ;;  %v5504_v45 = vcombine.low %v332_v35, %v336_v36  ;;  %v284_v36 = vld [vmem:[#allocation7 + $0x410] sm:$0xff] }
 0x1bc   :  { %3481 = vmatprep.subr.bf16.mxu1 %v5423_v47  ;;  %v5497_v47 = vcombine.high %v324_v42, %v328_v43 }
 0x1bd   :  { %3523 = vmatpush2.bf16.msra.mxu0 %v5550_v53  ;;  %v5368_v53 = vcombine.low %v196_v40, %v200_v41  ;;  %v5329_v40 = vcombine.high %v156_v33, %v160_v34 }
 0x1be   :  { %3524 = vmatprep.subr.bf16.mxu0 %v5543_v56  ;;  %v5361_v56 = vcombine.high %v188_v48, %v192_v49 }
 0x1bf   :  { %3482 = vmatpush2.bf16.msra.mxu1 %v5422_v55  ;;  %v5496_v55 = vcombine.low %v324_v42, %v328_v43  ;;  %v276_v42 = vld [vmem:[#allocation7 + $0x3d0] sm:$0xff] }
 0x1c0   :  { %3483 = vmatprep.subr.bf16.mxu1 %v5415_v58  ;;  %v5489_v58 = vcombine.high %v316_v50, %v320_v52  ;;  %v280_v43 = vld [vmem:[#allocation7 + $0x3f0] sm:$0xff] }
 0x1c1   :  { %3525 = vmatpush2.bf16.msra.mxu0 %v5542_v2 }
 0x1c2   :  { %3526 = vmatprep.subr.bf16.mxu0 %v5535_v5  ;;  %v5488_v5 = vcombine.low %v316_v50, %v320_v52  ;;  %v268_v50 = vld [vmem:[#allocation7 + $0x390] sm:$0xff] }
 0x1c3   :  { %3484 = vmatpush2.bf16.msra.mxu1 %v5414_v3  ;;  %v5360_v3 = vcombine.low %v188_v48, %v192_v49  ;;  %v5449_v48 = vcombine.high %v276_v42, %v280_v43  ;;  %v272_v52 = vld [vmem:[#allocation7 + $0x3b0] sm:$0xff] }
 0x1c4   :  { %3485 = vmatprep.subr.bf16.mxu1 %v5407_v6  ;;  %v5353_v6 = vcombine.high %v180_v60, %v184_v62 }
 0x1c5   :  { %3527 = vmatpush2.bf16.msra.mxu0 %v5534_v12  ;;  %v300_v12 = vld [vmem:[#allocation7 + $0x490] sm:$0xff] }
 0x1c6   :  { %3528 = vmatprep.subr.bf16.mxu0 %v5527_v14 }
 0x1c7   :  { %3486 = vmatpush2.bf16.msra.mxu1 %v5406_v13  ;;  %v304_v13 = vld [vmem:[#allocation7 + $0x4b0] sm:$0xff] }
 0x1c8   :  { %3487 = vmatprep.subr.bf16.mxu1 %v5399_v16  ;;  %v5352_v16 = vcombine.low %v180_v60, %v184_v62  ;;  %v5473_v22 = vcombine.high %v300_v12, %v304_v13  ;;  %v5441_v60 = vcombine.high %v268_v50, %v272_v52 }
 0x1c9   :  { %3529 = vmatpush2.bf16.msra.mxu0 %v5526_v23  ;;  %v164_v23 = vld [vmem:[#allocation7 + $0x50] sm:$0xff] }
 0x1ca   :  { %3530 = vmatprep.subr.bf16.mxu0 %v5519_v25 }
 0x1cb   :  { %3488 = vmatpush2.bf16.msra.mxu1 %v5398_v24  ;;  %v168_v24 = vld [vmem:[#allocation7 + $0x70] sm:$0xff] }
 0x1cc   :  { %3489 = vmatprep.subr.bf16.mxu1 %v5391_v1  ;;  %v292_v1 = vld [vmem:[#allocation7 + $0x450] sm:$0xff] }
 0x1cd   :  { %3531 = vmatpush2.bf16.msra.mxu0 %v5518_v29  ;;  %v5472_v29 = vcombine.low %v300_v12, %v304_v13  ;;  %v364_v12 = vld [vmem:[#allocation7 + $0x690] sm:$0xff] }
 0x1ce   :  { %3541 = vmatprep.subr.bf16.mxu0 %v5385_v31  ;;  %v368_v13 = vld [vmem:[#allocation7 + $0x6b0] sm:$0xff] }
 0x1cf   :  { %3490 = vmatpush2.bf16.msra.mxu1 %v5390_v30  ;;  %v5337_v30 = vcombine.high %v164_v23, %v168_v24 }
 0x1d0   :  { %3582 = vmatprep.subr.bf16.mxu1 %v5513_v32  ;;  %3533 = vmatmul.mubr.bf16.vlgmr.msra.gmra.mxu0 %v6412_v11  ;;  %v5465_v32 = vcombine.high %v292_v1, %v296_v26 }
 0x1d1   :  { %3542 = vmatpush1.bf16.msra.mxu0 %v5384_v37  ;;  %3573 = vmatprep.mubr.bf16.mxu0 %v6402_v19  ;;  %v288_v37 = vld [vmem:[#allocation7 + $0x430] sm:$0xff] }
 0x1d2   :  { %3492 = vmatmul.mubr.bf16.vlgmr.msra.gmra.mxu1 %v6416_v17  ;;  %3543 = vmatprep.subr.bf16.mxu0 %v5377_v39  ;;  %v5457_v41 = vcombine.high %v284_v36, %v288_v37 }
 0x1d3   :  { %3583 = vmatpush1.bf16.msra.mxu1 %v5512_v38  ;;  %5566 = vmatprep.mubr.msk.bf16.mxu1 %vm1842_vm0, %v6399_v15  ;;  %v5336_v38 = vcombine.low %v164_v23, %v168_v24  ;;  %v356_v23 = vld [vmem:[#allocation7 + $0x650] sm:$0xff] }
 0x1d4   :  { %3584 = vmatprep.subr.bf16.mxu1 %v5505_v51  ;;  %v5464_v51 = vcombine.low %v292_v1, %v296_v26  ;;  %v360_v24 = vld [vmem:[#allocation7 + $0x670] sm:$0xff]  ;;  %v5536_v1 = vcombine.low %v364_v12, %v368_v13 }
 0x1d5   :  { %3544 = vmatpush1.bf16.msra.mxu0 %v5376_v44  ;;  %v388_v44 = vld [vmem:[#allocation7 + $0x750] sm:$0xff] }
 0x1d6   :  { %3545 = vmatprep.subr.bf16.mxu0 %v5369_v46  ;;  %v5328_v46 = vcombine.low %v156_v33, %v160_v34  ;;  %v5528_v34 = vcombine.low %v356_v23, %v360_v24 }
 0x1d7   :  { %3585 = vmatpush1.bf16.msra.mxu1 %v5504_v45  ;;  %v392_v45 = vld [vmem:[#allocation7 + $0x770] sm:$0xff] }
 0x1d8   :  { %3586 = vmatprep.subr.bf16.mxu1 %v5497_v47  ;;  %v5456_v47 = vcombine.low %v284_v36, %v288_v37  ;;  %v5561_v49 = vcombine.high %v388_v44, %v392_v45  ;;  %v228_v37 = vld [vmem:[#allocation7 + $0x250] sm:$0xff] }
 0x1d9   :  { %3546 = vmatpush1.bf16.msra.mxu0 %v5368_v53  ;;  %v380_v53 = vld [vmem:[#allocation7 + $0x710] sm:$0xff] }
 0x1da   :  { %v2085_v2 = vpop.f32.mrf.mxu1  ;;  %3547 = vmatprep.subr.bf16.mxu0 %v5361_v56  ;;  %v5448_v56 = vcombine.low %v276_v42, %v280_v43 }
 0x1db   :  { %3587 = vmatpush1.bf16.msra.mxu1 %v5496_v55  ;;  %v384_v55 = vld [vmem:[#allocation7 + $0x730] sm:$0xff] }
 0x1dc   :  { %v2087_v7 = vpop.f32.mrf.mxu1  ;;  %3588 = vmatprep.subr.bf16.mxu1 %v5489_v58  ;;  %v5560_v58 = vcombine.low %v388_v44, %v392_v45  ;;  %v5553_v62 = vcombine.high %v380_v53, %v384_v55  ;;  %v220_v44 = vld [vmem:[#allocation7 + $0x210] sm:$0xff] }
 0x1dd   :  { %3548 = vmatpush1.bf16.msra.mxu0 %v5360_v3  ;;  %v376_v3 = vld [vmem:[#allocation7 + $0x6f0] sm:$0xff] }
 0x1de   :  { %v2089_v14 = vpop.f32.mrf.mxu1  ;;  %3549 = vmatprep.subr.bf16.mxu0 %v5353_v6  ;;  %v5552_v6 = vcombine.low %v380_v53, %v384_v55  ;;  %v224_v45 = vld [vmem:[#allocation7 + $0x230] sm:$0xff]  ;;  %v341_v53 = vld [vmem:[#allocation7 + $0x5d8] sm:$0xff] }
 0x1df   :  { %3589 = vmatpush1.bf16.msra.mxu1 %v5488_v5  ;;  %v5440_v5 = vcombine.low %v268_v50, %v272_v52  ;;  %v5432_v14 = vcombine.low %v260_v63, %v264_v0  ;;  %v5393_v50 = vcombine.high %v220_v44, %v224_v45  ;;  %v345_v55 = vld [vmem:[#allocation7 + $0x5f8] sm:$0xff] }
 0x1e0   :  { %v2090_v21 = vpop.f32.mrf.mxu1  ;;  %3590 = vmatprep.subr.bf16.mxu1 %v5481_v8  ;;  %v2044_v25 = vpop.f32.mrf.mxu0 }
 0x1e1   :  { %v6430_v27 = vadd.f32 %v2085_v2, %v2044_v25  ;;  %3550 = vmatpush1.bf16.msra.mxu0 %v5352_v16  ;;  %v372_v2 = vld [vmem:[#allocation7 + $0x6d0] sm:$0xff]  ;;  %v5424_v25 = vcombine.low %v252_v9, %v256_v10 }
 0x1e2   :  { %v2046_v61 = vpop.f32.mrf.mxu0  ;;  %3551 = vmatprep.subr.bf16.mxu0 %v5345_v20  ;;  %v5545_v8 = vcombine.high %v372_v2, %v376_v3  ;;  %v5544_v16 = vcombine.low %v372_v2, %v376_v3  ;;  %v5537_v20 = vcombine.high %v364_v12, %v368_v13  ;;  %v244_v21 = vld [vmem:[#allocation7 + $0x2d0] sm:$0xff]  ;;  %v333_v2 = vld [vmem:[#allocation7 + $0x598] sm:$0xff] }
 0x1e3   :  { %3591 = vmatpush1.bf16.msra.mxu1 %v5480_v18  ;;  %v6432_v31 = vadd.f32 %v2087_v7, %v2046_v61  ;;  %v5433_v7 = vcombine.high %v260_v63, %v264_v0  ;;  %v5425_v18 = vcombine.high %v252_v9, %v256_v10  ;;  %v236_v61 = vld [vmem:[#allocation7 + $0x290] sm:$0xff]  ;;  %v5515_v63 = vcombine.high %v341_v53, %v345_v55  ;;  %v337_v3 = vld [vmem:[#allocation7 + $0x5b8] sm:$0xff] }
 0x1e4   :  { %3592 = vmatprep.subr.bf16.mxu1 %v5473_v22  ;;  %v2048_v35 = vpop.f32.mrf.mxu0  ;;  %v248_v22 = vld [vmem:[#allocation7 + $0x2f0] sm:$0xff]  ;;  %v5507_v9 = vcombine.high %v333_v2, %v337_v3  ;;  %v325_v12 = vld [vmem:[#allocation7 + $0x558] sm:$0xff] }
 0x1e5   :  { %3552 = vmatpush1.bf16.msra.mxu0 %v5344_v28  ;;  %v5417_v26 = vcombine.high %v244_v21, %v248_v22  ;;  %v5529_v28 = vcombine.high %v356_v23, %v360_v24  ;;  %v5416_v33 = vcombine.low %v244_v21, %v248_v22  ;;  %v329_v13 = vld [vmem:[#allocation7 + $0x578] sm:$0xff] }
 0x1e6   :  { %v2049_v39 = vpop.f32.mrf.mxu0  ;;  %3553 = vmatprep.subr.bf16.mxu0 %v5337_v30  ;;  %v348_v30 = vld [vmem:[#allocation7 + $0x610] sm:$0xff]  ;;  %v317_v22 = vld [vmem:[#allocation7 + $0x518] sm:$0xff] }
 0x1e7   :  { %3593 = vmatpush1.bf16.msra.mxu1 %v5472_v29  ;;  %v240_v29 = vld [vmem:[#allocation7 + $0x2b0] sm:$0xff]  ;;  %v213_v39 = vld [vmem:[#allocation7 + $0x1d8] sm:$0xff] }
 0x1e8   :  { %3594 = vmatprep.subr.bf16.mxu1 %v5465_v32  ;;  %v352_v32 = vld [vmem:[#allocation7 + $0x630] sm:$0xff]  ;;  %v5409_v35 = vcombine.high %v236_v61, %v240_v29  ;;  %v321_v23 = vld [vmem:[#allocation7 + $0x538] sm:$0xff] }
 0x1e9   :  { %3554 = vmatpush1.bf16.msra.mxu0 %v5336_v38  ;;  %v5521_v36 = vcombine.high %v348_v30, %v352_v32  ;;  %v232_v38 = vld [vmem:[#allocation7 + $0x270] sm:$0xff]  ;;  %v173_v24 = vld [vmem:[#allocation7 + $0x98] sm:$0xff] }
 0x1ea   :  { %3555 = vmatprep.subr.bf16.mxu0 %v5329_v40  ;;  %v5408_v40 = vcombine.low %v236_v61, %v240_v29  ;;  %v5401_v42 = vcombine.high %v228_v37, %v232_v38  ;;  %v309_v29 = vld [vmem:[#allocation7 + $0x4d8] sm:$0xff] }
 0x1eb   :  { %3595 = vmatpush1.bf16.msra.mxu1 %v5464_v51  ;;  %v217_v51 = vld [vmem:[#allocation7 + $0x1f8] sm:$0xff] }
 0x1ec   :  { %3596 = vmatprep.subr.bf16.mxu1 %v5457_v41  ;;  %v5520_v41 = vcombine.low %v348_v30, %v352_v32  ;;  %v5387_v43 = vcombine.high %v213_v39, %v217_v51  ;;  %v165_v32 = vld [vmem:[#allocation7 + $0x58] sm:$0xff] }
 0x1ed   :  { %3556 = vmatpush1.bf16.msra.mxu0 %v5328_v46  ;;  %v205_v46 = vld [vmem:[#allocation7 + $0x198] sm:$0xff] }
 0x1ee   :  { %3557 = vmatprep.subr.bf16.mxu0 %v5449_v48  ;;  %v5400_v48 = vcombine.low %v228_v37, %v232_v38 }
 0x1ef   :  { %3597 = vmatpush1.bf16.msra.mxu1 %v5456_v47  ;;  %v209_v47 = vld [vmem:[#allocation7 + $0x1b8] sm:$0xff] }
 0x1f0   :  { %3602 = vmatprep.subr.bf16.mxu1 %v5561_v49  ;;  %v5386_v49 = vcombine.low %v213_v39, %v217_v51  ;;  %v5379_v52 = vcombine.high %v205_v46, %v209_v47 }
 0x1f1   :  { %3558 = vmatpush2.bf16.msra.mxu0 %v5448_v56  ;;  %v197_v56 = vld [vmem:[#allocation7 + $0x158] sm:$0xff] }
 0x1f2   :  { %3559 = vmatprep.subr.bf16.mxu0 %v5441_v60  ;;  %v5392_v60 = vcombine.low %v220_v44, %v224_v45  ;;  %v157_v45 = vld [vmem:[#allocation7 + $0x18] sm:$0xff] }
 0x1f3   :  { %3603 = vmatpush2.bf16.msra.mxu1 %v5560_v58  ;;  %v201_v58 = vld [vmem:[#allocation7 + $0x178] sm:$0xff] }
 0x1f4   :  { %3604 = vmatprep.subr.bf16.mxu1 %v5553_v62  ;;  %v5378_v62 = vcombine.low %v205_v46, %v209_v47  ;;  %v5371_v0 = vcombine.high %v197_v56, %v201_v58  ;;  %v161_v46 = vld [vmem:[#allocation7 + $0x38] sm:$0xff] }
 0x1f5   :  { %3560 = vmatpush2.bf16.msra.mxu0 %v5440_v5  ;;  %v189_v5 = vld [vmem:[#allocation7 + $0x118] sm:$0xff] }
 0x1f6   :  { %3561 = vmatprep.subr.bf16.mxu0 %v5433_v7  ;;  %v5514_v7 = vcombine.low %v341_v53, %v345_v55  ;;  %v5331_v55 = vcombine.high %v157_v45, %v161_v46 }
 0x1f7   :  { %3605 = vmatpush2.bf16.msra.mxu1 %v5552_v6  ;;  %v193_v6 = vld [vmem:[#allocation7 + $0x138] sm:$0xff] }
 0x1f8   :  { %3606 = vmatprep.subr.bf16.mxu1 %v5545_v8  ;;  %v5370_v8 = vcombine.low %v197_v56, %v201_v58  ;;  %v5363_v10 = vcombine.high %v189_v5, %v193_v6  ;;  %v293_v56 = vld [vmem:[#allocation7 + $0x458] sm:$0xff] }
 0x1f9   :  { %3562 = vmatpush2.bf16.msra.mxu0 %v5432_v14  ;;  %v181_v14 = vld [vmem:[#allocation7 + $0xd8] sm:$0xff] }
 0x1fa   :  { %3563 = vmatprep.subr.bf16.mxu0 %v5425_v18  ;;  %v5506_v18 = vcombine.low %v333_v2, %v337_v3  ;;  %v297_v58 = vld [vmem:[#allocation7 + $0x478] sm:$0xff] }
 0x1fb   :  { %3607 = vmatpush2.bf16.msra.mxu1 %v5544_v16  ;;  %v185_v16 = vld [vmem:[#allocation7 + $0xf8] sm:$0xff]  ;;  %v5467_v2 = vcombine.high %v293_v56, %v297_v58 }
 0x1fc   :  { %3608 = vmatprep.subr.bf16.mxu1 %v5537_v20  ;;  %v5499_v20 = vcombine.high %v325_v12, %v329_v13  ;;  %v5355_v21 = vcombine.high %v181_v14, %v185_v16 }
 0x1fd   :  { %3564 = vmatpush2.bf16.msra.mxu0 %v5424_v25  ;;  %v177_v25 = vld [vmem:[#allocation7 + $0xb8] sm:$0xff] }
 0x1fe   :  { %3565 = vmatprep.subr.bf16.mxu0 %v5417_v26  ;;  %v5354_v26 = vcombine.low %v181_v14, %v185_v16  ;;  %v5347_v61 = vcombine.high %v173_v24, %v177_v25  ;;  %v5346_v38 = vcombine.low %v173_v24, %v177_v25  ;;  %v389_v14 = vld [vmem:[#allocation7 + $0x758] sm:$0xff] }
 0x1ff   :  { %3609 = vmatpush2.bf16.msra.mxu1 %v5536_v1  ;;  %v5498_v1 = vcombine.low %v325_v12, %v329_v13  ;;  %v393_v16 = vld [vmem:[#allocation7 + $0x778] sm:$0xff] }
 0x200   :  { %3610 = vmatprep.subr.bf16.mxu1 %v5529_v28  ;;  %v5491_v28 = vcombine.high %v317_v22, %v321_v23  ;;  %v381_v24 = vld [vmem:[#allocation7 + $0x718] sm:$0xff] }
 0x201   :  { %3566 = vmatpush2.bf16.msra.mxu0 %v5416_v33  ;;  %v169_v33 = vld [vmem:[#allocation7 + $0x78] sm:$0xff] }
 0x202   :  { %3567 = vmatprep.subr.bf16.mxu0 %v5409_v35  ;;  %v5490_v35 = vcombine.low %v317_v22, %v321_v23  ;;  %v5563_v22 = vcombine.high %v389_v14, %v393_v16  ;;  %v385_v25 = vld [vmem:[#allocation7 + $0x738] sm:$0xff] }
 0x203   :  { %3611 = vmatpush2.bf16.msra.mxu1 %v5528_v34 }
 0x204   :  { %3612 = vmatprep.subr.bf16.mxu1 %v5521_v36 }
 0x205   :  { %3568 = vmatpush2.bf16.msra.mxu0 %v5408_v40  ;;  %v5339_v40 = vcombine.high %v165_v32, %v169_v33 }
 0x206   :  { %3569 = vmatprep.subr.bf16.mxu0 %v5401_v42  ;;  %v305_v42 = vld [vmem:[#allocation7 + $0x4b8] sm:$0xff] }
 0x207   :  { %3613 = vmatpush2.bf16.msra.mxu1 %v5520_v41  ;;  %v301_v41 = vld [vmem:[#allocation7 + $0x498] sm:$0xff] }
 0x208   :  { %3623 = vmatprep.subr.bf16.mxu1 %v5387_v43 }
 0x209   :  { %3570 = vmatpush2.bf16.msra.mxu0 %v5400_v48 }
 0x20a   :  { %3615 = vmatmul.mubr.bf16.vlgmr.msra.gmra.mxu1 %v6412_v11  ;;  %3571 = vmatprep.subr.bf16.mxu0 %v5393_v50  ;;  %v5338_v50 = vcombine.low %v165_v32, %v169_v33  ;;  %v377_v32 = vld [vmem:[#allocation7 + $0x6f8] sm:$0xff] }
 0x20b   :  { %3624 = vmatpush1.bf16.msra.mxu1 %v5386_v49  ;;  %3655 = vmatprep.mubr.bf16.mxu1 %v6402_v19  ;;  %v5362_v19 = vcombine.low %v189_v5, %v193_v6  ;;  %v285_v5 = vld [vmem:[#allocation7 + $0x418] sm:$0xff] }
 0x20c   :  { %3625 = vmatprep.subr.bf16.mxu1 %v5379_v52  ;;  %v5475_v52 = vcombine.high %v301_v41, %v305_v42  ;;  %v289_v6 = vld [vmem:[#allocation7 + $0x438] sm:$0xff] }
 0x20d   :  { %3572 = vmatpush2.bf16.msra.mxu0 %v5392_v60  ;;  %v277_v60 = vld [vmem:[#allocation7 + $0x3d8] sm:$0xff]  ;;  %v5459_v12 = vcombine.high %v285_v5, %v289_v6 }
 0x20e   :  { %3664 = vmatprep.subr.bf16.mxu0 %v5515_v63  ;;  %v5474_v63 = vcombine.low %v301_v41, %v305_v42  ;;  %v245_v33 = vld [vmem:[#allocation7 + $0x2d8] sm:$0xff] }
 0x20f   :  { %3626 = vmatpush1.bf16.msra.mxu1 %v5378_v62  ;;  %v281_v62 = vld [vmem:[#allocation7 + $0x3f8] sm:$0xff] }
 0x210   :  { %3627 = vmatprep.subr.bf16.mxu1 %v5371_v0  ;;  %3574 = vmatmul.mubr.bf16.vlgmr.msra.gmra.mxu0 %v6416_v17  ;;  %v5330_v0 = vcombine.low %v157_v45, %v161_v46  ;;  %v5451_v3 = vcombine.high %v277_v60, %v281_v62  ;;  %v237_v41 = vld [vmem:[#allocation7 + $0x298] sm:$0xff] }
 0x211   :  { %3665 = vmatpush1.bf16.msra.mxu0 %v5514_v7  ;;  %5567 = vmatprep.mubr.msk.bf16.mxu0 %vm1842_vm0, %v6399_v15  ;;  %v313_v15 = vld [vmem:[#allocation7 + $0x4f8] sm:$0xff] }
 0x212   :  { %3666 = vmatprep.subr.bf16.mxu0 %v5507_v9  ;;  %v5483_v39 = vcombine.high %v309_v29, %v313_v15  ;;  %v5482_v48 = vcombine.low %v309_v29, %v313_v15  ;;  %v269_v7 = vld [vmem:[#allocation7 + $0x398] sm:$0xff]  ;;  %v5466_v9 = vcombine.low %v293_v56, %v297_v58  ;;  %v5555_v29 = vcombine.high %v381_v24, %v385_v25 }
 0x213   :  { %3628 = vmatpush1.bf16.msra.mxu1 %v5370_v8  ;;  %v273_v8 = vld [vmem:[#allocation7 + $0x3b8] sm:$0xff] }
 0x214   :  { %3629 = vmatprep.subr.bf16.mxu1 %v5363_v10  ;;  %v5450_v10 = vcombine.low %v277_v60, %v281_v62  ;;  %v5443_v13 = vcombine.high %v269_v7, %v273_v8  ;;  %v241_v42 = vld [vmem:[#allocation7 + $0x2b8] sm:$0xff] }
 0x215   :  { %3667 = vmatpush1.bf16.msra.mxu0 %v5506_v18  ;;  %v261_v18 = vld [vmem:[#allocation7 + $0x358] sm:$0xff] }
 0x216   :  { %3668 = vmatprep.subr.bf16.mxu0 %v5499_v20  ;;  %v5458_v20 = vcombine.low %v285_v5, %v289_v6  ;;  %v349_v60 = vld [vmem:[#allocation7 + $0x618] sm:$0xff] }
 0x217   :  { %3630 = vmatpush1.bf16.msra.mxu1 %v5362_v19  ;;  %v265_v19 = vld [vmem:[#allocation7 + $0x378] sm:$0xff] }
 0x218   :  { %3631 = vmatprep.subr.bf16.mxu1 %v5355_v21  ;;  %v2167_v30 = vpop.f32.mrf.mxu0  ;;  %v5442_v21 = vcombine.low %v269_v7, %v273_v8  ;;  %v5435_v23 = vcombine.high %v261_v18, %v265_v19  ;;  %v353_v62 = vld [vmem:[#allocation7 + $0x638] sm:$0xff] }
 0x219   :  { %3669 = vmatpush1.bf16.msra.mxu0 %v5498_v1  ;;  %v253_v1 = vld [vmem:[#allocation7 + $0x318] sm:$0xff]  ;;  %v5523_v5 = vcombine.high %v349_v60, %v353_v62  ;;  %v5522_v7 = vcombine.low %v349_v60, %v353_v62  ;;  %v5877_v60 = vld [vmem:[#allocation11 + $0x104] ss:$8 sps:$4 sm:$0xff]  }
 0x21a   :  { %v2126_v34 = vpop.f32.mrf.mxu1  ;;  %v2169_v37 = vpop.f32.mrf.mxu0  ;;  %3670 = vmatprep.subr.bf16.mxu0 %v5491_v28  ;;  %v5562_v28 = vcombine.low %v389_v14, %v393_v16  ;;  %v5839_v14 = vld [vmem:[#allocation11 + $0x170] ss:$8 sps:$4 sm:$0xff]   ;;  %v5847_v16 = vld [vmem:[#allocation11 + $0x164] ss:$8 sps:$4 sm:$0xff]  }
 0x21b   :  { %v6439_v36 = vadd.f32 %v2167_v30, %v2126_v34  ;;  %3632 = vmatpush1.bf16.msra.mxu1 %v5354_v26  ;;  %v257_v26 = vld [vmem:[#allocation7 + $0x338] sm:$0xff] }
 0x21c   :  { %v2128_v51 = vpop.f32.mrf.mxu1  ;;  %3633 = vmatprep.subr.bf16.mxu1 %v5347_v61  ;;  %v2171_v44 = vpop.f32.mrf.mxu0  ;;  %v5434_v61 = vcombine.low %v261_v18, %v265_v19  ;;  %v5427_v15 = vcombine.high %v253_v1, %v257_v26  ;;  %v373_v30 = vld [vmem:[#allocation7 + $0x6d8] sm:$0xff]  ;;  %v5809_v18 = vld [vmem:[#allocation11 + $0x60] ss:$8 sps:$4 sm:$0xff]  }
 0x21d   :  { %v6441_v43 = vadd.f32 %v2169_v37, %v2128_v51  ;;  %3671 = vmatpush1.bf16.msra.mxu0 %v5490_v35  ;;  %v249_v34 = vld [vmem:[#allocation7 + $0x2f8] sm:$0xff]  ;;  %v5554_v35 = vcombine.low %v381_v24, %v385_v25  ;;  %v5426_v37 = vcombine.low %v253_v1, %v257_v26  ;;  %v5546_v44 = vcombine.low %v373_v30, %v377_v32  ;;  %v5859_v25 = vld [vmem:[#allocation11 + $0x144] ss:$8 sps:$4 sm:$0xff]  }
 0x21e   :  { %v2130_v47 = vpop.f32.mrf.mxu1  ;;  %v2172_v49 = vpop.f32.mrf.mxu0  ;;  %3672 = vmatprep.subr.bf16.mxu0 %v5483_v39  ;;  %v5419_v39 = vcombine.high %v245_v33, %v249_v34  ;;  %v365_v51 = vld [vmem:[#allocation7 + $0x698] sm:$0xff]  ;;  %v5418_v45 = vcombine.low %v245_v33, %v249_v34  ;;  %v5823_v33 = vld [vmem:[#allocation11 + $0x24] ss:$8 sps:$4 sm:$0xff]  }
 0x21f   :  { %3634 = vmatpush1.bf16.msra.mxu1 %v5346_v38  ;;  %v5547_v38 = vcombine.high %v373_v30, %v377_v32  ;;  %v5411_v47 = vcombine.high %v237_v41, %v241_v42  ;;  %v361_v49 = vld [vmem:[#allocation7 + $0x678] sm:$0xff] }
 0x220   :  { %v2131_v53 = vpop.f32.mrf.mxu1  ;;  %3635 = vmatprep.subr.bf16.mxu1 %v5339_v40  ;;  %v369_v40 = vld [vmem:[#allocation7 + $0x6b8] sm:$0xff] }
 0x221   :  { %3673 = vmatpush1.bf16.msra.mxu0 %v5482_v48  ;;  %v5539_v46 = vcombine.high %v365_v51, %v369_v40  ;;  %v357_v48 = vld [vmem:[#allocation7 + $0x658] sm:$0xff]  ;;  %v5538_v53 = vcombine.low %v365_v51, %v369_v40  ;;  %v5821_v51 = vld [vmem:[#allocation11 + $0x20] ss:$8 sps:$4 sm:$0xff]   ;;  %v6449_v40 = vld [vmem:[#allocation10] sm:$0xff] }
 0x222   :  { %3674 = vmatprep.subr.bf16.mxu0 %v5475_v52  ;;  %v233_v52 = vld [vmem:[#allocation7 + $0x278] sm:$0xff]  ;;  %v5531_v56 = vcombine.high %v357_v48, %v361_v49 }
 0x223   :  { %3636 = vmatpush1.bf16.msra.mxu1 %v5338_v50  ;;  %v229_v50 = vld [vmem:[#allocation7 + $0x258] sm:$0xff] }
 0x224   :  { %3637 = vmatprep.subr.bf16.mxu1 %v5331_v55  ;;  %v5410_v55 = vcombine.low %v237_v41, %v241_v42  ;;  %v5403_v58 = vcombine.high %v229_v50, %v233_v52  ;;  %v5814_v19 = vld [vmem:[#allocation11 + $0x54] ss:$8 sps:$4 sm:$0xff]   ;;  %v5851_v24 = vld [vmem:[#allocation11 + $0x150] ss:$8 sps:$4 sm:$0xff]  }
 0x225   :  { %3675 = vmatpush1.bf16.msra.mxu0 %v5474_v63  ;;  %v221_v63 = vld [vmem:[#allocation7 + $0x218] sm:$0xff] }
 0x226   :  { %3676 = vmatprep.subr.bf16.mxu0 %v5467_v2  ;;  %v5530_v2 = vcombine.low %v357_v48, %v361_v49  ;;  %v5820_v26 = vld [vmem:[#allocation11 + $0x34] ss:$8 sps:$4 sm:$0xff]   ;;  %v5818_v32 = vld [vmem:[#allocation11 + $0x30] ss:$8 sps:$4 sm:$0xff]  }
 0x227   :  { %3638 = vmatpush1.bf16.msra.mxu1 %v5330_v0  ;;  %v225_v0 = vld [vmem:[#allocation7 + $0x238] sm:$0xff] }
 0x228   :  { %3639 = vmatprep.subr.bf16.mxu1 %v5451_v3  ;;  %v5402_v3 = vcombine.low %v229_v50, %v233_v52  ;;  %v5395_v6 = vcombine.high %v221_v63, %v225_v0  ;;  %v5394_v8 = vcombine.low %v221_v63, %v225_v0  ;;  %v5863_v34 = vld [vmem:[#allocation11 + $0x130] ss:$8 sps:$4 sm:$0xff]   ;;  %v5826_v42 = vld [vmem:[#allocation11 + $0x14] ss:$8 sps:$4 sm:$0xff]   ;;  %v5827_v63 = vld [vmem:[#allocation11] ss:$8 sps:$4 sm:$0xff]  }
 0x229   :  { %3677 = vmatpush1.bf16.msra.mxu0 %v5466_v9  ;;  %v5808_v9 = vld [vmem:[#allocation11 + $0x74] ss:$8 sps:$4 sm:$0xff]   ;;  %v5824_v50 = vld [vmem:[#allocation11 + $0x10] ss:$8 sps:$4 sm:$0xff]  }
 0x22a   :  { %3678 = vmatprep.subr.bf16.mxu0 %v5459_v12  ;;  %v5806_v12 = vld [vmem:[#allocation11 + $0x70] ss:$8 sps:$4 sm:$0xff]  }
 0x22b   :  { %3640 = vmatpush2.bf16.msra.mxu1 %v5450_v10  ;;  %v5841_v10 = vld [vmem:[#allocation11 + $0x174] ss:$8 sps:$4 sm:$0xff]  }
 0x22c   :  { %3641 = vmatprep.subr.bf16.mxu1 %v5443_v13  ;;  %v5811_v13 = vld [vmem:[#allocation11 + $0x64] ss:$8 sps:$4 sm:$0xff]  }
 0x22d   :  { %3679 = vmatpush1.bf16.msra.mxu0 %v5458_v20  ;;  %v5845_v20 = vld [vmem:[#allocation11 + $0x160] ss:$8 sps:$4 sm:$0xff]  }
 0x22e   :  { %3684 = vmatprep.subr.bf16.mxu0 %v5563_v22  ;;  %v5812_v22 = vld [vmem:[#allocation11 + $0x50] ss:$8 sps:$4 sm:$0xff]  }
 0x22f   :  { %3642 = vmatpush2.bf16.msra.mxu1 %v5442_v21  ;;  %v5853_v21 = vld [vmem:[#allocation11 + $0x154] ss:$8 sps:$4 sm:$0xff]  }
 0x230   :  { %3643 = vmatprep.subr.bf16.mxu1 %v5435_v23  ;;  %v5817_v23 = vld [vmem:[#allocation11 + $0x44] ss:$8 sps:$4 sm:$0xff]  }
 0x231   :  { %3685 = vmatpush2.bf16.msra.mxu0 %v5562_v28  ;;  %v5857_v28 = vld [vmem:[#allocation11 + $0x140] ss:$8 sps:$4 sm:$0xff]  }
 0x232   :  { %3686 = vmatprep.subr.bf16.mxu0 %v5555_v29  ;;  %v5865_v29 = vld [vmem:[#allocation11 + $0x134] ss:$8 sps:$4 sm:$0xff]  }
 0x233   :  { %3644 = vmatpush2.bf16.msra.mxu1 %v5434_v61 }
 0x234   :  { %3645 = vmatprep.subr.bf16.mxu1 %v5427_v15 }
 0x235   :  { %3687 = vmatpush2.bf16.msra.mxu0 %v5554_v35 }
 0x236   :  { %3688 = vmatprep.subr.bf16.mxu0 %v5547_v38  ;;  %v5871_v38 = vld [vmem:[#allocation11 + $0x124] ss:$8 sps:$4 sm:$0xff]  }
 0x237   :  { %3646 = vmatpush2.bf16.msra.mxu1 %v5426_v37 }
 0x238   :  { %3647 = vmatprep.subr.bf16.mxu1 %v5419_v39 }
 0x239   :  { %3689 = vmatpush2.bf16.msra.mxu0 %v5546_v44  ;;  %v5869_v44 = vld [vmem:[#allocation11 + $0x120] ss:$8 sps:$4 sm:$0xff]  }
 0x23a   :  { %3690 = vmatprep.subr.bf16.mxu0 %v5539_v46 }
 0x23b   :  { %3648 = vmatpush2.bf16.msra.mxu1 %v5418_v45 }
 0x23c   :  { %3649 = vmatprep.subr.bf16.mxu1 %v5411_v47  ;;  %v5874_v47 = vld [vmem:[#allocation11 + $0x114] ss:$8 sps:$4 sm:$0xff]  }
 0x23d   :  { %3691 = vmatpush2.bf16.msra.mxu0 %v5538_v53 }
 0x23e   :  { %3692 = vmatprep.subr.bf16.mxu0 %v5531_v56  ;;  %v5829_v56 = vld [vmem:[#allocation11 + $0x4] ss:$8 sps:$4 sm:$0xff]  }
 0x23f   :  { %3650 = vmatpush2.bf16.msra.mxu1 %v5410_v55 }
 0x240   :  { %3651 = vmatprep.subr.bf16.mxu1 %v5403_v58  ;;  %v5872_v58 = vld [vmem:[#allocation11 + $0x110] ss:$8 sps:$4 sm:$0xff]  }
 0x241   :  { %3693 = vmatpush2.bf16.msra.mxu0 %v5530_v2 }
 0x242   :  { %3694 = vmatprep.subr.bf16.mxu0 %v5523_v5  ;;  %v5880_v5 = vld [vmem:[#allocation11 + $0x1f4] ss:$8 sps:$4 sm:$0xff]  }
 0x243   :  { %3652 = vmatpush2.bf16.msra.mxu1 %v5402_v3  ;;  %v5875_v3 = vld [vmem:[#allocation11 + $0x100] ss:$8 sps:$4 sm:$0xff]  }
 0x244   :  { %3653 = vmatprep.subr.bf16.mxu1 %v5395_v6  ;;  %v5830_v6 = vld [vmem:[#allocation11 + $0xf0] ss:$8 sps:$4 sm:$0xff]  }
 0x245   :  { %3695 = vmatpush2.bf16.msra.mxu0 %v5522_v7 }
 0x246   :  { %4583 = vmatprep.subr.bf16.mxu0 %v5808_v9  ;;  %v5878_v9 = vld [vmem:[#allocation11 + $0x1f0] ss:$8 sps:$4 sm:$0xff]  }
 0x247   :  { %3654 = vmatpush2.bf16.msra.mxu1 %v5394_v8  ;;  %v5835_v8 = vld [vmem:[#allocation11 + $0xe4] ss:$8 sps:$4 sm:$0xff]  }
 0x248   :  { %4624 = vmatprep.subr.bf16.mxu1 %v5841_v10  ;;  %3697 = vmatmul.mubr.bf16.vlgmr.msra.gmra.mxu0 %v6412_v11  ;;  %v5815_v11 = vld [vmem:[#allocation11 + $0x40] ss:$8 sps:$4 sm:$0xff]   ;;  %v5883_v10 = vld [vmem:[#allocation11 + $0x1e4] ss:$8 sps:$4 sm:$0xff]  }
 0x249   :  { %4584 = vmatpush1.bf16.msra.mxu0 %v5806_v12  ;;  %v5833_v12 = vld [vmem:[#allocation11 + $0xe0] ss:$8 sps:$4 sm:$0xff]  }
 0x24a   :  { %3656 = vmatmul.mubr.bf16.vlgmr.msra.gmra.mxu1 %v6416_v17  ;;  %4585 = vmatprep.subr.bf16.mxu0 %v5811_v13  ;;  %v3707_v17 = vlaneseq }
 0x24b   :  { %4625 = vmatpush1.bf16.msra.mxu1 %v5839_v14  ;;  %v5838_v14 = vld [vmem:[#allocation11 + $0xd4] ss:$8 sps:$4 sm:$0xff]  }
 0x24c   :  { %4626 = vmatprep.subr.bf16.mxu1 %v5847_v16  ;;  %v6446_v30 = vshrl.u32 %v3707_v17, 7  ;;  %v5881_v16 = vld [vmem:[#allocation11 + $0x1e0] ss:$8 sps:$4 sm:$0xff]  }
 0x24d   :  { %4586 = vmatpush1.bf16.msra.mxu0 %v5809_v18  ;;  %v5886_v18 = vld [vmem:[#allocation11 + $0x1d4] ss:$8 sps:$4 sm:$0xff]  }
 0x24e   :  { %4587 = vmatprep.subr.bf16.mxu0 %v5814_v19  ;;  %v3713_v37 = vsub.s32 1, %v6446_v30  ;;  %v3709_v53 = vsub.s32 0, %v6446_v30  ;;  %v5836_v19 = vld [vmem:[#allocation11 + $0xd0] ss:$8 sps:$4 sm:$0xff]  }
 0x24f   :  { %4627 = vmatpush1.bf16.msra.mxu1 %v5845_v20  ;;  %v5844_v20 = vld [vmem:[#allocation11 + $0xc4] ss:$8 sps:$4 sm:$0xff]  }
 0x250   :  { %4628 = vmatprep.subr.bf16.mxu1 %v5853_v21  ;;  %v3714_v46 = vrot.slane %v6449_v40, %v3713_v37  ;;  %v3710_v2 = vrot.slane %v6449_v40, %v3709_v53  ;;  %v5884_v21 = vld [vmem:[#allocation11 + $0x1d0] ss:$8 sps:$4 sm:$0xff]  }
 0x251   :  { %4588 = vmatpush1.bf16.msra.mxu0 %v5812_v22  ;;  %v5889_v22 = vld [vmem:[#allocation11 + $0x1c4] ss:$8 sps:$4 sm:$0xff]  }
 0x252   :  { %v3452_v1 = vpop.f32.mrf.mxu1  ;;  %4589 = vmatprep.subr.bf16.mxu0 %v5817_v23 }
 0x253   :  { %4629 = vmatpush1.bf16.msra.mxu1 %v5851_v24  ;;  %v5842_v24 = vld [vmem:[#allocation11 + $0xc0] ss:$8 sps:$4 sm:$0xff]  }
 0x254   :  { %v3454_v61 = vpop.f32.mrf.mxu1  ;;  %4630 = vmatprep.subr.bf16.mxu1 %v5859_v25 }
 0x255   :  { %4590 = vmatpush1.bf16.msra.mxu0 %v5815_v11  ;;  %v5850_v11 = vld [vmem:[#allocation11 + $0xb4] ss:$8 sps:$4 sm:$0xff]  }
 0x256   :  { %v3456_v15 = vpop.f32.mrf.mxu1  ;;  %4591 = vmatprep.subr.bf16.mxu0 %v5820_v26  ;;  %v5887_v26 = vld [vmem:[#allocation11 + $0x1c0] ss:$8 sps:$4 sm:$0xff]  }
 0x257   :  { %4631 = vmatpush1.bf16.msra.mxu1 %v5857_v28  ;;  %v5848_v15 = vld [vmem:[#allocation11 + $0xb0] ss:$8 sps:$4 sm:$0xff]  }
 0x258   :  { %v3457_v35 = vpop.f32.mrf.mxu1  ;;  %4632 = vmatprep.subr.bf16.mxu1 %v5865_v29  ;;  %v3411_v39 = vpop.f32.mrf.mxu0 }
 0x259   :  { %4592 = vmatpush1.bf16.msra.mxu0 %v5818_v32  ;;  %v3412_v52 = vadd.f32 %v3411_v39, %v6408_v54  ;;  %v5832_v54 = vld [vmem:[#allocation11 + $0xf4] ss:$8 sps:$4 sm:$0xff]   ;;  %v5856_v32 = vld [vmem:[#allocation11 + $0xa4] ss:$8 sps:$4 sm:$0xff]   ;;  %v5854_v35 = vld [vmem:[#allocation11 + $0xa0] ss:$8 sps:$4 sm:$0xff]  }
 0x25a   :  { %v3413_v41 = vpop.f32.mrf.mxu0  ;;  %4593 = vmatprep.subr.bf16.mxu0 %v5823_v33  ;;  %v5890_v33 = vld [vmem:[#allocation11 + $0x1b0] ss:$8 sps:$4 sm:$0xff]   ;;  %v5893_v39 = vld [vmem:[#allocation11 + $0x1a0] ss:$8 sps:$4 sm:$0xff]  }
 0x25b   :  { %4633 = vmatpush1.bf16.msra.mxu1 %v5863_v34  ;;  %v3414_v45 = vadd.f32 %v3413_v41, %v6410_v59  ;;  %v3453_v0 = vadd.f32 %v3452_v1, %v3412_v52  ;;  %v5895_v34 = vld [vmem:[#allocation11 + $0x1a4] ss:$8 sps:$4 sm:$0xff]   ;;  %v5898_v41 = vld [vmem:[#allocation11 + $0x194] ss:$8 sps:$4 sm:$0xff]   ;;  %v5899_v52 = vld [vmem:[#allocation11 + $0x180] ss:$8 sps:$4 sm:$0xff]  }
 0x25c   :  { %4634 = vmatprep.subr.bf16.mxu1 %v5871_v38  ;;  %v3415_v48 = vpop.f32.mrf.mxu0  ;;  %v5862_v38 = vld [vmem:[#allocation11 + $0x94] ss:$8 sps:$4 sm:$0xff]  }
 0x25d   :  { %v3455_v49 = vadd.f32 %v3454_v61, %v3414_v45  ;;  %4594 = vmatpush1.bf16.msra.mxu0 %v5821_v51  ;;  %v6460_v7 = vadd.f32 %v3710_v2, %v3453_v0  ;;  %v5892_v61 = vld [vmem:[#allocation11 + $0x1b4] ss:$8 sps:$4 sm:$0xff]   ;;  %v5908_v0 = vld [vmem:[#allocation11 + $0x250] ss:$8 sps:$4 sm:$0xff]   ;;  %v3717_v2 = vsub.s32 2, %v6446_v30 }
 0x25e   :  { %v3416_v55 = vpop.f32.mrf.mxu0  ;;  %4595 = vmatprep.subr.bf16.mxu0 %v5826_v42  ;;  %v5860_v42 = vld [vmem:[#allocation11 + $0x90] ss:$8 sps:$4 sm:$0xff]  }
 0x25f   :  { %4635 = vmatpush1.bf16.msra.mxu1 %v5869_v44  ;;  %v3748_v59 = vadd.f32 %v3714_v46, %v3455_v49  ;;  %v3763_v13 = vmul.f32 0.70710677, %v6460_v7  ;;  %v5868_v44 = vld [vmem:[#allocation11 + $0x84] ss:$8 sps:$4 sm:$0xff]   ;;  %v5896_v46 = vld [vmem:[#allocation11 + $0x190] ss:$8 sps:$4 sm:$0xff]  }
 0x260   :  { %4636 = vmatprep.subr.bf16.mxu1 %v5874_v47  ;;  %v5901_v47 = vld [vmem:[#allocation11 + $0x184] ss:$8 sps:$4 sm:$0xff]   ;;  %v3755_v48 = vmul.f32 0.5, %v6460_v7  ;;  %v5866_v49 = vld [vmem:[#allocation11 + $0x80] ss:$8 sps:$4 sm:$0xff]  }
 0x261   :  { %v3764_v62 = vmul.f32 0.70710677, %v3748_v59  ;;  %4596 = vmatpush1.bf16.msra.mxu0 %v5824_v50  ;;  %v3756_v25 = vmul.f32 0.5, %v3748_v59  ;;  %v5904_v55 = vld [vmem:[#allocation11 + $0x274] ss:$8 sps:$4 sm:$0xff]  }
 0x262   :  { %4597 = vmatprep.subr.bf16.mxu0 %v5829_v56  ;;  %v5949_v56 = vld [vmem:[#allocation11 + $0x374] ss:$8 sps:$4 sm:$0xff]   ;;  %v5911_v7 = vld [vmem:[#allocation11 + $0x240] ss:$8 sps:$4 sm:$0xff]  }
 0x263   :  { %4637 = vmatpush1.bf16.msra.mxu1 %v5872_v58  ;;  %6014 = verf.f32 %v3764_v62  ;;  %v5902_v58 = vld [vmem:[#allocation11 + $0x270] ss:$8 sps:$4 sm:$0xff]   ;;  %v5905_v62 = vld [vmem:[#allocation11 + $0x260] ss:$8 sps:$4 sm:$0xff]  }
 0x264   :  { %4638 = vmatprep.subr.bf16.mxu1 %v5877_v60  ;;  %6016 = verf.f32 %v3763_v13  ;;  %v5907_v60 = vld [vmem:[#allocation11 + $0x264] ss:$8 sps:$4 sm:$0xff]  }
 0x265   :  { %4598 = vmatpush1.bf16.msra.mxu0 %v5827_v63  ;;  %v5910_v63 = vld [vmem:[#allocation11 + $0x254] ss:$8 sps:$4 sm:$0xff]  }
 0x266   :  { %4599 = vmatprep.subr.bf16.mxu0 %v5832_v54  ;;  %v5913_v54 = vld [vmem:[#allocation11 + $0x244] ss:$8 sps:$4 sm:$0xff]  }
 0x267   :  { %4639 = vmatpush1.bf16.msra.mxu1 %v5875_v3 }
 0x268   :  { %4640 = vmatprep.subr.bf16.mxu1 %v5880_v5  ;;  %v3721_v5 = vsub.s32 3, %v6446_v30 }
 0x269   :  { %4600 = vmatpush2.bf16.msra.mxu0 %v5830_v6 }
 0x26a   :  { %4601 = vmatprep.subr.bf16.mxu0 %v5835_v8 }
 0x26b   :  { %4641 = vmatpush2.bf16.msra.mxu1 %v5878_v9  ;;  %v3718_v9 = vrot.slane %v6449_v40, %v3717_v2  ;;  %v5956_v2 = vld [vmem:[#allocation11 + $0x350] ss:$8 sps:$4 sm:$0xff]  }
 0x26c   :  { %4642 = vmatprep.subr.bf16.mxu1 %v5883_v10 }
 0x26d   :  { %4602 = vmatpush2.bf16.msra.mxu0 %v5833_v12  ;;  %v5916_v12 = vld [vmem:[#allocation11 + $0x234] ss:$8 sps:$4 sm:$0xff]  }
 0x26e   :  { %4603 = vmatprep.subr.bf16.mxu0 %v5838_v14 }
 0x26f   :  { %4643 = vmatpush2.bf16.msra.mxu1 %v5881_v16 }
 0x270   :  { %4644 = vmatprep.subr.bf16.mxu1 %v5886_v18  ;;  %v6015_v23 = vpop.eup %6014  ;;  %v3722_v18 = vrot.slane %v6449_v40, %v3721_v5  ;;  %v5946_v5 = vld [vmem:[#allocation11 + $0x294] ss:$8 sps:$4 sm:$0xff]  }
 0x271   :  { %4604 = vmatpush2.bf16.msra.mxu0 %v5836_v19  ;;  %v3780_v1 = vadd.f32 1.0, %v6015_v23  ;;  %v6017_v51 = vpop.eup %6016 }
 0x272   :  { %4605 = vmatprep.subr.bf16.mxu0 %v5844_v20  ;;  %v3779_v45 = vadd.f32 1.0, %v6017_v51 }
 0x273   :  { %4645 = vmatpush2.bf16.msra.mxu1 %v5884_v21  ;;  %v3788_v28 = vmul.f32 %v3780_v1, %v3756_v25  ;;  %v5914_v21 = vld [vmem:[#allocation11 + $0x230] ss:$8 sps:$4 sm:$0xff]  }
 0x274   :  { %4646 = vmatprep.subr.bf16.mxu1 %v5889_v22  ;;  %v3787_v50 = vmul.f32 %v3779_v45, %v3755_v48  ;;  %v5934_v45 = vld [vmem:[#allocation11 + $0x2d4] ss:$8 sps:$4 sm:$0xff]   ;;  %v5932_v48 = vld [vmem:[#allocation11 + $0x2d0] ss:$8 sps:$4 sm:$0xff]  }
 0x275   :  { %4606 = vmatpush2.bf16.msra.mxu0 %v5842_v24  ;;  %v3796_v29 = vpack.c.bf16 %v3788_v28, %v3788_v28 }
 0x276   :  { %4607 = vmatprep.subr.bf16.mxu0 %v5850_v11  ;;  %v3795_v59 = vpack.c.bf16 %v3787_v50, %v3787_v50  ;;  %v5937_v50 = vld [vmem:[#allocation11 + $0x2c4] ss:$8 sps:$4 sm:$0xff]  }
 0x277   :  { %4647 = vmatpush2.bf16.msra.mxu1 %v5887_v26  ;;  %4615 = vmatprep.mubr.bf16.mxu0 %v3796_v29  ;;  %v5917_v26 = vld [vmem:[#allocation11 + $0x220] ss:$8 sps:$4 sm:$0xff]   ;;  %v5925_v29 = vld [vmem:[#allocation11 + $0x204] ss:$8 sps:$4 sm:$0xff]  }
 0x278   :  { %4648 = vmatprep.subr.bf16.mxu1 %v5892_v61  ;;  %v5920_v61 = vld [vmem:[#allocation11 + $0x210] ss:$8 sps:$4 sm:$0xff]  }
 0x279   :  { %4608 = vmatpush2.bf16.msra.mxu0 %v5848_v15  ;;  %v5923_v15 = vld [vmem:[#allocation11 + $0x200] ss:$8 sps:$4 sm:$0xff]  }
 0x27a   :  { %4609 = vmatprep.subr.bf16.mxu0 %v5856_v32  ;;  %v5928_v32 = vld [vmem:[#allocation11 + $0x2f4] ss:$8 sps:$4 sm:$0xff]  }
 0x27b   :  { %4649 = vmatpush2.bf16.msra.mxu1 %v5890_v33  ;;  %v5926_v33 = vld [vmem:[#allocation11 + $0x2f0] ss:$8 sps:$4 sm:$0xff]  }
 0x27c   :  { %4650 = vmatprep.subr.bf16.mxu1 %v5895_v34  ;;  %v5931_v34 = vld [vmem:[#allocation11 + $0x2e4] ss:$8 sps:$4 sm:$0xff]  }
 0x27d   :  { %4610 = vmatpush2.bf16.msra.mxu0 %v5854_v35 }
 0x27e   :  { %4611 = vmatprep.subr.bf16.mxu0 %v5862_v38 }
 0x27f   :  { %4651 = vmatpush2.bf16.msra.mxu1 %v5893_v39 }
 0x280   :  { %4652 = vmatprep.subr.bf16.mxu1 %v5898_v41  ;;  %v5929_v41 = vld [vmem:[#allocation11 + $0x2e0] ss:$8 sps:$4 sm:$0xff]  }
 0x281   :  { %4612 = vmatpush2.bf16.msra.mxu0 %v5860_v42 }
 0x282   :  { %4613 = vmatprep.subr.bf16.mxu0 %v5868_v44 }
 0x283   :  { %4653 = vmatpush2.bf16.msra.mxu1 %v5896_v46 }
 0x284   :  { %4654 = vmatprep.subr.bf16.mxu1 %v5901_v47 }
 0x285   :  { %4614 = vmatpush2.bf16.msra.mxu0 %v5866_v49 }
 0x286   :  { %4665 = vmatprep.subr.bf16.mxu0 %v5904_v55 }
 0x287   :  { %4655 = vmatpush2.bf16.msra.mxu1 %v5899_v52  ;;  %v5947_v52 = vld [vmem:[#allocation11 + $0x370] ss:$8 sps:$4 sm:$0xff]  }
 0x288   :  { %4706 = vmatprep.subr.bf16.mxu1 %v5949_v56  ;;  %4616 = vmatmul.mubr.bf16.vlgmr.msra.gmra.mxu0 %v3795_v59  ;;  %v5955_v56 = vld [vmem:[#allocation11 + $0x364] ss:$8 sps:$4 sm:$0xff]   ;;  %v5940_v59 = vld [vmem:[#allocation11 + $0x2b4] ss:$8 sps:$4 sm:$0xff]  }
 0x289   :  { %4666 = vmatpush1.bf16.msra.mxu0 %v5902_v58  ;;  %v5935_v58 = vld [vmem:[#allocation11 + $0x2c0] ss:$8 sps:$4 sm:$0xff]  }
 0x28a   :  { %4667 = vmatprep.subr.bf16.mxu0 %v5907_v60  ;;  %v5953_v60 = vld [vmem:[#allocation11 + $0x360] ss:$8 sps:$4 sm:$0xff]  }
 0x28d   :  { %4668 = vmatpush1.bf16.msra.mxu0 %v5905_v62  ;;  %v5958_v62 = vld [vmem:[#allocation11 + $0x354] ss:$8 sps:$4 sm:$0xff]  }
 0x28e   :  { %4669 = vmatprep.subr.bf16.mxu0 %v5910_v63  ;;  %v5938_v63 = vld [vmem:[#allocation11 + $0x2b0] ss:$8 sps:$4 sm:$0xff]  }
 0x290   :  { %v3534_v3 = vpop.f32.mrf.mxu0 }
 0x291   :  { %4670 = vmatpush1.bf16.msra.mxu0 %v5908_v0  ;;  %v5943_v0 = vld [vmem:[#allocation11 + $0x2a4] ss:$8 sps:$4 sm:$0xff]  }
 0x292   :  { %v3493_v6 = vpop.f32.mrf.mxu1  ;;  %v3536_v10 = vpop.f32.mrf.mxu0  ;;  %4671 = vmatprep.subr.bf16.mxu0 %v5913_v54  ;;  %v5961_v54 = vld [vmem:[#allocation11 + $0x344] ss:$8 sps:$4 sm:$0xff]  }
 0x293   :  { %v3494_v8 = vadd.f32 %v3493_v6, %v6421_v57  ;;  %v5919_v57 = vld [vmem:[#allocation11 + $0x224] ss:$8 sps:$4 sm:$0xff]   ;;  %v5959_v6 = vld [vmem:[#allocation11 + $0x340] ss:$8 sps:$4 sm:$0xff]  }
 0x294   :  { %v3495_v13 = vpop.f32.mrf.mxu1  ;;  %v3538_v19 = vpop.f32.mrf.mxu0 }
 0x295   :  { %v3535_v14 = vadd.f32 %v3534_v3, %v3494_v8  ;;  %v3496_v16 = vadd.f32 %v3495_v13, %v6423_v4  ;;  %4672 = vmatpush1.bf16.msra.mxu0 %v5911_v7  ;;  %v5922_v4 = vld [vmem:[#allocation11 + $0x214] ss:$8 sps:$4 sm:$0xff]   ;;  %v5941_v3 = vld [vmem:[#allocation11 + $0x2a0] ss:$8 sps:$4 sm:$0xff]   ;;  %v5944_v8 = vld [vmem:[#allocation11 + $0x290] ss:$8 sps:$4 sm:$0xff]  }
 0x296   :  { %v3497_v20 = vpop.f32.mrf.mxu1  ;;  %v3539_v24 = vpop.f32.mrf.mxu0  ;;  %4673 = vmatprep.subr.bf16.mxu0 %v5916_v12  ;;  %v5964_v7 = vld [vmem:[#allocation11 + $0x334] ss:$8 sps:$4 sm:$0xff]   ;;  %v5967_v12 = vld [vmem:[#allocation11 + $0x324] ss:$8 sps:$4 sm:$0xff]   ;;  %v5950_v13 = vld [vmem:[#allocation11 + $0x280] ss:$8 sps:$4 sm:$0xff]  }
 0x297   :  { %v3749_v22 = vadd.f32 %v3718_v9, %v3535_v14  ;;  %v3537_v23 = vadd.f32 %v3536_v10, %v3496_v16  ;;  %v5952_v9 = vld [vmem:[#allocation11 + $0x284] ss:$8 sps:$4 sm:$0xff]   ;;  %v5962_v10 = vld [vmem:[#allocation11 + $0x330] ss:$8 sps:$4 sm:$0xff]   ;;  %v5965_v14 = vld [vmem:[#allocation11 + $0x320] ss:$8 sps:$4 sm:$0xff]  }
 0x298   :  { %v3498_v25 = vpop.f32.mrf.mxu1  ;;  %v5970_v16 = vld [vmem:[#allocation11 + $0x314] ss:$8 sps:$4 sm:$0xff]   ;;  %v5973_v19 = vld [vmem:[#allocation11 + $0x304] ss:$8 sps:$4 sm:$0xff]  }
 0x299   :  { %v3765_v1 = vmul.f32 0.70710677, %v3749_v22  ;;  %v3750_v11 = vadd.f32 %v3722_v18, %v3537_v23  ;;  %4674 = vmatpush1.bf16.msra.mxu0 %v5914_v21  ;;  %v3757_v51 = vmul.f32 0.5, %v3749_v22  ;;  %v5968_v18 = vld [vmem:[#allocation11 + $0x310] ss:$8 sps:$4 sm:$0xff]  }
 0x29a   :  { %4675 = vmatprep.subr.bf16.mxu0 %v5919_v57  ;;  %v5971_v21 = vld [vmem:[#allocation11 + $0x300] ss:$8 sps:$4 sm:$0xff]   ;;  %v5976_v23 = vld [vmem:[#allocation11 + $0x3f4] ss:$8 sps:$4 sm:$0xff]   ;;  %v3725_v57 = vsub.s32 4, %v6446_v30 }
 0x29b   :  { %6018 = verf.f32 %v3765_v1  ;;  %v3766_v28 = vmul.f32 0.70710677, %v3750_v11  ;;  %v3758_v42 = vmul.f32 0.5, %v3750_v11  ;;  %v5974_v25 = vld [vmem:[#allocation11 + $0x3f0] ss:$8 sps:$4 sm:$0xff]   ;;  %v3729_v11 = vsub.s32 5, %v6446_v30 }
 0x29d   :  { %6020 = verf.f32 %v3766_v28  ;;  %4676 = vmatpush1.bf16.msra.mxu0 %v5917_v26  ;;  %v5979_v26 = vld [vmem:[#allocation11 + $0x3e4] ss:$8 sps:$4 sm:$0xff]  }
 0x29e   :  { %4677 = vmatprep.subr.bf16.mxu0 %v5922_v4 }
 0x2a1   :  { %4678 = vmatpush1.bf16.msra.mxu0 %v5920_v61  ;;  %v3726_v61 = vrot.slane %v6449_v40, %v3725_v57 }
 0x2a2   :  { %4679 = vmatprep.subr.bf16.mxu0 %v5925_v29 }
 0x2a5   :  { %4680 = vmatpush1.bf16.msra.mxu0 %v5923_v15  ;;  %v5977_v15 = vld [vmem:[#allocation11 + $0x3e0] ss:$8 sps:$4 sm:$0xff]  }
 0x2a6   :  { %4681 = vmatprep.subr.bf16.mxu0 %v5928_v32 }
 0x2a8   :  { %v6019_v35 = vpop.eup %6018 }
 0x2a9   :  { %v3781_v38 = vadd.f32 1.0, %v6019_v35  ;;  %4682 = vmatpush2.bf16.msra.mxu0 %v5926_v33  ;;  %v5982_v35 = vld [vmem:[#allocation11 + $0x3d4] ss:$8 sps:$4 sm:$0xff]  }
 0x2aa   :  { %v6021_v39 = vpop.eup %6020  ;;  %4683 = vmatprep.subr.bf16.mxu0 %v5931_v34  ;;  %v3730_v34 = vrot.slane %v6449_v40, %v3729_v11 }
 0x2ab   :  { %v3782_v44 = vadd.f32 1.0, %v6021_v39  ;;  %v3789_v46 = vmul.f32 %v3781_v38, %v3757_v51 }
 0x2ad   :  { %v3790_v47 = vmul.f32 %v3782_v44, %v3758_v42  ;;  %4684 = vmatpush2.bf16.msra.mxu0 %v5929_v41  ;;  %v3797_v55 = vpack.c.bf16 %v3789_v46, %v3789_v46  ;;  %v5980_v42 = vld [vmem:[#allocation11 + $0x3d0] ss:$8 sps:$4 sm:$0xff]  }
 0x2ae   :  { %4685 = vmatprep.subr.bf16.mxu0 %v5934_v45  ;;  %v5985_v45 = vld [vmem:[#allocation11 + $0x3c4] ss:$8 sps:$4 sm:$0xff]  }
 0x2af   :  { %v3798_v49 = vpack.c.bf16 %v3790_v47, %v3790_v47  ;;  %v5983_v47 = vld [vmem:[#allocation11 + $0x3c0] ss:$8 sps:$4 sm:$0xff]  }
 0x2b1   :  { %4656 = vmatprep.mubr.bf16.mxu1 %v3798_v49  ;;  %4686 = vmatpush2.bf16.msra.mxu0 %v5932_v48  ;;  %v5986_v48 = vld [vmem:[#allocation11 + $0x3b0] ss:$8 sps:$4 sm:$0xff]   ;;  %v5991_v49 = vld [vmem:[#allocation11 + $0x3a4] ss:$8 sps:$4 sm:$0xff]  }
 0x2b2   :  { %4657 = vmatmul.mubr.bf16.vlgmr.msra.gmra.mxu1 %v3797_v55  ;;  %4687 = vmatprep.subr.bf16.mxu0 %v5937_v50  ;;  %v5989_v50 = vld [vmem:[#allocation11 + $0x3a0] ss:$8 sps:$4 sm:$0xff]  }
 0x2b3   :  { %4707 = vmatpush1.bf16.msra.mxu1 %v5947_v52  ;;  %v5994_v52 = vld [vmem:[#allocation11 + $0x394] ss:$8 sps:$4 sm:$0xff]  }
 0x2b4   :  { %4708 = vmatprep.subr.bf16.mxu1 %v5955_v56  ;;  %v5992_v56 = vld [vmem:[#allocation11 + $0x390] ss:$8 sps:$4 sm:$0xff]  }
 0x2b5   :  { %4688 = vmatpush2.bf16.msra.mxu0 %v5935_v58 }
 0x2b6   :  { %4689 = vmatprep.subr.bf16.mxu0 %v5940_v59  ;;  %v5997_v59 = vld [vmem:[#allocation11 + $0x384] ss:$8 sps:$4 sm:$0xff]  }
 0x2b7   :  { %4709 = vmatpush1.bf16.msra.mxu1 %v5953_v60 }
 0x2b8   :  { %4710 = vmatprep.subr.bf16.mxu1 %v5958_v62 }
 0x2b9   :  { %4690 = vmatpush2.bf16.msra.mxu0 %v5938_v63 }
 0x2ba   :  { %4691 = vmatprep.subr.bf16.mxu0 %v5943_v0 }
 0x2bb   :  { %4711 = vmatpush1.bf16.msra.mxu1 %v5956_v2 }
 0x2bc   :  { %4712 = vmatprep.subr.bf16.mxu1 %v5961_v54  ;;  %v5995_v54 = vld [vmem:[#allocation11 + $0x380] ss:$8 sps:$4 sm:$0xff]  }
 0x2bd   :  { %4692 = vmatpush2.bf16.msra.mxu0 %v5941_v3 }
 0x2be   :  { %4693 = vmatprep.subr.bf16.mxu0 %v5946_v5 }
 0x2bf   :  { %4713 = vmatpush1.bf16.msra.mxu1 %v5959_v6 }
 0x2c0   :  { %4714 = vmatprep.subr.bf16.mxu1 %v5964_v7  ;;  %v3733_v7 = vsub.s32 6, %v6446_v30 }
 0x2c1   :  { %4694 = vmatpush2.bf16.msra.mxu0 %v5944_v8 }
 0x2c2   :  { %4695 = vmatprep.subr.bf16.mxu0 %v5952_v9  ;;  %v3737_v9 = vsub.s32 7, %v6446_v30  ;;  %v6009_v30 = vld [vmem:[#allocation13 + $0x10] sm:$0xff]  }
 0x2c3   :  { %4715 = vmatpush1.bf16.msra.mxu1 %v5962_v10 }
 0x2c4   :  { %4716 = vmatprep.subr.bf16.mxu1 %v5967_v12 }
 0x2c5   :  { %4696 = vmatpush2.bf16.msra.mxu0 %v5950_v13  ;;  %v3734_v13 = vrot.slane %v6449_v40, %v3733_v7  ;;  %v4953_v7 = vld [vmem:[#allocation14 + $0x70] sm:$0xff] }
 0x2c7   :  { %4717 = vmatpush1.bf16.msra.mxu1 %v5965_v14 }
 0x2c8   :  { %4718 = vmatprep.subr.bf16.mxu1 %v5970_v16 }
 0x2ca   :  { %v3616_v20 = vpop.f32.mrf.mxu1 }
 0x2cb   :  { %4719 = vmatpush1.bf16.msra.mxu1 %v5968_v18 }
 0x2cc   :  { %v3618_v22 = vpop.f32.mrf.mxu1  ;;  %4720 = vmatprep.subr.bf16.mxu1 %v5973_v19 }
 0x2ce   :  { %v3620_v24 = vpop.f32.mrf.mxu1 }
 0x2cf   :  { %4721 = vmatpush1.bf16.msra.mxu1 %v5971_v21 }
 0x2d0   :  { %v3621_v1 = vpop.f32.mrf.mxu1  ;;  %4722 = vmatprep.subr.bf16.mxu1 %v5976_v23  ;;  %v3575_v28 = vpop.f32.mrf.mxu0 }
 0x2d1   :  { %v3576_v4 = vadd.f32 %v3575_v28, %v6430_v27 }
 0x2d2   :  { %v3577_v29 = vpop.f32.mrf.mxu0 }
 0x2d3   :  { %4723 = vmatpush2.bf16.msra.mxu1 %v5974_v25  ;;  %v3617_v32 = vadd.f32 %v3616_v20, %v3576_v4  ;;  %v3578_v33 = vadd.f32 %v3577_v29, %v6432_v31  ;;  %v5988_v31 = vld [vmem:[#allocation11 + $0x3b4] ss:$8 sps:$4 sm:$0xff]   ;;  %v3738_v20 = vrot.slane %v6449_v40, %v3737_v9 }
 0x2d4   :  { %4724 = vmatprep.subr.bf16.mxu1 %v5979_v26  ;;  %v3579_v38 = vpop.f32.mrf.mxu0 }
 0x2d5   :  { %v3751_v39 = vadd.f32 %v3726_v61, %v3617_v32  ;;  %v3619_v51 = vadd.f32 %v3618_v22, %v3578_v33 }
 0x2d6   :  { %v3580_v41 = vpop.f32.mrf.mxu0 }
 0x2d7   :  { %4725 = vmatpush2.bf16.msra.mxu1 %v5977_v15  ;;  %v3767_v44 = vmul.f32 0.70710677, %v3751_v39  ;;  %v3752_v27 = vadd.f32 %v3730_v34, %v3619_v51  ;;  %v3759_v62 = vmul.f32 0.5, %v3751_v39  ;;  %v5998_v34 = vld [vmem:[#allocation13 + $0x78] sm:$0xff]  }
 0x2d8   :  { %4726 = vmatprep.subr.bf16.mxu1 %v5982_v35  ;;  %v5999_v35 = vld [vmem:[#allocation13 + $0x38] sm:$0xff]   ;;  %5714 = vmatprep.subr.bf16.mxu0 %v5998_v34  ;;  %v4947_v34 = vld [vmem:[#allocation14 + $0x40] sm:$0xff] }
 0x2d9   :  { %6022 = verf.f32 %v3767_v44  ;;  %v3768_v46 = vmul.f32 0.70710677, %v3752_v27  ;;  %v3760_v63 = vmul.f32 0.5, %v3752_v27  ;;  %v6001_v44 = vld [vmem:[#allocation13 + $0x30] sm:$0xff]   ;;  %v3931_v27 = vld [vmem:[%s6525_s6] sm:$0x3] }
 0x2db   :  { %4727 = vmatpush2.bf16.msra.mxu1 %v5980_v42  ;;  %6024 = verf.f32 %v3768_v46  ;;  %v6000_v42 = vld [vmem:[#allocation13 + $0x70] sm:$0xff]   ;;  %v3936_v46 = vrot.slane %v3931_v27, %v3709_v53 }
 0x2dc   :  { %4728 = vmatprep.subr.bf16.mxu1 %v5985_v45  ;;  %v6002_v45 = vld [vmem:[#allocation13 + $0x68] sm:$0xff]  }
 0x2df   :  { %4729 = vmatpush2.bf16.msra.mxu1 %v5983_v47  ;;  %v6003_v47 = vld [vmem:[#allocation13 + $0x28] sm:$0xff]  }
 0x2e0   :  { %4730 = vmatprep.subr.bf16.mxu1 %v5988_v31  ;;  %v3940_v31 = vrot.slane %v3931_v27, %v3713_v37  ;;  %v6010_v37 = vld [vmem:[#allocation13 + $0x48] sm:$0xff]   ;;  %v4939_v27 = vld [vmem:[#allocation14] sm:$0xff] }
 0x2e3   :  { %4731 = vmatpush2.bf16.msra.mxu1 %v5986_v48  ;;  %v6004_v48 = vld [vmem:[#allocation13 + $0x60] sm:$0xff]  }
 0x2e4   :  { %4732 = vmatprep.subr.bf16.mxu1 %v5991_v49 }
 0x2e6   :  { %v6023_v55 = vpop.eup %6022 }
 0x2e7   :  { %4733 = vmatpush2.bf16.msra.mxu1 %v5989_v50  ;;  %v3783_v58 = vadd.f32 1.0, %v6023_v55  ;;  %v6005_v50 = vld [vmem:[#allocation13 + $0x20] sm:$0xff]  }
 0x2e8   :  { %4734 = vmatprep.subr.bf16.mxu1 %v5994_v52  ;;  %v6025_v60 = vpop.eup %6024 }
 0x2e9   :  { %v3784_v0 = vadd.f32 1.0, %v6025_v60  ;;  %v3791_v2 = vmul.f32 %v3783_v58, %v3759_v62  ;;  %v6007_v62 = vld [vmem:[#allocation13 + $0x18] sm:$0xff]  }
 0x2eb   :  { %4735 = vmatpush2.bf16.msra.mxu1 %v5992_v56  ;;  %v3792_v3 = vmul.f32 %v3784_v0, %v3760_v63  ;;  %v3799_v6 = vpack.c.bf16 %v3791_v2, %v3791_v2  ;;  %v6008_v0 = vld [vmem:[#allocation13 + $0x50] sm:$0xff]   ;;  %v6011_v2 = vld [vmem:[#allocation13 + $0x8] sm:$0xff]  }
 0x2ec   :  { %4736 = vmatprep.subr.bf16.mxu1 %v5997_v59  ;;  %v6006_v59 = vld [vmem:[#allocation13 + $0x58] sm:$0xff]  }
 0x2ed   :  { %v3800_v5 = vpack.c.bf16 %v3792_v3, %v3792_v3  ;;  %v6013_v3 = vld [vmem:[#allocation13] sm:$0xff]  }
 0x2ef   :  { %4737 = vmatpush2.bf16.msra.mxu1 %v5995_v54  ;;  %4697 = vmatprep.mubr.bf16.mxu0 %v3800_v5  ;;  %v6012_v54 = vld [vmem:[#allocation13 + $0x40] sm:$0xff]   ;;  %v4954_v5 = vld [vmem:[#allocation14 + $0x78] sm:$0xff] }
 0x2f0   :  { %4698 = vmatmul.mubr.bf16.vlgmr.msra.gmra.mxu0 %v3799_v6  ;;  %v6268_v6 = vmov 0.0  }
 0x2f1   :  { %5715 = vmatpush3.bf16.msra.mxu0 %v5999_v35  ;;  %5753 = vmatprep.subr.mxu1 %v6268_v6  ;;  %v4946_v35 = vld [vmem:[#allocation14 + $0x38] sm:$0xff] }
 0x2f2   :  { %5716 = vmatprep.subr.bf16.mxu0 %v6000_v42  ;;  %v4941_v42 = vld [vmem:[#allocation14 + $0x10] sm:$0xff] }
 0x2f5   :  { %5717 = vmatpush3.bf16.msra.mxu0 %v6001_v44  ;;  %v4940_v44 = vld [vmem:[#allocation14 + $0x8] sm:$0xff] }
 0x2f6   :  { %5718 = vmatprep.subr.bf16.mxu0 %v6002_v45 }
 0x2f9   :  { %5719 = vmatpush3.bf16.msra.mxu0 %v6003_v47 }
 0x2fa   :  { %5720 = vmatprep.subr.bf16.mxu0 %v6004_v48 }
 0x2fd   :  { %5721 = vmatpush3.bf16.msra.mxu0 %v6005_v50 }
 0x2fe   :  { %5722 = vmatprep.subr.bf16.mxu0 %v6006_v59 }
 0x301   :  { %5723 = vmatpush3.bf16.msra.mxu0 %v6007_v62  ;;  %v5713_v62 = vld [vmem:[%s6529_s10] ss:$0 sm:$0xff] }
 0x302   :  { %5724 = vmatprep.subr.bf16.mxu0 %v6008_v0 }
 0x305   :  { %5725 = vmatpush3.bf16.msra.mxu0 %v6009_v30 }
 0x306   :  { %5726 = vmatprep.subr.bf16.mxu0 %v6010_v37 }
 0x308   :  { %v3698_v8 = vpop.f32.mrf.mxu0 }
 0x309   :  { %5727 = vmatpush3.bf16.msra.mxu0 %v6011_v2 }
 0x30a   :  { %v3657_v10 = vpop.f32.mrf.mxu1  ;;  %v3700_v14 = vpop.f32.mrf.mxu0  ;;  %5728 = vmatprep.subr.bf16.mxu0 %v6012_v54 }
 0x30b   :  { %v3658_v12 = vadd.f32 %v3657_v10, %v6439_v36 }
 0x30c   :  { %v3659_v16 = vpop.f32.mrf.mxu1  ;;  %v3702_v21 = vpop.f32.mrf.mxu0 }
 0x30d   :  { %v3699_v18 = vadd.f32 %v3698_v8, %v3658_v12  ;;  %v3660_v19 = vadd.f32 %v3659_v16, %v6441_v43  ;;  %5729 = vmatpush3.bf16.msra.mxu0 %v6013_v3 }
 0x30e   :  { %v3661_v22 = vpop.f32.mrf.mxu1  ;;  %v3703_v57 = vpop.f32.mrf.mxu0 }
 0x30f   :  { %v3753_v23 = vadd.f32 %v3734_v13, %v3699_v18  ;;  %v3701_v24 = vadd.f32 %v3700_v14, %v3660_v19 }
 0x310   :  { %v3662_v25 = vpop.f32.mrf.mxu1 }
 0x311   :  { %v3769_v1 = vmul.f32 0.70710677, %v3753_v23  ;;  %v3754_v11 = vadd.f32 %v3738_v20, %v3701_v24  ;;  %v3761_v61 = vmul.f32 0.5, %v3753_v23 }
 0x313   :  { %6026 = verf.f32 %v3769_v1  ;;  %v3770_v26 = vmul.f32 0.70710677, %v3754_v11  ;;  %v3762_v29 = vmul.f32 0.5, %v3754_v11 }
 0x315   :  { %6028 = verf.f32 %v3770_v26 }
 0x320   :  { %v6027_v36 = vpop.eup %6026 }
 0x321   :  { %v3785_v28 = vadd.f32 1.0, %v6027_v36 }
 0x322   :  { %v6029_v4 = vpop.eup %6028 }
 0x323   :  { %v3786_v15 = vadd.f32 1.0, %v6029_v4  ;;  %v3793_v43 = vmul.f32 %v3785_v28, %v3761_v61 }
 0x325   :  { %v3794_v32 = vmul.f32 %v3786_v15, %v3762_v29  ;;  %v3801_v33 = vpack.c.bf16 %v3793_v43, %v3793_v43  ;;  %v4952_v15 = vld [vmem:[#allocation14 + $0x68] sm:$0xff]  ;;  %v4951_v43 = vld [vmem:[#allocation14 + $0x60] sm:$0xff] }
 0x327   :  { %v3802_v40 = vpack.c.bf16 %v3794_v32, %v3794_v32  ;;  %v4950_v32 = vld [vmem:[#allocation14 + $0x58] sm:$0xff] }
 0x329   :  { %4738 = vmatprep.mubr.bf16.mxu1 %v3802_v40  ;;  %v4949_v40 = vld [vmem:[#allocation14 + $0x50] sm:$0xff] }
 0x32a   :  { %4739 = vmatmul.mubr.bf16.vlgmr.msra.gmra.mxu1 %v3801_v33  ;;  %v4948_v33 = vld [vmem:[#allocation14 + $0x48] sm:$0xff] }
 0x32b   :  { %5754 = vmatpush3.msra.mxu1 %v4954_v5  ;;  %5785 = vmatprep.mubr.msk.f32.mxu1 %vm6269_vm1, %v6268_v6 }
 0x32c   :  { %5755 = vmatprep.subr.mxu1 %v6268_v6 }
 0x32d   :  { %5756 = vmatpush3.msra.mxu1 %v4953_v7 }
 0x32e   :  { %5757 = vmatprep.subr.mxu1 %v6268_v6 }
 0x32f   :  { %5758 = vmatpush3.msra.mxu1 %v4952_v15 }
 0x330   :  { %5759 = vmatprep.subr.mxu1 %v6268_v6 }
 0x331   :  { %5760 = vmatpush3.msra.mxu1 %v4951_v43 }
 0x332   :  { %5761 = vmatprep.subr.mxu1 %v6268_v6 }
 0x333   :  { %5762 = vmatpush3.msra.mxu1 %v4950_v32 }
 0x334   :  { %5763 = vmatprep.subr.mxu1 %v6268_v6 }
 0x335   :  { %5764 = vmatpush3.msra.mxu1 %v4949_v40 }
 0x336   :  { %5765 = vmatprep.subr.mxu1 %v6268_v6 }
 0x337   :  { %5766 = vmatpush3.msra.mxu1 %v4948_v33 }
 0x338   :  { %5767 = vmatprep.subr.mxu1 %v6268_v6 }
 0x339   :  { %5768 = vmatpush3.msra.mxu1 %v4947_v34 }
 0x33a   :  { %5769 = vmatprep.subr.mxu1 %v6268_v6 }
 0x33b   :  { %5770 = vmatpush3.msra.mxu1 %v4946_v35 }
 0x33c   :  { %5771 = vmatprep.subr.mxu1 %v6268_v6 }
 0x348   :  { %v4617_v38 = vpop.f32.mrf.mxu0 }
 0x349   :  { %v4618_v49 = vadd.f32 %v4617_v38, %v3936_v46  ;;  %v4945_v38 = vld [vmem:[#allocation14 + $0x30] sm:$0xff]  ;;  %v5696_v46 = vld [vmem:[%s6527_s8] ss:$0 sm:$0xff]  ;;  %s6270_s8 = smov [#allocation16]  }
 0x34a   :  { %v4619_v39 = vpop.f32.mrf.mxu0  ;;  %5772 = vmatpush3.msra.mxu1 %v4945_v38  ;;  %s5053_s26 = sshll.u32 %s6270_s8, 4  ;;  %s5054_s26 = int_to_ptr.vmem [resolvable:$true] %s5053_s26 }
 0x34b   :  { %v4620_v55 = vadd.f32 %v4619_v39, %v3940_v31  ;;  %5773 = vmatprep.subr.mxu1 %v6268_v6  ;;  %v4944_v39 = vld [vmem:[#allocation14 + $0x28] sm:$0xff]  ;;  %s6200_s27 = scalar_lea.vmem %s5054_s26, 128  ;;  %p6205_p13 = scmp.lt.s32.totalorder %s5054_s26, %s5054_s26 }
 0x34c   :  { %v4621_v51 = vpop.f32.mrf.mxu0  ;;  %5774 = vmatpush3.msra.mxu1 %v4944_v39  ;;  %p6201_p12 = scmp.ne.s32.totalorder %s5054_s26, %s6200_s27  ;;  %p6206_p0 = scmp.lt.s32.totalorder %s6200_s27, %s6200_s27 }
 0x34d   :  { %5775 = vmatprep.subr.mxu1 %v6268_v6  ;;  %v4943_v51 = vld [vmem:[#allocation14 + $0x20] sm:$0xff] }
 0x34e   :  { %v4622_v41 = vpop.f32.mrf.mxu0  ;;  %5776 = vmatpush3.msra.mxu1 %v4943_v51  ;;  %p6207_p1 = por %p6206_p0, %p6205_p13 }
 0x34f   :  { %5777 = vmatprep.subr.mxu1 %v6268_v6  ;;  %v4942_v41 = vld [vmem:[#allocation14 + $0x18] sm:$0xff] }
 0x350   :  { %5778 = vmatpush3.msra.mxu1 %v4942_v41  ;;  %p6208_p2 = pnand %p6207_p1, %p6201_p12 }
 0x351   :  { %5779 = vmatprep.subr.mxu1 %v6268_v6 }
 0x352   :  { %5780 = vmatpush3.msra.mxu1 %v4941_v42 }
 0x353   :  { %5781 = vmatprep.subr.mxu1 %v6268_v6 }
 0x354   :  { %5782 = vmatpush3.msra.mxu1 %v4940_v44 }
 0x355   :  { %5783 = vmatprep.subr.mxu1 %v6268_v6 }
 0x356   :  { %5784 = vmatpush3.msra.mxu1 %v4939_v27 }
 0x372   :  { %v4658_v52 = vpop.f32.mrf.mxu1 }
 0x373   :  { %v4659_v56 = vadd.f32 %v4658_v52, %v4618_v49 }
 0x374   :  { %v4660_v58 = vpop.f32.mrf.mxu1 }
 0x375   :  { %v4661_v60 = vadd.f32 %v4660_v58, %v4620_v55 }
 0x376   :  { %v4662_v63 = vpop.f32.mrf.mxu1 }
 0x378   :  { %v4663_v53 = vpop.f32.mrf.mxu1 }
 0x3b0   :  { %v4699_v8 = vpop.f32.mrf.mxu0 }
 0x3b1   :  { %v4700_v13 = vadd.f32 %v4699_v8, %v4659_v56 }
 0x3b2   :  { %v4701_v9 = vpop.f32.mrf.mxu0 }
 0x3b3   :  { %v4702_v16 = vadd.f32 %v4701_v9, %v4661_v60  ;;  %v5034_v60 = vand.u32 127, %v3707_v17 }
 0x3b4   :  { %v4703_v10 = vpop.f32.mrf.mxu0 }
 0x3b5   :  { %vm5035_vm2 = vcmp.lt.s32.totalorder %v5034_v60, 4 }
 0x3b6   :  { %v4704_v12 = vpop.f32.mrf.mxu0 }
 0x3ea   :  { %v4740_v14 = vpop.f32.mrf.mxu1 }
 0x3eb   :  { %v4741_v18 = vadd.f32 %v4740_v14, %v4700_v13 }
 0x3ec   :  { %v4742_v19 = vpop.f32.mrf.mxu1 }
 0x3ed   :  { %v4749_v20 = vmul.f32 0.70710677, %v4741_v18  ;;  %v4743_v21 = vadd.f32 %v4742_v19, %v4702_v16  ;;  %v4747_v11 = vmul.f32 0.5, %v4741_v18 }
 0x3ee   :  { %v4744_v22 = vpop.f32.mrf.mxu1 }
 0x3ef   :  { %6030 = verf.f32 %v4749_v20  ;;  %v4750_v23 = vmul.f32 0.70710677, %v4743_v21  ;;  %v4748_v26 = vmul.f32 0.5, %v4743_v21 }
 0x3f0   :  { %v4745_v24 = vpop.f32.mrf.mxu1 }
 0x3f1   :  { %6032 = verf.f32 %v4750_v23 }
 0x3fc   :  { %v6031_v57 = vpop.eup %6030 }
 0x3fd   :  { %v4753_v25 = vadd.f32 1.0, %v6031_v57 }
 0x3fe   :  { %v6033_v1 = vpop.eup %6032 }
 0x3ff   :  { %v4754_v36 = vadd.f32 1.0, %v6033_v1  ;;  %v4755_v28 = vmul.f32 %v4753_v25, %v4747_v11 }
 0x401   :  { %v4756_v4 = vmul.f32 %v4754_v36, %v4748_v26  ;;  %v4757_v29 = vpack.c.bf16 %v4755_v28, %v4755_v28 }
 0x403   :  { %v4758_v61 = vpack.c.bf16 %v4756_v4, %v4756_v4 }
 0x405   :  { %4926 = vmatprep.mubr.bf16.mxu0 %v4758_v61 }
 0x406   :  { %4927 = vmatmul.mubr.bf16.vlgmr.msra.gmra.mxu0 %v4757_v29 }
 0x4c6   :  { %v5730_v45 = vpop.f32.mrf.mxu0 }
 0x4c8   :  { %v5731_v47 = vpop.f32.mrf.mxu0 }
 0x4c9   :  { %v5732_v31 = vadd.f32 %v5731_v47, %v5730_v45 }
 0x4ca   :  { %v5733_v48 = vpop.f32.mrf.mxu0 }
 0x4cb   :  { %v4929_v49 = vadd.f32 %v5732_v31, %v5696_v46 }
 0x4cc   :  { %v5734_v50 = vpop.f32.mrf.mxu0 }
 0x4cd   :  { %v4935_v52 = vmul.f32 0.70710677, %v4929_v49  ;;  %v4934_v56 = vmul.f32 0.5, %v4929_v49 }
 0x4cf   :  { %6034 = verf.f32 %v4935_v52 }
 0x4dc   :  { %v6035_v55 = vpop.eup %6034 }
 0x4dd   :  { %v4937_v58 = vadd.f32 1.0, %v6035_v55 }
 0x4df   :  { %v4938_v59 = vmul.f32 %v4937_v58, %v4934_v56 }
 0x4e1   :  { %5786 = vmatmul.mubr.f32.vlgmr.msra.gmra.mxu1 %v4938_v59 }
 0x5a1   :  { %v5028_v63 = vpop.f32.mrf.mxu1 }
 0x5a2   :  { %v5029_v53 = vadd.f32 %v5713_v62, %v5028_v63 }
 0x5a3   :  { %v5787_v0 = vpop.f32.mrf.mxu1 }
 0x5a4   :  { %5032 = vst [vmem:[#allocation16] sm:$0xff] %v5029_v53  ;;  %v5036_v30 = vsel %vm5035_vm2, %v5029_v53, -inf }
 0x5a5   :  { %5037 = vmax.xlane.f32.xlu0 %v5036_v30 }
 0x62e   :  { %v5038_v37 = vpop.xlane.xlu0 %5037 }
 0x62f   :  { %v5039_v2 = vsub.f32 %v5036_v30, %v5038_v37 }
 0x631   :  { %v5040_v54 = vmul.f32 1.442695, %v5039_v2 }
 0x633   :  { %6036 = vpow2.f32 %v5040_v54 }
 0x640   :  { %v6037_v3 = vpop.eup %6036 }
 0x641   :  { %5042 = vadd.xlane.f32.xlu0 %v6037_v3 }
 0x642   :  { %6211 = shalt.err (!%p6208_p2)
}
 0x643   :  { %5056 = dma.vmem_to_hbm [thread:$0]  %s5054_s26, 128, %s6530_s11, [#allocation4]  }
 0x644   :  { %s6271_s28 = smov [#allocation17]  }
 0x645   :  { %s5063_s29 = sshll.u32 %s6271_s28, 4  ;;  %s5064_s29 = int_to_ptr.vmem [resolvable:$true] %s5063_s29 }
 0x646   :  { %s6220_s30 = scalar_lea.vmem %s5064_s29, 128  ;;  %p6225_p4 = scmp.lt.s32.totalorder %s5064_s29, %s5064_s29 }
 0x647   :  { %p6221_p3 = scmp.ne.s32.totalorder %s5064_s29, %s6220_s30  ;;  %p6226_p5 = scmp.lt.s32.totalorder %s6220_s30, %s6220_s30 }
 0x649   :  { %p6227_p6 = por %p6226_p5, %p6225_p4 }
 0x64b   :  { %p6228_p7 = pnand %p6227_p6, %p6221_p3 }
 0x6ca   :  { %v5043_v17 = vpop.xlane.xlu0 %5042 }
 0x6cb   :  { %6038 = vrcp.f32 %v5043_v17 }
 0x6d8   :  { %v6039_v5 = vpop.eup %6038 }
 0x6d9   :  { %v5045_v6 = vmul.f32 %v6039_v5, %v6037_v3 }
 0x6db   :  { %5046 = vst [vmem:[#allocation17] sm:$0xff] %v5045_v6 }
 0x6dc   :  { %6231 = shalt.err (!%p6228_p7)
}
 0x6dd   :  { %5066 = dma.vmem_to_hbm [thread:$0]  %s5064_s29, 128, %s6531_s12, [#allocation18]  }
 0x6de   :  { %6250 = dma.done.wait [#allocation4], 128  }
 0x6df   :  { %6251 = vsyncadd [#allocation4], 4294967168 }
 0x6e0   :  { %6252 = dma.done.wait [#allocation18], 128  }
 0x6e1   :  { %6253 = vsyncadd [#allocation18], 4294967168 }
 0x6e2   :  { %5073 = vsyncpa [#allocation3], 1 }
 0x6e3   :  { %5074 = vsyncpa [#allocation6], 1 }
 0x6e4   :  { %5075 = vsyncpa [#allocation9], 1 }
 0x6e5   :  { %5076 = vsyncpa [#allocation12], 1 }
 0x6e6   :  { %5077 = vsyncpa [#allocation15], 1 }
 0x6e7   :  { %5078 = vsyncpa [#allocation4], 1 }
 0x6e8   :  { %5079 = vsyncpa [#allocation18], 1 }

</bundles_post_ra>
